<compile_context>
chip_gen: v6e
topology: v6e:2x2x1
jax: 0.10.0
libtpu: 0.0.40
codegen_flags: <defaults>
</compile_context>

<pallas_src>
import functools

import jax
import jax.numpy as jnp
from jax.experimental import pallas as pl
from jax.experimental.pallas import tpu as pltpu


def _srel_kernel(phi_ref, wv_ref, p_ref, w1w_ref, w1re_ref, w1im_ref,
                 b1_ref, w2_ref, b2_ref, s_out, rho_out,
                 *, n_step, ls, modulus):
    phi = phi_ref[...]                          # (Ls, TB)   batch on lanes
    b1 = b1_ref[...]                            # (hidden, 1)  (b1 + W1y^T y)
    w2 = w2_ref[...]                            # (hidden, 1)
    b2 = b2_ref[...]                            # (1, 1)

    # Step-invariant hidden-layer contribution from w (y & bias folded already).
    h_const = jnp.dot(w1w_ref[...], wv_ref[...],
                      preferred_element_type=jnp.float32) + b1      # (hidden, TB)

    for step in range(n_step):                  # small static step count
        s_re = modulus * jnp.cos(phi)           # (Ls, TB)
        s_im = modulus * jnp.sin(phi)

        # rho = Estimate_rho(cat(s.re, s.im, w.re, w.im, y))
        h = jnp.maximum(
            h_const
            + jnp.dot(w1re_ref[...], s_re, preferred_element_type=jnp.float32)
            + jnp.dot(w1im_ref[...], s_im, preferred_element_type=jnp.float32),
            0.0)                                                    # (hidden, TB)
        # N=1 output layer as VPU multiply + sublane reduction (no MXU pass).
        rho = jax.nn.sigmoid(jnp.sum(h * w2, axis=0, keepdims=True) + b2)  # (1, TB)

        # Gs / Hs via VPU broadcast-FMA over the Ls contraction axis.
        # p_ref[j] is the contiguous (4Ls, TB) slab [G_re|G_im|H_re|H_im] row j.
        pj = p_ref[0]
        t_re = pj * s_re[0:1, :]
        t_im = pj * s_im[0:1, :]
        for j in range(1, ls):
            pj = p_ref[j]
            t_re = t_re + pj * s_re[j:j + 1, :]
            t_im = t_im + pj * s_im[j:j + 1, :]

        Gs_re = t_re[0 * ls:1 * ls] - t_im[1 * ls:2 * ls]
        Gs_im = t_im[0 * ls:1 * ls] + t_re[1 * ls:2 * ls]
        Hs_re = t_re[2 * ls:3 * ls] - t_im[3 * ls:4 * ls]
        Hs_im = t_im[2 * ls:3 * ls] + t_re[3 * ls:4 * ls]

        # eta_sred: d/dphi of (s^H G s) / (s^H H s), s = modulus * exp(i phi)
        numer = jnp.sum(s_re * Gs_re + s_im * Gs_im, axis=0, keepdims=True)  # (1, TB)
        denom = jnp.sum(s_re * Hs_re + s_im * Hs_im, axis=0, keepdims=True)
        grad_num = 2.0 * (s_re * Gs_im - s_im * Gs_re)
        grad_den = 2.0 * (s_re * Hs_im - s_im * Hs_re)
        inv_d = pl.reciprocal(denom, approx=True)      # EUP vrcp
        inv_d = inv_d * (2.0 - denom * inv_d)          # one Newton step
        eta = (grad_num * denom - grad_den * numer) * (inv_d * inv_d)

        # Lane-dense per-step writeback (batch on the lane axis).
        base = 2 * ls * step
        s_out[base:base + ls, :] = s_re
        s_out[base + ls:base + 2 * ls, :] = s_im
        rho_out[step:step + 1, :] = rho

        phi = phi - rho * eta

    base = 2 * ls * n_step
    s_out[base:base + ls, :] = modulus * jnp.cos(phi)
    s_out[base + ls:base + 2 * ls, :] = modulus * jnp.sin(phi)


def srel_intra_phase1_rep_rho(phi_batch, w_batch, y, G_batch, H_batch,
                              params, *, n_step, modulus, hidden):
    B, Ls = phi_batch.shape
    Lw = w_batch.shape[1]
    W1, b1, W2, b2 = params

    # ---- wrapper-side packing (batch-on-lanes layout) ----------------------
    phi_t = phi_batch.astype(jnp.float32).T                         # (Ls, B)
    wv_t = jnp.concatenate([jnp.real(w_batch), jnp.imag(w_batch)],
                           axis=1).astype(jnp.float32).T            # (2Lw, B)

    # Packed real G/H matrix: P[j, c*Ls+k, b] = mat_c[b, k, j],
    # mat_c in (G_re, G_im, H_re, H_im).  No 2x block redundancy.
    P = jnp.concatenate([jnp.real(G_batch), jnp.imag(G_batch),
                         jnp.real(H_batch), jnp.imag(H_batch)],
                        axis=1)                                      # (B, 4Ls, Ls)
    P = jnp.transpose(P, (2, 1, 0)).astype(jnp.float32)              # (Ls, 4Ls, B)

    W1 = W1.astype(jnp.float32)
    W1reT = W1[:Ls, :].T                                             # (hidden, Ls)
    W1imT = W1[Ls:2 * Ls, :].T                                       # (hidden, Ls)
    W1wT = W1[2 * Ls:2 * Ls + 2 * Lw, :].T                           # (hidden, 2Lw)
    W1yT = W1[2 * Ls + 2 * Lw:, :].T                                 # (hidden, Ly)
    b1_eff = (b1.astype(jnp.float32)
              + W1yT @ y.astype(jnp.float32)).reshape(hidden, 1)     # y folded
    W2c = W2.astype(jnp.float32).reshape(hidden, 1)
    b2c = b2.astype(jnp.float32).reshape(1, 1)

    # ---- batch tiling: lane-dense blocks, >=2 grid blocks when B is large --
    bytes_per_col = 4 * (Ls + 2 * Lw + Ls * 4 * Ls
                         + 2 * (n_step + 1) * Ls + n_step)
    vmem_budget = 24 << 20                       # headroom under 32 MiB scoped
    tb_cap = max(128, (vmem_budget // (2 * bytes_per_col)) // 128 * 128)
    if B <= 128:
        TB = B                                   # single full-extent block
    else:
        desired = max(128, (B // 4) // 128 * 128)  # aim for >=2-4 blocks
        TB = min(tb_cap, desired, 1024)
    grid = (pl.cdiv(B, TB),)

    K2 = 2 * (n_step + 1) * Ls
    kernel = functools.partial(_srel_kernel, n_step=n_step, ls=Ls,
                               modulus=float(modulus))

    s_flat, rho_t = pl.pallas_call(
        kernel,
        grid=grid,
        in_specs=[
            pl.BlockSpec((Ls, TB), lambda i: (0, i)),                # phi^T
            pl.BlockSpec((2 * Lw, TB), lambda i: (0, i)),            # [w.re|w.im]^T
            pl.BlockSpec((Ls, 4 * Ls, TB), lambda i: (0, 0, i)),     # packed G/H
            pl.BlockSpec((hidden, 2 * Lw), lambda i: (0, 0)),        # W1 (w part)^T
            pl.BlockSpec((hidden, Ls), lambda i: (0, 0)),            # W1 (s.re)^T
            pl.BlockSpec((hidden, Ls), lambda i: (0, 0)),            # W1 (s.im)^T
            pl.BlockSpec((hidden, 1), lambda i: (0, 0)),             # b1 + W1y^T y
            pl.BlockSpec((hidden, 1), lambda i: (0, 0)),             # W2
            pl.BlockSpec((1, 1), lambda i: (0, 0)),                  # b2
        ],
        out_specs=[
            pl.BlockSpec((K2, TB), lambda i: (0, i)),                # [s.re|s.im] per step
            pl.BlockSpec((n_step, TB), lambda i: (0, i)),            # rho per step
        ],
        out_shape=(
            jax.ShapeDtypeStruct((K2, B), jnp.float32),
            jax.ShapeDtypeStruct((n_step, B), jnp.float32),
        ),
        compiler_params=pltpu.CompilerParams(
            dimension_semantics=("parallel",),
            vmem_limit_bytes=32 << 20),
    )(phi_t, wv_t, P, W1wT, W1reT, W1imT, b1_eff, W2c, b2c)

    s_bt = s_flat.T.reshape(B, n_step + 1, 2, Ls)
    s_stack = (s_bt[:, :, 0, :] + 1j * s_bt[:, :, 1, :]).astype(jnp.complex64)
    rho_stack = rho_t.T
    return {'s_stack_batch': s_stack, 'rho_stack_batch': rho_stack}


def srel_reference(phi, w, y, G, H, params, *, n_step, modulus):
    """Pure-JAX reference mirroring the PyTorch forward semantics."""
    W1, b1, W2, b2 = params
    B = phi.shape[0]
    s_list, rho_list = [], []
    for _ in range(n_step):
        s = modulus * jnp.exp(1j * phi)
        x = jnp.concatenate([jnp.real(s), jnp.imag(s),
                             jnp.real(w), jnp.imag(w),
                             jnp.tile(y[None, :], (B, 1))], axis=1)
        h = jnp.maximum(x @ W1 + b1[None, :], 0.0)
        rho = jax.nn.sigmoid(h @ W2 + b2[None, :])          # (B, 1)
        Gs = jnp.einsum('bkj,bj->bk', G, s)
        Hs = jnp.einsum('bkj,bj->bk', H, s)
        numer = jnp.real(jnp.sum(jnp.conj(s) * Gs, axis=-1, keepdims=True))
        denom = jnp.real(jnp.sum(jnp.conj(s) * Hs, axis=-1, keepdims=True))
        grad_num = 2.0 * jnp.imag(jnp.conj(s) * Gs)
        grad_den = 2.0 * jnp.imag(jnp.conj(s) * Hs)
        eta = (grad_num * denom - grad_den * numer) / (denom * denom)
        s_list.append(s)
        rho_list.append(rho[:, 0])
        phi = phi - rho * eta
    s_list.append(modulus * jnp.exp(1j * phi))
    return (jnp.stack(s_list, axis=1).astype(jnp.complex64),
            jnp.stack(rho_list, axis=1))


if __name__ == "__main__":
    # constants of the module
    constants = {'M': 4, 'Nt': 2, 'N': 4, 'N_step': 3,
                 'modulus': 1.0, 'Lw': 8, 'Ly': 8}
    B = 2
    Ls = constants['Nt'] * constants['N']      # 8
    Lw, Ly = constants['Lw'], constants['Ly']
    n_step = constants['N_step']
    modulus = constants['modulus']
    D = 2 * Ls + 2 * Lw + Ly                   # 40
    hidden = 32

    key = jax.random.PRNGKey(0)
    keys = jax.random.split(key, 12)

    phi_batch = jax.random.uniform(keys[0], (B, Ls), jnp.float32,
                                   minval=-jnp.pi, maxval=jnp.pi)
    w_batch = (jax.random.normal(keys[1], (B, Lw), jnp.float32)
               + 1j * jax.random.normal(keys[2], (B, Lw), jnp.float32)
               ).astype(jnp.complex64)
    y = jax.random.normal(keys[3], (Ly,), jnp.float32)

    A = (jax.random.normal(keys[4], (B, Ls, Ls), jnp.float32)
         + 1j * jax.random.normal(keys[5], (B, Ls, Ls), jnp.float32))
    Bm = (jax.random.normal(keys[6], (B, Ls, Ls), jnp.float32)
          + 1j * jax.random.normal(keys[7], (B, Ls, Ls), jnp.float32))
    G_batch = jnp.einsum('bij,bkj->bik', A, jnp.conj(A)).astype(jnp.complex64)
    H_batch = (jnp.einsum('bij,bkj->bik', Bm, jnp.conj(Bm))
               + Ls * jnp.eye(Ls, dtype=jnp.complex64)[None]).astype(jnp.complex64)

    # deterministic Estimate_rho parameters (Linear(D,hidden)-ReLU-Linear(hidden,1)-Sigmoid)
    W1 = 0.1 * jax.random.normal(keys[8], (D, hidden), jnp.float32)
    b1 = 0.01 * jax.random.normal(keys[9], (hidden,), jnp.float32)
    W2 = 0.1 * jax.random.normal(keys[10], (hidden, 1), jnp.float32)
    b2 = 0.01 * jax.random.normal(keys[11], (1,), jnp.float32)
    params = (W1, b1, W2, b2)

    out = srel_intra_phase1_rep_rho(phi_batch, w_batch, y, G_batch, H_batch,
                                    params, n_step=n_step, modulus=modulus,
                                    hidden=hidden)
    jax.block_until_ready(out)

    s_ref, rho_ref = srel_reference(phi_batch, w_batch, y, G_batch, H_batch,
                                    params, n_step=n_step, modulus=modulus)
    assert jnp.allclose(out['s_stack_batch'], s_ref, atol=1e-3, rtol=1e-3)
    assert jnp.allclose(out['rho_stack_batch'], rho_ref, atol=1e-3, rtol=1e-3)

    print("KERNEL_OK")
</pallas_src>

<mosaic_0001>
module attributes {stable_mosaic.version = 11 : i64} {
  func.func @_srel_kernel(%arg0: i32, %arg1: memref<8x2xf32, #tpu.memory_space<vmem>>, %arg2: memref<16x2xf32, #tpu.memory_space<vmem>>, %arg3: memref<8x32x2xf32, #tpu.memory_space<vmem>>, %arg4: memref<32x16xf32, #tpu.memory_space<vmem>>, %arg5: memref<32x8xf32, #tpu.memory_space<vmem>>, %arg6: memref<32x8xf32, #tpu.memory_space<vmem>>, %arg7: memref<32x1xf32, #tpu.memory_space<vmem>>, %arg8: memref<32x1xf32, #tpu.memory_space<vmem>>, %arg9: memref<1x1xf32, #tpu.memory_space<vmem>>, %arg10: memref<64x2xf32, #tpu.memory_space<vmem>>, %arg11: memref<3x2xf32, #tpu.memory_space<vmem>>) attributes {dimension_semantics = [#tpu.dimension_semantics<parallel>], iteration_bounds = array<i64: 1>, scalar_prefetch = 0 : i64, scratch_operands = 0 : i64, tpu.core_type = #tpu.core_type<tc>, window_params = [{transform_indices = @transform_0, window_bounds = array<i64: 8, 2>}, {transform_indices = @transform_1, window_bounds = array<i64: 16, 2>}, {transform_indices = @transform_2, window_bounds = array<i64: 8, 32, 2>}, {pipeline_mode = #tpu.pipeline_mode<synchronous>, transform_indices = @transform_3, window_bounds = array<i64: 32, 16>}, {pipeline_mode = #tpu.pipeline_mode<synchronous>, transform_indices = @transform_4, window_bounds = array<i64: 32, 8>}, {pipeline_mode = #tpu.pipeline_mode<synchronous>, transform_indices = @transform_5, window_bounds = array<i64: 32, 8>}, {pipeline_mode = #tpu.pipeline_mode<synchronous>, transform_indices = @transform_6, window_bounds = array<i64: 32, 1>}, {pipeline_mode = #tpu.pipeline_mode<synchronous>, transform_indices = @transform_7, window_bounds = array<i64: 32, 1>}, {pipeline_mode = #tpu.pipeline_mode<synchronous>, transform_indices = @transform_8, window_bounds = array<i64: 1, 1>}, {transform_indices = @transform_9, window_bounds = array<i64: 64, 2>}, {transform_indices = @transform_10, window_bounds = array<i64: 3, 2>}]} {
    %c0 = arith.constant 0 : index
    %c0_0 = arith.constant 0 : index
    %0 = vector.load %arg1[%c0, %c0_0] : memref<8x2xf32, #tpu.memory_space<vmem>>, vector<8x2xf32>
    %c0_1 = arith.constant 0 : index
    %c0_2 = arith.constant 0 : index
    %1 = vector.load %arg7[%c0_1, %c0_2] : memref<32x1xf32, #tpu.memory_space<vmem>>, vector<32x1xf32>
    %c0_3 = arith.constant 0 : index
    %c0_4 = arith.constant 0 : index
    %2 = vector.load %arg8[%c0_3, %c0_4] : memref<32x1xf32, #tpu.memory_space<vmem>>, vector<32x1xf32>
    %c0_5 = arith.constant 0 : index
    %c0_6 = arith.constant 0 : index
    %3 = vector.load %arg9[%c0_5, %c0_6] : memref<1x1xf32, #tpu.memory_space<vmem>>, vector<1x1xf32>
    %c0_7 = arith.constant 0 : index
    %c0_8 = arith.constant 0 : index
    %4 = vector.load %arg4[%c0_7, %c0_8] : memref<32x16xf32, #tpu.memory_space<vmem>>, vector<32x16xf32>
    %c0_9 = arith.constant 0 : index
    %c0_10 = arith.constant 0 : index
    %5 = vector.load %arg2[%c0_9, %c0_10] : memref<16x2xf32, #tpu.memory_space<vmem>>, vector<16x2xf32>
    %cst = arith.constant dense<0.000000e+00> : vector<32x2xf32>
    %6 = tpu.matmul %4, %5, %cst {dimension_numbers = #tpu.dot_dimension_numbers<[1], [0], [0], [1], [0, 0, 1, 1], [], []>} : vector<32x16xf32>, vector<16x2xf32>, vector<32x2xf32> -> vector<32x2xf32>
    %7 = vector.broadcast %1 : vector<32x1xf32> to vector<32x2xf32>
    %8 = arith.addf %6, %7 : vector<32x2xf32>
    %9 = math.cos %0 : vector<8x2xf32>
    %cst_11 = arith.constant 1.000000e+00 : f32
    %10 = vector.broadcast %cst_11 : f32 to vector<8x2xf32>
    %11 = arith.mulf %10, %9 : vector<8x2xf32>
    %12 = math.sin %0 : vector<8x2xf32>
    %cst_12 = arith.constant 1.000000e+00 : f32
    %13 = vector.broadcast %cst_12 : f32 to vector<8x2xf32>
    %14 = arith.mulf %13, %12 : vector<8x2xf32>
    %c0_13 = arith.constant 0 : index
    %c0_14 = arith.constant 0 : index
    %15 = vector.load %arg5[%c0_13, %c0_14] : memref<32x8xf32, #tpu.memory_space<vmem>>, vector<32x8xf32>
    %cst_15 = arith.constant dense<0.000000e+00> : vector<32x2xf32>
    %16 = tpu.matmul %15, %11, %cst_15 {dimension_numbers = #tpu.dot_dimension_numbers<[1], [0], [0], [1], [0, 0, 1, 1], [], []>} : vector<32x8xf32>, vector<8x2xf32>, vector<32x2xf32> -> vector<32x2xf32>
    %17 = arith.addf %8, %16 : vector<32x2xf32>
    %c0_16 = arith.constant 0 : index
    %c0_17 = arith.constant 0 : index
    %18 = vector.load %arg6[%c0_16, %c0_17] : memref<32x8xf32, #tpu.memory_space<vmem>>, vector<32x8xf32>
    %cst_18 = arith.constant dense<0.000000e+00> : vector<32x2xf32>
    %19 = tpu.matmul %18, %14, %cst_18 {dimension_numbers = #tpu.dot_dimension_numbers<[1], [0], [0], [1], [0, 0, 1, 1], [], []>} : vector<32x8xf32>, vector<8x2xf32>, vector<32x2xf32> -> vector<32x2xf32>
    %20 = arith.addf %17, %19 : vector<32x2xf32>
    %cst_19 = arith.constant 0.000000e+00 : f32
    %21 = vector.broadcast %cst_19 : f32 to vector<32x2xf32>
    %22 = arith.maximumf %20, %21 : vector<32x2xf32>
    %23 = vector.broadcast %2 : vector<32x1xf32> to vector<32x2xf32>
    %24 = arith.mulf %22, %23 : vector<32x2xf32>
    %cst_20 = arith.constant dense<0.000000e+00> : vector<2xf32>
    %25 = vector.multi_reduction <add>, %24, %cst_20 [0] : vector<32x2xf32> to vector<2xf32>
    %26 = vector.shape_cast %25 : vector<2xf32> to vector<1x2xf32>
    %27 = vector.broadcast %3 : vector<1x1xf32> to vector<1x2xf32>
    %28 = arith.addf %26, %27 : vector<1x2xf32>
    %29 = arith.negf %28 : vector<1x2xf32>
    %30 = math.exp %29 : vector<1x2xf32>
    %cst_21 = arith.constant 1.000000e+00 : f32
    %31 = vector.broadcast %cst_21 : f32 to vector<1x2xf32>
    %32 = arith.addf %31, %30 : vector<1x2xf32>
    %33 = arith.divf %31, %32 : vector<1x2xf32>
    %c0_22 = arith.constant 0 : index
    %c0_23 = arith.constant 0 : index
    %c0_24 = arith.constant 0 : index
    %34 = vector.load %arg3[%c0_22, %c0_23, %c0_24] : memref<8x32x2xf32, #tpu.memory_space<vmem>>, vector<1x32x2xf32>
    %35 = vector.shape_cast %34 : vector<1x32x2xf32> to vector<32x2xf32>
    %36 = vector.extract_strided_slice %11 {offsets = [0, 0], sizes = [1, 2], strides = [1, 1]} : vector<8x2xf32> to vector<1x2xf32>
    %37 = vector.broadcast %36 : vector<1x2xf32> to vector<32x2xf32>
    %38 = arith.mulf %35, %37 : vector<32x2xf32>
    %39 = vector.extract_strided_slice %14 {offsets = [0, 0], sizes = [1, 2], strides = [1, 1]} : vector<8x2xf32> to vector<1x2xf32>
    %40 = vector.broadcast %39 : vector<1x2xf32> to vector<32x2xf32>
    %41 = arith.mulf %35, %40 : vector<32x2xf32>
    %c1 = arith.constant 1 : index
    %c0_25 = arith.constant 0 : index
    %c0_26 = arith.constant 0 : index
    %42 = vector.load %arg3[%c1, %c0_25, %c0_26] : memref<8x32x2xf32, #tpu.memory_space<vmem>>, vector<1x32x2xf32>
    %43 = vector.shape_cast %42 : vector<1x32x2xf32> to vector<32x2xf32>
    %44 = vector.extract_strided_slice %11 {offsets = [1, 0], sizes = [1, 2], strides = [1, 1]} : vector<8x2xf32> to vector<1x2xf32>
    %45 = vector.broadcast %44 : vector<1x2xf32> to vector<32x2xf32>
    %46 = arith.mulf %43, %45 : vector<32x2xf32>
    %47 = arith.addf %38, %46 : vector<32x2xf32>
    %48 = vector.extract_strided_slice %14 {offsets = [1, 0], sizes = [1, 2], strides = [1, 1]} : vector<8x2xf32> to vector<1x2xf32>
    %49 = vector.broadcast %48 : vector<1x2xf32> to vector<32x2xf32>
    %50 = arith.mulf %43, %49 : vector<32x2xf32>
    %51 = arith.addf %41, %50 : vector<32x2xf32>
    %c2 = arith.constant 2 : index
    %c0_27 = arith.constant 0 : index
    %c0_28 = arith.constant 0 : index
    %52 = vector.load %arg3[%c2, %c0_27, %c0_28] : memref<8x32x2xf32, #tpu.memory_space<vmem>>, vector<1x32x2xf32>
    %53 = vector.shape_cast %52 : vector<1x32x2xf32> to vector<32x2xf32>
    %54 = vector.extract_strided_slice %11 {offsets = [2, 0], sizes = [1, 2], strides = [1, 1]} : vector<8x2xf32> to vector<1x2xf32>
    %55 = vector.broadcast %54 : vector<1x2xf32> to vector<32x2xf32>
    %56 = arith.mulf %53, %55 : vector<32x2xf32>
    %57 = arith.addf %47, %56 : vector<32x2xf32>
    %58 = vector.extract_strided_slice %14 {offsets = [2, 0], sizes = [1, 2], strides = [1, 1]} : vector<8x2xf32> to vector<1x2xf32>
    %59 = vector.broadcast %58 : vector<1x2xf32> to vector<32x2xf32>
    %60 = arith.mulf %53, %59 : vector<32x2xf32>
    %61 = arith.addf %51, %60 : vector<32x2xf32>
    %c3 = arith.constant 3 : index
    %c0_29 = arith.constant 0 : index
    %c0_30 = arith.constant 0 : index
    %62 = vector.load %arg3[%c3, %c0_29, %c0_30] : memref<8x32x2xf32, #tpu.memory_space<vmem>>, vector<1x32x2xf32>
    %63 = vector.shape_cast %62 : vector<1x32x2xf32> to vector<32x2xf32>
    %64 = vector.extract_strided_slice %11 {offsets = [3, 0], sizes = [1, 2], strides = [1, 1]} : vector<8x2xf32> to vector<1x2xf32>
    %65 = vector.broadcast %64 : vector<1x2xf32> to vector<32x2xf32>
    %66 = arith.mulf %63, %65 : vector<32x2xf32>
    %67 = arith.addf %57, %66 : vector<32x2xf32>
    %68 = vector.extract_strided_slice %14 {offsets = [3, 0], sizes = [1, 2], strides = [1, 1]} : vector<8x2xf32> to vector<1x2xf32>
    %69 = vector.broadcast %68 : vector<1x2xf32> to vector<32x2xf32>
    %70 = arith.mulf %63, %69 : vector<32x2xf32>
    %71 = arith.addf %61, %70 : vector<32x2xf32>
    %c4 = arith.constant 4 : index
    %c0_31 = arith.constant 0 : index
    %c0_32 = arith.constant 0 : index
    %72 = vector.load %arg3[%c4, %c0_31, %c0_32] : memref<8x32x2xf32, #tpu.memory_space<vmem>>, vector<1x32x2xf32>
    %73 = vector.shape_cast %72 : vector<1x32x2xf32> to vector<32x2xf32>
    %74 = vector.extract_strided_slice %11 {offsets = [4, 0], sizes = [1, 2], strides = [1, 1]} : vector<8x2xf32> to vector<1x2xf32>
    %75 = vector.broadcast %74 : vector<1x2xf32> to vector<32x2xf32>
    %76 = arith.mulf %73, %75 : vector<32x2xf32>
    %77 = arith.addf %67, %76 : vector<32x2xf32>
    %78 = vector.extract_strided_slice %14 {offsets = [4, 0], sizes = [1, 2], strides = [1, 1]} : vector<8x2xf32> to vector<1x2xf32>
    %79 = vector.broadcast %78 : vector<1x2xf32> to vector<32x2xf32>
    %80 = arith.mulf %73, %79 : vector<32x2xf32>
    %81 = arith.addf %71, %80 : vector<32x2xf32>
    %c5 = arith.constant 5 : index
    %c0_33 = arith.constant 0 : index
    %c0_34 = arith.constant 0 : index
    %82 = vector.load %arg3[%c5, %c0_33, %c0_34] : memref<8x32x2xf32, #tpu.memory_space<vmem>>, vector<1x32x2xf32>
    %83 = vector.shape_cast %82 : vector<1x32x2xf32> to vector<32x2xf32>
    %84 = vector.extract_strided_slice %11 {offsets = [5, 0], sizes = [1, 2], strides = [1, 1]} : vector<8x2xf32> to vector<1x2xf32>
    %85 = vector.broadcast %84 : vector<1x2xf32> to vector<32x2xf32>
    %86 = arith.mulf %83, %85 : vector<32x2xf32>
    %87 = arith.addf %77, %86 : vector<32x2xf32>
    %88 = vector.extract_strided_slice %14 {offsets = [5, 0], sizes = [1, 2], strides = [1, 1]} : vector<8x2xf32> to vector<1x2xf32>
    %89 = vector.broadcast %88 : vector<1x2xf32> to vector<32x2xf32>
    %90 = arith.mulf %83, %89 : vector<32x2xf32>
    %91 = arith.addf %81, %90 : vector<32x2xf32>
    %c6 = arith.constant 6 : index
    %c0_35 = arith.constant 0 : index
    %c0_36 = arith.constant 0 : index
    %92 = vector.load %arg3[%c6, %c0_35, %c0_36] : memref<8x32x2xf32, #tpu.memory_space<vmem>>, vector<1x32x2xf32>
    %93 = vector.shape_cast %92 : vector<1x32x2xf32> to vector<32x2xf32>
    %94 = vector.extract_strided_slice %11 {offsets = [6, 0], sizes = [1, 2], strides = [1, 1]} : vector<8x2xf32> to vector<1x2xf32>
    %95 = vector.broadcast %94 : vector<1x2xf32> to vector<32x2xf32>
    %96 = arith.mulf %93, %95 : vector<32x2xf32>
    %97 = arith.addf %87, %96 : vector<32x2xf32>
    %98 = vector.extract_strided_slice %14 {offsets = [6, 0], sizes = [1, 2], strides = [1, 1]} : vector<8x2xf32> to vector<1x2xf32>
    %99 = vector.broadcast %98 : vector<1x2xf32> to vector<32x2xf32>
    %100 = arith.mulf %93, %99 : vector<32x2xf32>
    %101 = arith.addf %91, %100 : vector<32x2xf32>
    %c7 = arith.constant 7 : index
    %c0_37 = arith.constant 0 : index
    %c0_38 = arith.constant 0 : index
    %102 = vector.load %arg3[%c7, %c0_37, %c0_38] : memref<8x32x2xf32, #tpu.memory_space<vmem>>, vector<1x32x2xf32>
    %103 = vector.shape_cast %102 : vector<1x32x2xf32> to vector<32x2xf32>
    %104 = vector.extract_strided_slice %11 {offsets = [7, 0], sizes = [1, 2], strides = [1, 1]} : vector<8x2xf32> to vector<1x2xf32>
    %105 = vector.broadcast %104 : vector<1x2xf32> to vector<32x2xf32>
    %106 = arith.mulf %103, %105 : vector<32x2xf32>
    %107 = arith.addf %97, %106 : vector<32x2xf32>
    %108 = vector.extract_strided_slice %14 {offsets = [7, 0], sizes = [1, 2], strides = [1, 1]} : vector<8x2xf32> to vector<1x2xf32>
    %109 = vector.broadcast %108 : vector<1x2xf32> to vector<32x2xf32>
    %110 = arith.mulf %103, %109 : vector<32x2xf32>
    %111 = arith.addf %101, %110 : vector<32x2xf32>
    %112 = vector.extract_strided_slice %107 {offsets = [0, 0], sizes = [8, 2], strides = [1, 1]} : vector<32x2xf32> to vector<8x2xf32>
    %113 = vector.extract_strided_slice %111 {offsets = [8, 0], sizes = [8, 2], strides = [1, 1]} : vector<32x2xf32> to vector<8x2xf32>
    %114 = arith.subf %112, %113 : vector<8x2xf32>
    %115 = vector.extract_strided_slice %111 {offsets = [0, 0], sizes = [8, 2], strides = [1, 1]} : vector<32x2xf32> to vector<8x2xf32>
    %116 = vector.extract_strided_slice %107 {offsets = [8, 0], sizes = [8, 2], strides = [1, 1]} : vector<32x2xf32> to vector<8x2xf32>
    %117 = arith.addf %115, %116 : vector<8x2xf32>
    %118 = vector.extract_strided_slice %107 {offsets = [16, 0], sizes = [8, 2], strides = [1, 1]} : vector<32x2xf32> to vector<8x2xf32>
    %119 = vector.extract_strided_slice %111 {offsets = [24, 0], sizes = [8, 2], strides = [1, 1]} : vector<32x2xf32> to vector<8x2xf32>
    %120 = arith.subf %118, %119 : vector<8x2xf32>
    %121 = vector.extract_strided_slice %111 {offsets = [16, 0], sizes = [8, 2], strides = [1, 1]} : vector<32x2xf32> to vector<8x2xf32>
    %122 = vector.extract_strided_slice %107 {offsets = [24, 0], sizes = [8, 2], strides = [1, 1]} : vector<32x2xf32> to vector<8x2xf32>
    %123 = arith.addf %121, %122 : vector<8x2xf32>
    %124 = arith.mulf %11, %114 : vector<8x2xf32>
    %125 = arith.mulf %14, %117 : vector<8x2xf32>
    %126 = arith.addf %124, %125 : vector<8x2xf32>
    %cst_39 = arith.constant dense<0.000000e+00> : vector<2xf32>
    %127 = vector.multi_reduction <add>, %126, %cst_39 [0] : vector<8x2xf32> to vector<2xf32>
    %128 = vector.shape_cast %127 : vector<2xf32> to vector<1x2xf32>
    %129 = arith.mulf %11, %120 : vector<8x2xf32>
    %130 = arith.mulf %14, %123 : vector<8x2xf32>
    %131 = arith.addf %129, %130 : vector<8x2xf32>
    %cst_40 = arith.constant dense<0.000000e+00> : vector<2xf32>
    %132 = vector.multi_reduction <add>, %131, %cst_40 [0] : vector<8x2xf32> to vector<2xf32>
    %133 = vector.shape_cast %132 : vector<2xf32> to vector<1x2xf32>
    %134 = arith.mulf %11, %117 : vector<8x2xf32>
    %135 = arith.mulf %14, %114 : vector<8x2xf32>
    %136 = arith.subf %134, %135 : vector<8x2xf32>
    %cst_41 = arith.constant 2.000000e+00 : f32
    %137 = vector.broadcast %cst_41 : f32 to vector<8x2xf32>
    %138 = arith.mulf %137, %136 : vector<8x2xf32>
    %139 = arith.mulf %11, %123 : vector<8x2xf32>
    %140 = arith.mulf %14, %120 : vector<8x2xf32>
    %141 = arith.subf %139, %140 : vector<8x2xf32>
    %cst_42 = arith.constant 2.000000e+00 : f32
    %142 = vector.broadcast %cst_42 : f32 to vector<8x2xf32>
    %143 = arith.mulf %142, %141 : vector<8x2xf32>
    %144 = tpu.reciprocal %133 {approx = true} : vector<1x2xf32> -> vector<1x2xf32>
    %145 = arith.mulf %133, %144 : vector<1x2xf32>
    %cst_43 = arith.constant 2.000000e+00 : f32
    %146 = vector.broadcast %cst_43 : f32 to vector<1x2xf32>
    %147 = arith.subf %146, %145 : vector<1x2xf32>
    %148 = arith.mulf %144, %147 : vector<1x2xf32>
    %149 = vector.broadcast %133 : vector<1x2xf32> to vector<8x2xf32>
    %150 = arith.mulf %138, %149 : vector<8x2xf32>
    %151 = vector.broadcast %128 : vector<1x2xf32> to vector<8x2xf32>
    %152 = arith.mulf %143, %151 : vector<8x2xf32>
    %153 = arith.subf %150, %152 : vector<8x2xf32>
    %154 = arith.mulf %148, %148 : vector<1x2xf32>
    %155 = vector.broadcast %154 : vector<1x2xf32> to vector<8x2xf32>
    %156 = arith.mulf %153, %155 : vector<8x2xf32>
    %c0_44 = arith.constant 0 : index
    %c0_45 = arith.constant 0 : index
    %157 = vector.load %arg10[%c0_44, %c0_45] : memref<64x2xf32, #tpu.memory_space<vmem>>, vector<8x2xf32>
    tpu.vector_store %arg10[%c0_44, %c0_45], %11 {strides = array<i32>} : memref<64x2xf32, #tpu.memory_space<vmem>>, vector<8x2xf32>,
    %c8 = arith.constant 8 : index
    %c0_46 = arith.constant 0 : index
    %158 = vector.load %arg10[%c8, %c0_46] : memref<64x2xf32, #tpu.memory_space<vmem>>, vector<8x2xf32>
    tpu.vector_store %arg10[%c8, %c0_46], %14 {strides = array<i32>} : memref<64x2xf32, #tpu.memory_space<vmem>>, vector<8x2xf32>,
    %c0_47 = arith.constant 0 : index
    %c0_48 = arith.constant 0 : index
    %159 = vector.load %arg11[%c0_47, %c0_48] : memref<3x2xf32, #tpu.memory_space<vmem>>, vector<1x2xf32>
    tpu.vector_store %arg11[%c0_47, %c0_48], %33 {strides = array<i32>} : memref<3x2xf32, #tpu.memory_space<vmem>>, vector<1x2xf32>,
    %160 = vector.broadcast %33 : vector<1x2xf32> to vector<8x2xf32>
    %161 = arith.mulf %160, %156 : vector<8x2xf32>
    %162 = arith.subf %0, %161 : vector<8x2xf32>
    %163 = math.cos %162 : vector<8x2xf32>
    %cst_49 = arith.constant 1.000000e+00 : f32
    %164 = vector.broadcast %cst_49 : f32 to vector<8x2xf32>
    %165 = arith.mulf %164, %163 : vector<8x2xf32>
    %166 = math.sin %162 : vector<8x2xf32>
    %cst_50 = arith.constant 1.000000e+00 : f32
    %167 = vector.broadcast %cst_50 : f32 to vector<8x2xf32>
    %168 = arith.mulf %167, %166 : vector<8x2xf32>
    %c0_51 = arith.constant 0 : index
    %c0_52 = arith.constant 0 : index
    %169 = vector.load %arg5[%c0_51, %c0_52] : memref<32x8xf32, #tpu.memory_space<vmem>>, vector<32x8xf32>
    %cst_53 = arith.constant dense<0.000000e+00> : vector<32x2xf32>
    %170 = tpu.matmul %169, %165, %cst_53 {dimension_numbers = #tpu.dot_dimension_numbers<[1], [0], [0], [1], [0, 0, 1, 1], [], []>} : vector<32x8xf32>, vector<8x2xf32>, vector<32x2xf32> -> vector<32x2xf32>
    %171 = arith.addf %8, %170 : vector<32x2xf32>
    %c0_54 = arith.constant 0 : index
    %c0_55 = arith.constant 0 : index
    %172 = vector.load %arg6[%c0_54, %c0_55] : memref<32x8xf32, #tpu.memory_space<vmem>>, vector<32x8xf32>
    %cst_56 = arith.constant dense<0.000000e+00> : vector<32x2xf32>
    %173 = tpu.matmul %172, %168, %cst_56 {dimension_numbers = #tpu.dot_dimension_numbers<[1], [0], [0], [1], [0, 0, 1, 1], [], []>} : vector<32x8xf32>, vector<8x2xf32>, vector<32x2xf32> -> vector<32x2xf32>
    %174 = arith.addf %171, %173 : vector<32x2xf32>
    %cst_57 = arith.constant 0.000000e+00 : f32
    %175 = vector.broadcast %cst_57 : f32 to vector<32x2xf32>
    %176 = arith.maximumf %174, %175 : vector<32x2xf32>
    %177 = vector.broadcast %2 : vector<32x1xf32> to vector<32x2xf32>
    %178 = arith.mulf %176, %177 : vector<32x2xf32>
    %cst_58 = arith.constant dense<0.000000e+00> : vector<2xf32>
    %179 = vector.multi_reduction <add>, %178, %cst_58 [0] : vector<32x2xf32> to vector<2xf32>
    %180 = vector.shape_cast %179 : vector<2xf32> to vector<1x2xf32>
    %181 = vector.broadcast %3 : vector<1x1xf32> to vector<1x2xf32>
    %182 = arith.addf %180, %181 : vector<1x2xf32>
    %183 = arith.negf %182 : vector<1x2xf32>
    %184 = math.exp %183 : vector<1x2xf32>
    %cst_59 = arith.constant 1.000000e+00 : f32
    %185 = vector.broadcast %cst_59 : f32 to vector<1x2xf32>
    %186 = arith.addf %185, %184 : vector<1x2xf32>
    %187 = arith.divf %185, %186 : vector<1x2xf32>
    %c0_60 = arith.constant 0 : index
    %c0_61 = arith.constant 0 : index
    %c0_62 = arith.constant 0 : index
    %188 = vector.load %arg3[%c0_60, %c0_61, %c0_62] : memref<8x32x2xf32, #tpu.memory_space<vmem>>, vector<1x32x2xf32>
    %189 = vector.shape_cast %188 : vector<1x32x2xf32> to vector<32x2xf32>
    %190 = vector.extract_strided_slice %165 {offsets = [0, 0], sizes = [1, 2], strides = [1, 1]} : vector<8x2xf32> to vector<1x2xf32>
    %191 = vector.broadcast %190 : vector<1x2xf32> to vector<32x2xf32>
    %192 = arith.mulf %189, %191 : vector<32x2xf32>
    %193 = vector.extract_strided_slice %168 {offsets = [0, 0], sizes = [1, 2], strides = [1, 1]} : vector<8x2xf32> to vector<1x2xf32>
    %194 = vector.broadcast %193 : vector<1x2xf32> to vector<32x2xf32>
    %195 = arith.mulf %189, %194 : vector<32x2xf32>
    %c1_63 = arith.constant 1 : index
    %c0_64 = arith.constant 0 : index
    %c0_65 = arith.constant 0 : index
    %196 = vector.load %arg3[%c1_63, %c0_64, %c0_65] : memref<8x32x2xf32, #tpu.memory_space<vmem>>, vector<1x32x2xf32>
    %197 = vector.shape_cast %196 : vector<1x32x2xf32> to vector<32x2xf32>
    %198 = vector.extract_strided_slice %165 {offsets = [1, 0], sizes = [1, 2], strides = [1, 1]} : vector<8x2xf32> to vector<1x2xf32>
    %199 = vector.broadcast %198 : vector<1x2xf32> to vector<32x2xf32>
    %200 = arith.mulf %197, %199 : vector<32x2xf32>
    %201 = arith.addf %192, %200 : vector<32x2xf32>
    %202 = vector.extract_strided_slice %168 {offsets = [1, 0], sizes = [1, 2], strides = [1, 1]} : vector<8x2xf32> to vector<1x2xf32>
    %203 = vector.broadcast %202 : vector<1x2xf32> to vector<32x2xf32>
    %204 = arith.mulf %197, %203 : vector<32x2xf32>
    %205 = arith.addf %195, %204 : vector<32x2xf32>
    %c2_66 = arith.constant 2 : index
    %c0_67 = arith.constant 0 : index
    %c0_68 = arith.constant 0 : index
    %206 = vector.load %arg3[%c2_66, %c0_67, %c0_68] : memref<8x32x2xf32, #tpu.memory_space<vmem>>, vector<1x32x2xf32>
    %207 = vector.shape_cast %206 : vector<1x32x2xf32> to vector<32x2xf32>
    %208 = vector.extract_strided_slice %165 {offsets = [2, 0], sizes = [1, 2], strides = [1, 1]} : vector<8x2xf32> to vector<1x2xf32>
    %209 = vector.broadcast %208 : vector<1x2xf32> to vector<32x2xf32>
    %210 = arith.mulf %207, %209 : vector<32x2xf32>
    %211 = arith.addf %201, %210 : vector<32x2xf32>
    %212 = vector.extract_strided_slice %168 {offsets = [2, 0], sizes = [1, 2], strides = [1, 1]} : vector<8x2xf32> to vector<1x2xf32>
    %213 = vector.broadcast %212 : vector<1x2xf32> to vector<32x2xf32>
    %214 = arith.mulf %207, %213 : vector<32x2xf32>
    %215 = arith.addf %205, %214 : vector<32x2xf32>
    %c3_69 = arith.constant 3 : index
    %c0_70 = arith.constant 0 : index
    %c0_71 = arith.constant 0 : index
    %216 = vector.load %arg3[%c3_69, %c0_70, %c0_71] : memref<8x32x2xf32, #tpu.memory_space<vmem>>, vector<1x32x2xf32>
    %217 = vector.shape_cast %216 : vector<1x32x2xf32> to vector<32x2xf32>
    %218 = vector.extract_strided_slice %165 {offsets = [3, 0], sizes = [1, 2], strides = [1, 1]} : vector<8x2xf32> to vector<1x2xf32>
    %219 = vector.broadcast %218 : vector<1x2xf32> to vector<32x2xf32>
    %220 = arith.mulf %217, %219 : vector<32x2xf32>
    %221 = arith.addf %211, %220 : vector<32x2xf32>
    %222 = vector.extract_strided_slice %168 {offsets = [3, 0], sizes = [1, 2], strides = [1, 1]} : vector<8x2xf32> to vector<1x2xf32>
    %223 = vector.broadcast %222 : vector<1x2xf32> to vector<32x2xf32>
    %224 = arith.mulf %217, %223 : vector<32x2xf32>
    %225 = arith.addf %215, %224 : vector<32x2xf32>
    %c4_72 = arith.constant 4 : index
    %c0_73 = arith.constant 0 : index
    %c0_74 = arith.constant 0 : index
    %226 = vector.load %arg3[%c4_72, %c0_73, %c0_74] : memref<8x32x2xf32, #tpu.memory_space<vmem>>, vector<1x32x2xf32>
    %227 = vector.shape_cast %226 : vector<1x32x2xf32> to vector<32x2xf32>
    %228 = vector.extract_strided_slice %165 {offsets = [4, 0], sizes = [1, 2], strides = [1, 1]} : vector<8x2xf32> to vector<1x2xf32>
    %229 = vector.broadcast %228 : vector<1x2xf32> to vector<32x2xf32>
    %230 = arith.mulf %227, %229 : vector<32x2xf32>
    %231 = arith.addf %221, %230 : vector<32x2xf32>
    %232 = vector.extract_strided_slice %168 {offsets = [4, 0], sizes = [1, 2], strides = [1, 1]} : vector<8x2xf32> to vector<1x2xf32>
    %233 = vector.broadcast %232 : vector<1x2xf32> to vector<32x2xf32>
    %234 = arith.mulf %227, %233 : vector<32x2xf32>
    %235 = arith.addf %225, %234 : vector<32x2xf32>
    %c5_75 = arith.constant 5 : index
    %c0_76 = arith.constant 0 : index
    %c0_77 = arith.constant 0 : index
    %236 = vector.load %arg3[%c5_75, %c0_76, %c0_77] : memref<8x32x2xf32, #tpu.memory_space<vmem>>, vector<1x32x2xf32>
    %237 = vector.shape_cast %236 : vector<1x32x2xf32> to vector<32x2xf32>
    %238 = vector.extract_strided_slice %165 {offsets = [5, 0], sizes = [1, 2], strides = [1, 1]} : vector<8x2xf32> to vector<1x2xf32>
    %239 = vector.broadcast %238 : vector<1x2xf32> to vector<32x2xf32>
    %240 = arith.mulf %237, %239 : vector<32x2xf32>
    %241 = arith.addf %231, %240 : vector<32x2xf32>
    %242 = vector.extract_strided_slice %168 {offsets = [5, 0], sizes = [1, 2], strides = [1, 1]} : vector<8x2xf32> to vector<1x2xf32>
    %243 = vector.broadcast %242 : vector<1x2xf32> to vector<32x2xf32>
    %244 = arith.mulf %237, %243 : vector<32x2xf32>
    %245 = arith.addf %235, %244 : vector<32x2xf32>
    %c6_78 = arith.constant 6 : index
    %c0_79 = arith.constant 0 : index
    %c0_80 = arith.constant 0 : index
    %246 = vector.load %arg3[%c6_78, %c0_79, %c0_80] : memref<8x32x2xf32, #tpu.memory_space<vmem>>, vector<1x32x2xf32>
    %247 = vector.shape_cast %246 : vector<1x32x2xf32> to vector<32x2xf32>
    %248 = vector.extract_strided_slice %165 {offsets = [6, 0], sizes = [1, 2], strides = [1, 1]} : vector<8x2xf32> to vector<1x2xf32>
    %249 = vector.broadcast %248 : vector<1x2xf32> to vector<32x2xf32>
    %250 = arith.mulf %247, %249 : vector<32x2xf32>
    %251 = arith.addf %241, %250 : vector<32x2xf32>
    %252 = vector.extract_strided_slice %168 {offsets = [6, 0], sizes = [1, 2], strides = [1, 1]} : vector<8x2xf32> to vector<1x2xf32>
    %253 = vector.broadcast %252 : vector<1x2xf32> to vector<32x2xf32>
    %254 = arith.mulf %247, %253 : vector<32x2xf32>
    %255 = arith.addf %245, %254 : vector<32x2xf32>
    %c7_81 = arith.constant 7 : index
    %c0_82 = arith.constant 0 : index
    %c0_83 = arith.constant 0 : index
    %256 = vector.load %arg3[%c7_81, %c0_82, %c0_83] : memref<8x32x2xf32, #tpu.memory_space<vmem>>, vector<1x32x2xf32>
    %257 = vector.shape_cast %256 : vector<1x32x2xf32> to vector<32x2xf32>
    %258 = vector.extract_strided_slice %165 {offsets = [7, 0], sizes = [1, 2], strides = [1, 1]} : vector<8x2xf32> to vector<1x2xf32>
    %259 = vector.broadcast %258 : vector<1x2xf32> to vector<32x2xf32>
    %260 = arith.mulf %257, %259 : vector<32x2xf32>
    %261 = arith.addf %251, %260 : vector<32x2xf32>
    %262 = vector.extract_strided_slice %168 {offsets = [7, 0], sizes = [1, 2], strides = [1, 1]} : vector<8x2xf32> to vector<1x2xf32>
    %263 = vector.broadcast %262 : vector<1x2xf32> to vector<32x2xf32>
    %264 = arith.mulf %257, %263 : vector<32x2xf32>
    %265 = arith.addf %255, %264 : vector<32x2xf32>
    %266 = vector.extract_strided_slice %261 {offsets = [0, 0], sizes = [8, 2], strides = [1, 1]} : vector<32x2xf32> to vector<8x2xf32>
    %267 = vector.extract_strided_slice %265 {offsets = [8, 0], sizes = [8, 2], strides = [1, 1]} : vector<32x2xf32> to vector<8x2xf32>
    %268 = arith.subf %266, %267 : vector<8x2xf32>
    %269 = vector.extract_strided_slice %265 {offsets = [0, 0], sizes = [8, 2], strides = [1, 1]} : vector<32x2xf32> to vector<8x2xf32>
    %270 = vector.extract_strided_slice %261 {offsets = [8, 0], sizes = [8, 2], strides = [1, 1]} : vector<32x2xf32> to vector<8x2xf32>
    %271 = arith.addf %269, %270 : vector<8x2xf32>
    %272 = vector.extract_strided_slice %261 {offsets = [16, 0], sizes = [8, 2], strides = [1, 1]} : vector<32x2xf32> to vector<8x2xf32>
    %273 = vector.extract_strided_slice %265 {offsets = [24, 0], sizes = [8, 2], strides = [1, 1]} : vector<32x2xf32> to vector<8x2xf32>
    %274 = arith.subf %272, %273 : vector<8x2xf32>
    %275 = vector.extract_strided_slice %265 {offsets = [16, 0], sizes = [8, 2], strides = [1, 1]} : vector<32x2xf32> to vector<8x2xf32>
    %276 = vector.extract_strided_slice %261 {offsets = [24, 0], sizes = [8, 2], strides = [1, 1]} : vector<32x2xf32> to vector<8x2xf32>
    %277 = arith.addf %275, %276 : vector<8x2xf32>
    %278 = arith.mulf %165, %268 : vector<8x2xf32>
    %279 = arith.mulf %168, %271 : vector<8x2xf32>
    %280 = arith.addf %278, %279 : vector<8x2xf32>
    %cst_84 = arith.constant dense<0.000000e+00> : vector<2xf32>
    %281 = vector.multi_reduction <add>, %280, %cst_84 [0] : vector<8x2xf32> to vector<2xf32>
    %282 = vector.shape_cast %281 : vector<2xf32> to vector<1x2xf32>
    %283 = arith.mulf %165, %274 : vector<8x2xf32>
    %284 = arith.mulf %168, %277 : vector<8x2xf32>
    %285 = arith.addf %283, %284 : vector<8x2xf32>
    %cst_85 = arith.constant dense<0.000000e+00> : vector<2xf32>
    %286 = vector.multi_reduction <add>, %285, %cst_85 [0] : vector<8x2xf32> to vector<2xf32>
    %287 = vector.shape_cast %286 : vector<2xf32> to vector<1x2xf32>
    %288 = arith.mulf %165, %271 : vector<8x2xf32>
    %289 = arith.mulf %168, %268 : vector<8x2xf32>
    %290 = arith.subf %288, %289 : vector<8x2xf32>
    %cst_86 = arith.constant 2.000000e+00 : f32
    %291 = vector.broadcast %cst_86 : f32 to vector<8x2xf32>
    %292 = arith.mulf %291, %290 : vector<8x2xf32>
    %293 = arith.mulf %165, %277 : vector<8x2xf32>
    %294 = arith.mulf %168, %274 : vector<8x2xf32>
    %295 = arith.subf %293, %294 : vector<8x2xf32>
    %cst_87 = arith.constant 2.000000e+00 : f32
    %296 = vector.broadcast %cst_87 : f32 to vector<8x2xf32>
    %297 = arith.mulf %296, %295 : vector<8x2xf32>
    %298 = tpu.reciprocal %287 {approx = true} : vector<1x2xf32> -> vector<1x2xf32>
    %299 = arith.mulf %287, %298 : vector<1x2xf32>
    %cst_88 = arith.constant 2.000000e+00 : f32
    %300 = vector.broadcast %cst_88 : f32 to vector<1x2xf32>
    %301 = arith.subf %300, %299 : vector<1x2xf32>
    %302 = arith.mulf %298, %301 : vector<1x2xf32>
    %303 = vector.broadcast %287 : vector<1x2xf32> to vector<8x2xf32>
    %304 = arith.mulf %292, %303 : vector<8x2xf32>
    %305 = vector.broadcast %282 : vector<1x2xf32> to vector<8x2xf32>
    %306 = arith.mulf %297, %305 : vector<8x2xf32>
    %307 = arith.subf %304, %306 : vector<8x2xf32>
    %308 = arith.mulf %302, %302 : vector<1x2xf32>
    %309 = vector.broadcast %308 : vector<1x2xf32> to vector<8x2xf32>
    %310 = arith.mulf %307, %309 : vector<8x2xf32>
    %c16 = arith.constant 16 : index
    %c0_89 = arith.constant 0 : index
    %311 = vector.load %arg10[%c16, %c0_89] : memref<64x2xf32, #tpu.memory_space<vmem>>, vector<8x2xf32>
    tpu.vector_store %arg10[%c16, %c0_89], %165 {strides = array<i32>} : memref<64x2xf32, #tpu.memory_space<vmem>>, vector<8x2xf32>,
    %c24 = arith.constant 24 : index
    %c0_90 = arith.constant 0 : index
    %312 = vector.load %arg10[%c24, %c0_90] : memref<64x2xf32, #tpu.memory_space<vmem>>, vector<8x2xf32>
    tpu.vector_store %arg10[%c24, %c0_90], %168 {strides = array<i32>} : memref<64x2xf32, #tpu.memory_space<vmem>>, vector<8x2xf32>,
    %c1_91 = arith.constant 1 : index
    %c0_92 = arith.constant 0 : index
    %313 = vector.load %arg11[%c1_91, %c0_92] : memref<3x2xf32, #tpu.memory_space<vmem>>, vector<1x2xf32>
    tpu.vector_store %arg11[%c1_91, %c0_92], %187 {strides = array<i32>} : memref<3x2xf32, #tpu.memory_space<vmem>>, vector<1x2xf32>,
    %314 = vector.broadcast %187 : vector<1x2xf32> to vector<8x2xf32>
    %315 = arith.mulf %314, %310 : vector<8x2xf32>
    %316 = arith.subf %162, %315 : vector<8x2xf32>
    %317 = math.cos %316 : vector<8x2xf32>
    %cst_93 = arith.constant 1.000000e+00 : f32
    %318 = vector.broadcast %cst_93 : f32 to vector<8x2xf32>
    %319 = arith.mulf %318, %317 : vector<8x2xf32>
    %320 = math.sin %316 : vector<8x2xf32>
    %cst_94 = arith.constant 1.000000e+00 : f32
    %321 = vector.broadcast %cst_94 : f32 to vector<8x2xf32>
    %322 = arith.mulf %321, %320 : vector<8x2xf32>
    %c0_95 = arith.constant 0 : index
    %c0_96 = arith.constant 0 : index
    %323 = vector.load %arg5[%c0_95, %c0_96] : memref<32x8xf32, #tpu.memory_space<vmem>>, vector<32x8xf32>
    %cst_97 = arith.constant dense<0.000000e+00> : vector<32x2xf32>
    %324 = tpu.matmul %323, %319, %cst_97 {dimension_numbers = #tpu.dot_dimension_numbers<[1], [0], [0], [1], [0, 0, 1, 1], [], []>} : vector<32x8xf32>, vector<8x2xf32>, vector<32x2xf32> -> vector<32x2xf32>
    %325 = arith.addf %8, %324 : vector<32x2xf32>
    %c0_98 = arith.constant 0 : index
    %c0_99 = arith.constant 0 : index
    %326 = vector.load %arg6[%c0_98, %c0_99] : memref<32x8xf32, #tpu.memory_space<vmem>>, vector<32x8xf32>
    %cst_100 = arith.constant dense<0.000000e+00> : vector<32x2xf32>
    %327 = tpu.matmul %326, %322, %cst_100 {dimension_numbers = #tpu.dot_dimension_numbers<[1], [0], [0], [1], [0, 0, 1, 1], [], []>} : vector<32x8xf32>, vector<8x2xf32>, vector<32x2xf32> -> vector<32x2xf32>
    %328 = arith.addf %325, %327 : vector<32x2xf32>
    %cst_101 = arith.constant 0.000000e+00 : f32
    %329 = vector.broadcast %cst_101 : f32 to vector<32x2xf32>
    %330 = arith.maximumf %328, %329 : vector<32x2xf32>
    %331 = vector.broadcast %2 : vector<32x1xf32> to vector<32x2xf32>
    %332 = arith.mulf %330, %331 : vector<32x2xf32>
    %cst_102 = arith.constant dense<0.000000e+00> : vector<2xf32>
    %333 = vector.multi_reduction <add>, %332, %cst_102 [0] : vector<32x2xf32> to vector<2xf32>
    %334 = vector.shape_cast %333 : vector<2xf32> to vector<1x2xf32>
    %335 = vector.broadcast %3 : vector<1x1xf32> to vector<1x2xf32>
    %336 = arith.addf %334, %335 : vector<1x2xf32>
    %337 = arith.negf %336 : vector<1x2xf32>
    %338 = math.exp %337 : vector<1x2xf32>
    %cst_103 = arith.constant 1.000000e+00 : f32
    %339 = vector.broadcast %cst_103 : f32 to vector<1x2xf32>
    %340 = arith.addf %339, %338 : vector<1x2xf32>
    %341 = arith.divf %339, %340 : vector<1x2xf32>
    %c0_104 = arith.constant 0 : index
    %c0_105 = arith.constant 0 : index
    %c0_106 = arith.constant 0 : index
    %342 = vector.load %arg3[%c0_104, %c0_105, %c0_106] : memref<8x32x2xf32, #tpu.memory_space<vmem>>, vector<1x32x2xf32>
    %343 = vector.shape_cast %342 : vector<1x32x2xf32> to vector<32x2xf32>
    %344 = vector.extract_strided_slice %319 {offsets = [0, 0], sizes = [1, 2], strides = [1, 1]} : vector<8x2xf32> to vector<1x2xf32>
    %345 = vector.broadcast %344 : vector<1x2xf32> to vector<32x2xf32>
    %346 = arith.mulf %343, %345 : vector<32x2xf32>
    %347 = vector.extract_strided_slice %322 {offsets = [0, 0], sizes = [1, 2], strides = [1, 1]} : vector<8x2xf32> to vector<1x2xf32>
    %348 = vector.broadcast %347 : vector<1x2xf32> to vector<32x2xf32>
    %349 = arith.mulf %343, %348 : vector<32x2xf32>
    %c1_107 = arith.constant 1 : index
    %c0_108 = arith.constant 0 : index
    %c0_109 = arith.constant 0 : index
    %350 = vector.load %arg3[%c1_107, %c0_108, %c0_109] : memref<8x32x2xf32, #tpu.memory_space<vmem>>, vector<1x32x2xf32>
    %351 = vector.shape_cast %350 : vector<1x32x2xf32> to vector<32x2xf32>
    %352 = vector.extract_strided_slice %319 {offsets = [1, 0], sizes = [1, 2], strides = [1, 1]} : vector<8x2xf32> to vector<1x2xf32>
    %353 = vector.broadcast %352 : vector<1x2xf32> to vector<32x2xf32>
    %354 = arith.mulf %351, %353 : vector<32x2xf32>
    %355 = arith.addf %346, %354 : vector<32x2xf32>
    %356 = vector.extract_strided_slice %322 {offsets = [1, 0], sizes = [1, 2], strides = [1, 1]} : vector<8x2xf32> to vector<1x2xf32>
    %357 = vector.broadcast %356 : vector<1x2xf32> to vector<32x2xf32>
    %358 = arith.mulf %351, %357 : vector<32x2xf32>
    %359 = arith.addf %349, %358 : vector<32x2xf32>
    %c2_110 = arith.constant 2 : index
    %c0_111 = arith.constant 0 : index
    %c0_112 = arith.constant 0 : index
    %360 = vector.load %arg3[%c2_110, %c0_111, %c0_112] : memref<8x32x2xf32, #tpu.memory_space<vmem>>, vector<1x32x2xf32>
    %361 = vector.shape_cast %360 : vector<1x32x2xf32> to vector<32x2xf32>
    %362 = vector.extract_strided_slice %319 {offsets = [2, 0], sizes = [1, 2], strides = [1, 1]} : vector<8x2xf32> to vector<1x2xf32>
    %363 = vector.broadcast %362 : vector<1x2xf32> to vector<32x2xf32>
    %364 = arith.mulf %361, %363 : vector<32x2xf32>
    %365 = arith.addf %355, %364 : vector<32x2xf32>
    %366 = vector.extract_strided_slice %322 {offsets = [2, 0], sizes = [1, 2], strides = [1, 1]} : vector<8x2xf32> to vector<1x2xf32>
    %367 = vector.broadcast %366 : vector<1x2xf32> to vector<32x2xf32>
    %368 = arith.mulf %361, %367 : vector<32x2xf32>
    %369 = arith.addf %359, %368 : vector<32x2xf32>
    %c3_113 = arith.constant 3 : index
    %c0_114 = arith.constant 0 : index
    %c0_115 = arith.constant 0 : index
    %370 = vector.load %arg3[%c3_113, %c0_114, %c0_115] : memref<8x32x2xf32, #tpu.memory_space<vmem>>, vector<1x32x2xf32>
    %371 = vector.shape_cast %370 : vector<1x32x2xf32> to vector<32x2xf32>
    %372 = vector.extract_strided_slice %319 {offsets = [3, 0], sizes = [1, 2], strides = [1, 1]} : vector<8x2xf32> to vector<1x2xf32>
    %373 = vector.broadcast %372 : vector<1x2xf32> to vector<32x2xf32>
    %374 = arith.mulf %371, %373 : vector<32x2xf32>
    %375 = arith.addf %365, %374 : vector<32x2xf32>
    %376 = vector.extract_strided_slice %322 {offsets = [3, 0], sizes = [1, 2], strides = [1, 1]} : vector<8x2xf32> to vector<1x2xf32>
    %377 = vector.broadcast %376 : vector<1x2xf32> to vector<32x2xf32>
    %378 = arith.mulf %371, %377 : vector<32x2xf32>
    %379 = arith.addf %369, %378 : vector<32x2xf32>
    %c4_116 = arith.constant 4 : index
    %c0_117 = arith.constant 0 : index
    %c0_118 = arith.constant 0 : index
    %380 = vector.load %arg3[%c4_116, %c0_117, %c0_118] : memref<8x32x2xf32, #tpu.memory_space<vmem>>, vector<1x32x2xf32>
    %381 = vector.shape_cast %380 : vector<1x32x2xf32> to vector<32x2xf32>
    %382 = vector.extract_strided_slice %319 {offsets = [4, 0], sizes = [1, 2], strides = [1, 1]} : vector<8x2xf32> to vector<1x2xf32>
    %383 = vector.broadcast %382 : vector<1x2xf32> to vector<32x2xf32>
    %384 = arith.mulf %381, %383 : vector<32x2xf32>
    %385 = arith.addf %375, %384 : vector<32x2xf32>
    %386 = vector.extract_strided_slice %322 {offsets = [4, 0], sizes = [1, 2], strides = [1, 1]} : vector<8x2xf32> to vector<1x2xf32>
    %387 = vector.broadcast %386 : vector<1x2xf32> to vector<32x2xf32>
    %388 = arith.mulf %381, %387 : vector<32x2xf32>
    %389 = arith.addf %379, %388 : vector<32x2xf32>
    %c5_119 = arith.constant 5 : index
    %c0_120 = arith.constant 0 : index
    %c0_121 = arith.constant 0 : index
    %390 = vector.load %arg3[%c5_119, %c0_120, %c0_121] : memref<8x32x2xf32, #tpu.memory_space<vmem>>, vector<1x32x2xf32>
    %391 = vector.shape_cast %390 : vector<1x32x2xf32> to vector<32x2xf32>
    %392 = vector.extract_strided_slice %319 {offsets = [5, 0], sizes = [1, 2], strides = [1, 1]} : vector<8x2xf32> to vector<1x2xf32>
    %393 = vector.broadcast %392 : vector<1x2xf32> to vector<32x2xf32>
    %394 = arith.mulf %391, %393 : vector<32x2xf32>
    %395 = arith.addf %385, %394 : vector<32x2xf32>
    %396 = vector.extract_strided_slice %322 {offsets = [5, 0], sizes = [1, 2], strides = [1, 1]} : vector<8x2xf32> to vector<1x2xf32>
    %397 = vector.broadcast %396 : vector<1x2xf32> to vector<32x2xf32>
    %398 = arith.mulf %391, %397 : vector<32x2xf32>
    %399 = arith.addf %389, %398 : vector<32x2xf32>
    %c6_122 = arith.constant 6 : index
    %c0_123 = arith.constant 0 : index
    %c0_124 = arith.constant 0 : index
    %400 = vector.load %arg3[%c6_122, %c0_123, %c0_124] : memref<8x32x2xf32, #tpu.memory_space<vmem>>, vector<1x32x2xf32>
    %401 = vector.shape_cast %400 : vector<1x32x2xf32> to vector<32x2xf32>
    %402 = vector.extract_strided_slice %319 {offsets = [6, 0], sizes = [1, 2], strides = [1, 1]} : vector<8x2xf32> to vector<1x2xf32>
    %403 = vector.broadcast %402 : vector<1x2xf32> to vector<32x2xf32>
    %404 = arith.mulf %401, %403 : vector<32x2xf32>
    %405 = arith.addf %395, %404 : vector<32x2xf32>
    %406 = vector.extract_strided_slice %322 {offsets = [6, 0], sizes = [1, 2], strides = [1, 1]} : vector<8x2xf32> to vector<1x2xf32>
    %407 = vector.broadcast %406 : vector<1x2xf32> to vector<32x2xf32>
    %408 = arith.mulf %401, %407 : vector<32x2xf32>
    %409 = arith.addf %399, %408 : vector<32x2xf32>
    %c7_125 = arith.constant 7 : index
    %c0_126 = arith.constant 0 : index
    %c0_127 = arith.constant 0 : index
    %410 = vector.load %arg3[%c7_125, %c0_126, %c0_127] : memref<8x32x2xf32, #tpu.memory_space<vmem>>, vector<1x32x2xf32>
    %411 = vector.shape_cast %410 : vector<1x32x2xf32> to vector<32x2xf32>
    %412 = vector.extract_strided_slice %319 {offsets = [7, 0], sizes = [1, 2], strides = [1, 1]} : vector<8x2xf32> to vector<1x2xf32>
    %413 = vector.broadcast %412 : vector<1x2xf32> to vector<32x2xf32>
    %414 = arith.mulf %411, %413 : vector<32x2xf32>
    %415 = arith.addf %405, %414 : vector<32x2xf32>
    %416 = vector.extract_strided_slice %322 {offsets = [7, 0], sizes = [1, 2], strides = [1, 1]} : vector<8x2xf32> to vector<1x2xf32>
    %417 = vector.broadcast %416 : vector<1x2xf32> to vector<32x2xf32>
    %418 = arith.mulf %411, %417 : vector<32x2xf32>
    %419 = arith.addf %409, %418 : vector<32x2xf32>
    %420 = vector.extract_strided_slice %415 {offsets = [0, 0], sizes = [8, 2], strides = [1, 1]} : vector<32x2xf32> to vector<8x2xf32>
    %421 = vector.extract_strided_slice %419 {offsets = [8, 0], sizes = [8, 2], strides = [1, 1]} : vector<32x2xf32> to vector<8x2xf32>
    %422 = arith.subf %420, %421 : vector<8x2xf32>
    %423 = vector.extract_strided_slice %419 {offsets = [0, 0], sizes = [8, 2], strides = [1, 1]} : vector<32x2xf32> to vector<8x2xf32>
    %424 = vector.extract_strided_slice %415 {offsets = [8, 0], sizes = [8, 2], strides = [1, 1]} : vector<32x2xf32> to vector<8x2xf32>
    %425 = arith.addf %423, %424 : vector<8x2xf32>
    %426 = vector.extract_strided_slice %415 {offsets = [16, 0], sizes = [8, 2], strides = [1, 1]} : vector<32x2xf32> to vector<8x2xf32>
    %427 = vector.extract_strided_slice %419 {offsets = [24, 0], sizes = [8, 2], strides = [1, 1]} : vector<32x2xf32> to vector<8x2xf32>
    %428 = arith.subf %426, %427 : vector<8x2xf32>
    %429 = vector.extract_strided_slice %419 {offsets = [16, 0], sizes = [8, 2], strides = [1, 1]} : vector<32x2xf32> to vector<8x2xf32>
    %430 = vector.extract_strided_slice %415 {offsets = [24, 0], sizes = [8, 2], strides = [1, 1]} : vector<32x2xf32> to vector<8x2xf32>
    %431 = arith.addf %429, %430 : vector<8x2xf32>
    %432 = arith.mulf %319, %422 : vector<8x2xf32>
    %433 = arith.mulf %322, %425 : vector<8x2xf32>
    %434 = arith.addf %432, %433 : vector<8x2xf32>
    %cst_128 = arith.constant dense<0.000000e+00> : vector<2xf32>
    %435 = vector.multi_reduction <add>, %434, %cst_128 [0] : vector<8x2xf32> to vector<2xf32>
    %436 = vector.shape_cast %435 : vector<2xf32> to vector<1x2xf32>
    %437 = arith.mulf %319, %428 : vector<8x2xf32>
    %438 = arith.mulf %322, %431 : vector<8x2xf32>
    %439 = arith.addf %437, %438 : vector<8x2xf32>
    %cst_129 = arith.constant dense<0.000000e+00> : vector<2xf32>
    %440 = vector.multi_reduction <add>, %439, %cst_129 [0] : vector<8x2xf32> to vector<2xf32>
    %441 = vector.shape_cast %440 : vector<2xf32> to vector<1x2xf32>
    %442 = arith.mulf %319, %425 : vector<8x2xf32>
    %443 = arith.mulf %322, %422 : vector<8x2xf32>
    %444 = arith.subf %442, %443 : vector<8x2xf32>
    %cst_130 = arith.constant 2.000000e+00 : f32
    %445 = vector.broadcast %cst_130 : f32 to vector<8x2xf32>
    %446 = arith.mulf %445, %444 : vector<8x2xf32>
    %447 = arith.mulf %319, %431 : vector<8x2xf32>
    %448 = arith.mulf %322, %428 : vector<8x2xf32>
    %449 = arith.subf %447, %448 : vector<8x2xf32>
    %cst_131 = arith.constant 2.000000e+00 : f32
    %450 = vector.broadcast %cst_131 : f32 to vector<8x2xf32>
    %451 = arith.mulf %450, %449 : vector<8x2xf32>
    %452 = tpu.reciprocal %441 {approx = true} : vector<1x2xf32> -> vector<1x2xf32>
    %453 = arith.mulf %441, %452 : vector<1x2xf32>
    %cst_132 = arith.constant 2.000000e+00 : f32
    %454 = vector.broadcast %cst_132 : f32 to vector<1x2xf32>
    %455 = arith.subf %454, %453 : vector<1x2xf32>
    %456 = arith.mulf %452, %455 : vector<1x2xf32>
    %457 = vector.broadcast %441 : vector<1x2xf32> to vector<8x2xf32>
    %458 = arith.mulf %446, %457 : vector<8x2xf32>
    %459 = vector.broadcast %436 : vector<1x2xf32> to vector<8x2xf32>
    %460 = arith.mulf %451, %459 : vector<8x2xf32>
    %461 = arith.subf %458, %460 : vector<8x2xf32>
    %462 = arith.mulf %456, %456 : vector<1x2xf32>
    %463 = vector.broadcast %462 : vector<1x2xf32> to vector<8x2xf32>
    %464 = arith.mulf %461, %463 : vector<8x2xf32>
    %c32 = arith.constant 32 : index
    %c0_133 = arith.constant 0 : index
    %465 = vector.load %arg10[%c32, %c0_133] : memref<64x2xf32, #tpu.memory_space<vmem>>, vector<8x2xf32>
    tpu.vector_store %arg10[%c32, %c0_133], %319 {strides = array<i32>} : memref<64x2xf32, #tpu.memory_space<vmem>>, vector<8x2xf32>,
    %c40 = arith.constant 40 : index
    %c0_134 = arith.constant 0 : index
    %466 = vector.load %arg10[%c40, %c0_134] : memref<64x2xf32, #tpu.memory_space<vmem>>, vector<8x2xf32>
    tpu.vector_store %arg10[%c40, %c0_134], %322 {strides = array<i32>} : memref<64x2xf32, #tpu.memory_space<vmem>>, vector<8x2xf32>,
    %c2_135 = arith.constant 2 : index
    %c0_136 = arith.constant 0 : index
    %467 = vector.load %arg11[%c2_135, %c0_136] : memref<3x2xf32, #tpu.memory_space<vmem>>, vector<1x2xf32>
    tpu.vector_store %arg11[%c2_135, %c0_136], %341 {strides = array<i32>} : memref<3x2xf32, #tpu.memory_space<vmem>>, vector<1x2xf32>,
    %468 = vector.broadcast %341 : vector<1x2xf32> to vector<8x2xf32>
    %469 = arith.mulf %468, %464 : vector<8x2xf32>
    %470 = arith.subf %316, %469 : vector<8x2xf32>
    %471 = math.cos %470 : vector<8x2xf32>
    %cst_137 = arith.constant 1.000000e+00 : f32
    %472 = vector.broadcast %cst_137 : f32 to vector<8x2xf32>
    %473 = arith.mulf %472, %471 : vector<8x2xf32>
    %c48 = arith.constant 48 : index
    %c0_138 = arith.constant 0 : index
    %474 = vector.load %arg10[%c48, %c0_138] : memref<64x2xf32, #tpu.memory_space<vmem>>, vector<8x2xf32>
    tpu.vector_store %arg10[%c48, %c0_138], %473 {strides = array<i32>} : memref<64x2xf32, #tpu.memory_space<vmem>>, vector<8x2xf32>,
    %475 = math.sin %470 : vector<8x2xf32>
    %cst_139 = arith.constant 1.000000e+00 : f32
    %476 = vector.broadcast %cst_139 : f32 to vector<8x2xf32>
    %477 = arith.mulf %476, %475 : vector<8x2xf32>
    %c56 = arith.constant 56 : index
    %c0_140 = arith.constant 0 : index
    %478 = vector.load %arg10[%c56, %c0_140] : memref<64x2xf32, #tpu.memory_space<vmem>>, vector<8x2xf32>
    tpu.vector_store %arg10[%c56, %c0_140], %477 {strides = array<i32>} : memref<64x2xf32, #tpu.memory_space<vmem>>, vector<8x2xf32>,
    return
  }
  func.func @transform_0(%arg0: i32) -> (i32, i32) {
    %c0_i32 = arith.constant 0 : i32
    %c0_i32_0 = arith.constant 0 : i32
    return %c0_i32, %arg0 : i32, i32
  }
  func.func @transform_1(%arg0: i32) -> (i32, i32) {
    %c0_i32 = arith.constant 0 : i32
    %c0_i32_0 = arith.constant 0 : i32
    return %c0_i32, %arg0 : i32, i32
  }
  func.func @transform_2(%arg0: i32) -> (i32, i32, i32) {
    %c0_i32 = arith.constant 0 : i32
    %c0_i32_0 = arith.constant 0 : i32
    %c0_i32_1 = arith.constant 0 : i32
    return %c0_i32, %c0_i32_0, %arg0 : i32, i32, i32
  }
  func.func @transform_3(%arg0: i32) -> (i32, i32) {
    %c0_i32 = arith.constant 0 : i32
    %c0_i32_0 = arith.constant 0 : i32
    %c0_i32_1 = arith.constant 0 : i32
    return %c0_i32, %c0_i32_0 : i32, i32
  }
  func.func @transform_4(%arg0: i32) -> (i32, i32) {
    %c0_i32 = arith.constant 0 : i32
    %c0_i32_0 = arith.constant 0 : i32
    %c0_i32_1 = arith.constant 0 : i32
    return %c0_i32, %c0_i32_0 : i32, i32
  }
  func.func @transform_5(%arg0: i32) -> (i32, i32) {
    %c0_i32 = arith.constant 0 : i32
    %c0_i32_0 = arith.constant 0 : i32
    %c0_i32_1 = arith.constant 0 : i32
    return %c0_i32, %c0_i32_0 : i32, i32
  }
  func.func @transform_6(%arg0: i32) -> (i32, i32) {
    %c0_i32 = arith.constant 0 : i32
    %c0_i32_0 = arith.constant 0 : i32
    %c0_i32_1 = arith.constant 0 : i32
    return %c0_i32, %c0_i32_0 : i32, i32
  }
  func.func @transform_7(%arg0: i32) -> (i32, i32) {
    %c0_i32 = arith.constant 0 : i32
    %c0_i32_0 = arith.constant 0 : i32
    %c0_i32_1 = arith.constant 0 : i32
    return %c0_i32, %c0_i32_0 : i32, i32
  }
  func.func @transform_8(%arg0: i32) -> (i32, i32) {
    %c0_i32 = arith.constant 0 : i32
    %c0_i32_0 = arith.constant 0 : i32
    %c0_i32_1 = arith.constant 0 : i32
    return %c0_i32, %c0_i32_0 : i32, i32
  }
  func.func @transform_9(%arg0: i32) -> (i32, i32) {
    %c0_i32 = arith.constant 0 : i32
    %c0_i32_0 = arith.constant 0 : i32
    return %c0_i32, %arg0 : i32, i32
  }
  func.func @transform_10(%arg0: i32) -> (i32, i32) {
    %c0_i32 = arith.constant 0 : i32
    %c0_i32_0 = arith.constant 0 : i32
    return %c0_i32, %arg0 : i32, i32
  }
}

</mosaic_0001>

<bundles_post_ra>
// kernel: tpu_custom_call.1
= control target key start
LH: loop header
LB: loop body
LE: loop exit
PB: predicated region body
PF: predicated region fallthrough
CT: control target
= control target key end

     0   :  { %vm72_vm0 = vcmask 130048   ;;  %vm381_vm1 = vcmask 64512   ;;  %v2850_v6 = vmov 0   ;;  %v3998_v28 = vmov 683565275   ;;  %s3977_s1 = inlined_call_operand.vmem [shape: f32[16,2], index: 1, kind: input, shape index: {}]   ;;  %s3978_s3 = inlined_call_operand.vmem [shape: f32[32,16], index: 3, kind: input, shape index: {}]   ;;  %s3979_s0 = inlined_call_operand.vmem [shape: f32[8,2], index: 0, kind: input, shape index: {}]   ;;  %s3980_s8 = inlined_call_operand.<no memory space> [shape: f32[1,1], index: 8, kind: input, shape index: {}]   ;;  %s3981_s4 = inlined_call_operand.vmem [shape: f32[32,8], index: 4, kind: input, shape index: {}]   ;;  %s3982_s6 = inlined_call_operand.vmem [shape: f32[32,1], index: 6, kind: input, shape index: {}]   ;;  %s3983_s7 = inlined_call_operand.vmem [shape: f32[32,1], index: 7, kind: input, shape index: {}]   ;;  %s3984_s5 = inlined_call_operand.vmem [shape: f32[32,8], index: 5, kind: input, shape index: {}]   ;;  %s3985_s2 = inlined_call_operand.vmem [shape: f32[8,32,2], index: 2, kind: input, shape index: {}]   ;;  %s3986_s9 = inlined_call_operand.vmem [shape: f32[64,2], index: 9, kind: output, shape index: {0}]   ;;  %s3987_s10 = inlined_call_operand.vmem [shape: f32[3,2], index: 10, kind: output, shape index: {1}]  }
   0x1   :  { %v51_v0 = vld [vmem:[%s3977_s1 + $0x8] sm:$0xff]  ;;  %v50_v1 = vld [vmem:[%s3977_s1] sm:$0xff]  ;;  %v16_v3 = vstv %s3980_s8  ;;  %2813 = vset.pattern.permute.xlu0 %v2850_v6  ;;  %v48_v7 = vld [vmem:[%s3978_s3 + $0x10] sm:$0xff]  ;;  %2814 = vset.pattern.permute.xlu1 %v2850_v6  ;;  %v3996_v30 = vmov 2475754826  }
   0x2   :  { %v46_v2 = vld [vmem:[%s3978_s3] sm:$0xff]  ;;  %2730 = vmatprep.subr.mxu0 %v51_v0  ;;  %17 = vst [vmem:[#allocation2] sm:$0x1] %v16_v3  ;;  %v47_v4 = vld [vmem:[%s3978_s3 + $0x8] sm:$0xff]  ;;  %v379_v9 = vld [vmem:[%s3981_s4 + $0x10] sm:$0xff] }
   0x3   :  { %2734 = vmatprep.mubr.msk.f32.mxu0 %vm72_vm0, %v46_v2  ;;  %2731 = vmatpush3.msra.mxu0 %v51_v0  ;;  %v2931_v5 = vld [vmem:[%s3979_s0] sm:$0xff]  ;;  %v49_v11 = vld [vmem:[%s3978_s3 + $0x18] sm:$0xff]  ;;  %v39_v16 = vld [vmem:[%s3982_s6 + $0x10] sm:$0xff]  ;;  %v3994_v32 = vmov 2131351028  }
   0x4   :  { %2732 = vmatprep.subr.mxu0 %v50_v1  ;;  %v173_v8 = vand.u32 2139095040, %v2931_v5  ;;  %2745 = vmatprep.mubr.msk.f32.mxu1 %vm381_vm1, %v379_v9  ;;  %v170_v12 = vand.u32 2147483647, %v2931_v5  ;;  %v37_v13 = vld [vmem:[%s3982_s6] sm:$0xff]  ;;  %v38_v17 = vld [vmem:[%s3982_s6 + $0x8] sm:$0xff]  ;;  %v40_v19 = vld [vmem:[%s3982_s6 + $0x18] sm:$0xff] }
   0x5   :  { %2733 = vmatpush3.msra.mxu0 %v50_v1  ;;  %v2953_v15 = vld [vmem:[%s3981_s4] sm:$0xff]  ;;  %54 = vperm.xlu0 %2813, %v37_v13   ;;  %v42_v24 = vld [vmem:[%s3983_s7 + $0x8] sm:$0xff]  ;;  %v3992_v34 = vmov 2102212464   ;;  %v3990_v36 = vmov 920167782  }
   0x6   :  { %2735 = vmatmul.mubr.msk.f32.vlgmr.msra.gmra.mxu0 %vm72_vm0, %v47_v4  ;;  %v174_v10 = vshrl.u32 %v173_v8, 23  ;;  %64 = vperm.xlu1 %2814, %v39_v16   ;;  %v177_v20 = vand.u32 8388607, %v170_v12  ;;  %v41_v22 = vld [vmem:[%s3983_s7] sm:$0xff]  ;;  %v43_v38 = vld [vmem:[%s3983_s7 + $0x10] sm:$0xff]  ;;  %v44_v43 = vld [vmem:[%s3983_s7 + $0x18] sm:$0xff] }
   0x7   :  { %2737 = vmatprep.mubr.msk.f32.mxu0 %vm72_vm0, %v48_v7  ;;  %v3988_v45 = vmov 1326507024   ;;  %vm172_vm9 = vcmp.lt.s32.totalorder %v2931_v5, 0  ;;  %vm171_vm10 = vcmp.le.f32.partialorder %v170_v12, 0.7853982 }
   0x8   :  { %v2551_v14 = vadd.s32 4294967169, %v174_v10  ;;  %v178_v25 = vor.u32 8388608, %v177_v20 }
   0x9   :  { %59 = vperm.xlu0 %2813, %v38_v17   ;;  %v45_v53 = vld [vmem:[#allocation2] sm:$0x1] }
   0xa   :  { %2738 = vmatmul.mubr.msk.f32.gmra.mxu0 %vm72_vm0, %v49_v11  ;;  %v180_v18 = vadd.s32 1, %v2551_v14  ;;  %69 = vperm.xlu1 %2814, %v40_v19   ;;  %v218_v47 = vshll.u32 %v178_v25, 8 }
   0xb   :  { %2742 = vmatprep.mubr.msk.f32.mxu0 %vm381_vm1, %v2953_v15 }
   0xc   :  { %vm181_vm2 = vcmp.gt.s32.totalorder %v180_v18, 0 }
   0xd   :  { %v182_v21 = vsel %vm181_vm2, %v180_v18, 0  ;;  %594 = vperm.xlu0 %2813, %v41_v22   ;;  %vm262_vm2 = vweird.f32 %v2931_v5 }
   0xe   :  { %v184_v23 = vand.u32 31, %v182_v21  ;;  %v183_v26 = vshrl.u32 %v182_v21, 5  ;;  %599 = vperm.xlu1 %2814, %v42_v24  }
  0x10   :  { %v185_v27 = vsub.s32 32, %v184_v23  ;;  %v187_v29 = vshll.u32 %v3998_v28, %v184_v23  ;;  %v190_v31 = vshll.u32 %v3996_v30, %v184_v23  ;;  %v193_v33 = vshll.u32 %v3994_v32, %v184_v23 }
  0x11   :  { %v196_v35 = vshll.u32 %v3992_v34, %v184_v23  ;;  %v199_v37 = vshll.u32 %v3990_v36, %v184_v23  ;;  %vm202_vm3 = vcmp.lt.s32.totalorder %v183_v26, 1  ;;  %vm205_vm4 = vcmp.lt.s32.totalorder %v183_v26, 4  ;;  %604 = vperm.xlu0 %2813, %v43_v38  }
  0x12   :  { %v186_v39 = vshrl.u32 %v3998_v28, %v185_v27  ;;  %v188_v40 = vshrl.u32 %v3996_v30, %v185_v27  ;;  %v191_v41 = vshrl.u32 %v3994_v32, %v185_v27  ;;  %v194_v42 = vshrl.u32 %v3992_v34, %v185_v27  ;;  %609 = vperm.xlu1 %2814, %v44_v43   ;;  %v3265_v34 = vld [vmem:[%s3985_s2 + $0xd0] sm:$0xff] }
  0x13   :  { %v197_v44 = vshrl.u32 %v3990_v36, %v185_v27  ;;  %v200_v46 = vshrl.u32 %v3988_v45, %v185_v27  ;;  %vm203_vm5 = vcmp.lt.s32.totalorder %v183_v26, 2  ;;  %vm204_vm6 = vcmp.lt.s32.totalorder %v183_v26, 3  ;;  %4064 = vst [vmem:[#allocation15_spill] sm:$0xff] %v3265_v34 }
  0x14   :  { %v189_v48 = vor.u32 %v188_v40, %v187_v29  ;;  %v192_v49 = vor.u32 %v191_v41, %v190_v31  ;;  %v195_v50 = vor.u32 %v194_v42, %v193_v33 }
  0x15   :  { %v198_v51 = vor.u32 %v197_v44, %v196_v35  ;;  %v201_v52 = vor.u32 %v200_v46, %v199_v37  ;;  %632 = vperm.xlu0 %2813, %v45_v53  }
  0x16   :  { %v206_v54 = vsel %vm202_vm3, %v186_v39, %v189_v48  ;;  %v207_v55 = vsel %vm205_vm4, %v195_v50, 2102212464  ;;  %v210_v56 = vsel %vm202_vm3, %v189_v48, %v192_v49  ;;  %v214_v57 = vsel %vm202_vm3, %v192_v49, %v195_v50 }
  0x17   :  { %v208_v58 = vsel %vm204_vm6, %v192_v49, %v207_v55  ;;  %v211_v59 = vsel %vm205_vm4, %v198_v51, 920167782  ;;  %v215_v60 = vsel %vm205_vm4, %v201_v52, 1326507024  ;;  %vm616_vm3 = vcmask 15360  }
  0x18   :  { %v212_v61 = vsel %vm204_vm6, %v195_v50, %v211_v59  ;;  %v216_v62 = vsel %vm204_vm6, %v198_v51, %v215_v60  ;;  %v209_v63 = vsel %vm203_vm5, %v206_v54, %v208_v58  ;;  %v3018_v59 = vld [vmem:[%s3981_s4 + $0x8] sm:$0xff]  ;;  %v3023_v60 = vld [vmem:[%s3981_s4 + $0x18] sm:$0xff]  ;;  %vm912_vm4 = vcmask 8192  }
  0x19   :  { %v213_v0 = vsel %vm203_vm5, %v210_v56, %v212_v61  ;;  %v217_v1 = vsel %vm203_vm5, %v214_v57, %v216_v62  ;;  %v225_v7 = vmul.u32 %v218_v47, %v209_v63  ;;  %v483_v62 = vld [vmem:[%s3984_s5] sm:$0xff]  ;;  %v3043_v63 = vld [vmem:[%s3984_s5 + $0x8] sm:$0xff] }
  0x1a   :  { %v2998_v2 = vmul.u32.u64.low %v218_v47, %v217_v1  ;;  %v2999_v3 = vmul.u32.u64.high %v218_v47, %v217_v1, %v2998_v2  ;;  %v3001_v4 = vmul.u32.u64.low %v218_v47, %v213_v0  ;;  %v3002_v6 = vmul.u32.u64.high %v218_v47, %v213_v0, %v3001_v4  ;;  %v3049_v0 = vld [vmem:[%s3984_s5 + $0x10] sm:$0xff]  ;;  %v3060_v1 = vld [vmem:[%s3984_s5 + $0x18] sm:$0xff] }
  0x1b   :  { %v635_v2 = vlaneseq }
  0x1c   :  { %vm227_vm7 = vc.u32 %v2999_v3, %v3001_v4  ;;  %v228_v8 = vadd.s32 1, %v3002_v6  ;;  %v226_v21 = vadd.s32 %v3001_v4, %v2999_v3 }
  0x1d   :  { %v3065_v3 = vshrl.u32 %v635_v2, 7  ;;  %v3202_v2 = vld [vmem:[%s3985_s2 + $0x98] sm:$0xff] }
  0x1e   :  { %v229_v9 = vsel %vm227_vm7, %v228_v8, %v3002_v6  ;;  %v3084_v8 = vld [vmem:[%s3985_s2 + $0x10] sm:$0xff]  ;;  %4059 = vst [vmem:[#allocation10_spill] sm:$0xff] %v3202_v2 }
  0x1f   :  { %v230_v10 = vadd.s32 %v229_v9, %v225_v7  ;;  %v3071_v4 = vsub.s32 0, %v3065_v3  ;;  %v3089_v9 = vld [vmem:[%s3985_s2 + $0x18] sm:$0xff] }
  0x21   :  { %v231_v11 = vadd.s32 536870912, %v230_v10 }
  0x23   :  { %v232_v13 = vshrl.u32 %v231_v11, 30 }
  0x25   :  { %v233_v14 = vshll.u32 %v232_v13, 30  ;;  %v256_v40 = vsub.s32 4, %v232_v13 }
  0x27   :  { %v234_v16 = vsub.s32 %v230_v10, %v233_v14  ;;  %v257_v43 = vsel %vm172_vm9, %v256_v40, %v232_v13  ;;  %v3102_v13 = vld [vmem:[%s3985_s2 + $0x30] sm:$0xff]  ;;  %v3107_v14 = vld [vmem:[%s3985_s2 + $0x38] sm:$0xff] }
  0x28   :  { %v259_v44 = vsel %vm171_vm10, 0, %v257_v43 }
  0x29   :  { %v236_v17 = vsub.s32 0, %v234_v16  ;;  %v366_v46 = vadd.s32 3, %v259_v44  ;;  %v263_v47 = vand.u32 3, %v259_v44 }
  0x2b   :  { %v2552_v18 = vmin.u32 %v236_v17, %v234_v16  ;;  %v367_v48 = vand.u32 3, %v366_v46  ;;  %vm268_vm11 = vcmp.eq.s32.totalorder %v263_v47, 2  ;;  %vm265_vm13 = vcmp.eq.s32.totalorder %v263_v47, 0  ;;  %v3168_v46 = vld [vmem:[%s3985_s2 + $0x70] sm:$0xff] }
  0x2c   :  { %vm264_vm15 = vcmp.lt.s32.totalorder %v263_v47, 2  ;;  %4055 = vst [vmem:[#allocation6_spill] sm:$0xff] %v3168_v46  ;;  %v3173_v47 = vld [vmem:[%s3985_s2 + $0x78] sm:$0xff] }
  0x2d   :  { %v238_v19 = vclz %v2552_v18  ;;  %vm372_vm12 = vcmp.eq.s32.totalorder %v367_v48, 2  ;;  %vm369_vm14 = vcmp.eq.s32.totalorder %v367_v48, 0  ;;  %vm368_vm0 = vcmp.lt.s32.totalorder %v367_v48, 2  ;;  %4056 = vst [vmem:[#allocation7_spill] sm:$0xff] %v3173_v47 }
  0x2e   :  { %v3176_v48 = vsub.s32 4, %v3065_v3 }
  0x2f   :  { %v2553_v20 = vadd.s32 4294967294, %v238_v19 }
  0x30   :  { %4057 = vst [vmem:[#allocation8_spill] sm:$0xff] %v3176_v48 }
  0x31   :  { %vm2554_vm8 = vcmp.lt.s32.totalorder %v2553_v20, 0 }
  0x32   :  { %v241_v22 = vsel %vm2554_vm8, 0, %v2553_v20 }
  0x33   :  { %v242_v23 = vsub.s32 32, %v241_v22  ;;  %v243_v24 = vshll.u32 %v234_v16, %v241_v22  ;;  %v246_v25 = vsub.s32 4294967266, %v241_v22  ;;  %v3110_v16 = vsub.s32 2, %v3065_v3 }
  0x35   :  { %v244_v26 = vshrl.u32 %v226_v21, %v242_v23  ;;  %v247_v27 = vadd.s32 127, %v246_v25 }
  0x37   :  { %v245_v29 = vor.u32 %v244_v26, %v243_v24  ;;  %v248_v31 = vshll.u32 %v247_v27, 23  ;;  %v3139_v27 = vld [vmem:[%s3985_s2 + $0x50] sm:$0xff] }
  0x38   :  { %4052 = vst [vmem:[#allocation3_spill] sm:$0xff] %v3139_v27 }
  0x39   :  { %v249_v33 = vor.u32 4788187, %v248_v31  ;;  %v252_v35 = vcvt.s32.f32 %v245_v29  ;;  %v3144_v29 = vld [vmem:[%s3985_s2 + $0x58] sm:$0xff]  ;;  %v3147_v31 = vsub.s32 3, %v3065_v3 }
  0x3a   :  { %4053 = vst [vmem:[#allocation4_spill] sm:$0xff] %v3144_v29 }
  0x3b   :  { %v250_v37 = vand.u32 2147483647, %v249_v33  ;;  %4054 = vst [vmem:[#allocation5_spill] sm:$0xff] %v3147_v31 }
  0x3d   :  { %v253_v38 = vmul.f32 %v252_v35, %v250_v37 }
  0x3f   :  { %v254_v39 = vxor.u32 2147483648, %v253_v38 }
  0x41   :  { %v255_v41 = vsel %vm172_vm9, %v254_v39, %v253_v38 }
  0x42   :  { %v258_v42 = vsel %vm171_vm10, %v2931_v5, %v255_v41 }
  0x43   :  { %2815 = vcosq.f32 %v258_v42 }
  0x44   :  { %2817 = vsinq.f32 %v258_v42 }
  0x50   :  { %v2816_v49 = vpop.eup %2815 }
  0x51   :  { %v2818_v50 = vpop.eup %2817  ;;  %v269_v51 = vxor.u32 2147483648, %v2816_v49 }
  0x52   :  { %v266_v12 = vxor.u32 2147483648, %v2818_v50 }
  0x53   :  { %v270_v52 = vsel %vm268_vm11, %v269_v51, %v2818_v50  ;;  %v374_v53 = vsel %vm372_vm12, %v269_v51, %v2818_v50 }
  0x54   :  { %v267_v54 = vsel %vm265_vm13, %v2816_v49, %v266_v12  ;;  %v371_v55 = vsel %vm369_vm14, %v2816_v49, %v266_v12 }
  0x55   :  { %v271_v56 = vsel %vm264_vm15, %v267_v54, %v270_v52  ;;  %v375_v57 = vsel %vm368_vm0, %v371_v55, %v374_v53 }
  0x56   :  { %v3013_v58 = vsel %vm262_vm2, nan, %v271_v56  ;;  %v3027_v61 = vsel %vm262_vm2, nan, %v375_v57 }
  0x57   :  { %2740 = vmatprep.subr.mxu0 %v3013_v58  ;;  %2788 = vmatprep.subr.mxu1 %v3013_v58  ;;  %v3075_v6 = vrot.slane %v3013_v58, %v3071_v4  ;;  %v3079_v7 = vrot.slane %v3027_v61, %v3071_v4  ;;  %v3130_v25 = vrot.slane %v3013_v58, %v3110_v16 }
  0x58   :  { %2741 = vmatpush3.msra.mxu0 %v3013_v58  ;;  %2789 = vmatpush3.msra.mxu1 %v3013_v58  ;;  %v3134_v26 = vrot.slane %v3027_v61, %v3110_v16  ;;  %v3159_v43 = vrot.slane %v3013_v58, %v3147_v31  ;;  %v3163_v44 = vrot.slane %v3027_v61, %v3147_v31 }
  0x59   :  { %2743 = vmatmul.mubr.msk.f32.vlgmr.msra.gmra.mxu0 %vm381_vm1, %v3018_v59  ;;  %2746 = vmatmul.mubr.msk.f32.vlgmr.msra.gmra.mxu1 %vm381_vm1, %v3023_v60  ;;  %v656_v17 = vmul.f32 %v3075_v6, %v3084_v8  ;;  %v657_v18 = vmul.f32 %v3075_v6, %v3089_v9  ;;  %v664_v19 = vmul.f32 %v3079_v7, %v3084_v8 }
  0x5a   :  { %2748 = vmatprep.subr.mxu1 %v3027_v61  ;;  %2750 = vmatprep.mubr.msk.f32.mxu1 %vm381_vm1, %v483_v62  ;;  %v665_v20 = vmul.f32 %v3079_v7, %v3089_v9  ;;  %v706_v39 = vmul.f32 %v3139_v27, %v3130_v25  ;;  %v707_v40 = vmul.f32 %v3144_v29, %v3130_v25 }
  0x5b   :  { %2749 = vmatpush3.msra.mxu1 %v3027_v61  ;;  %2758 = vmatprep.mubr.msk.f32.mxu0 %vm381_vm1, %v2953_v15  ;;  %v3068_v15 = vsub.s32 1, %v3065_v3  ;;  %v718_v41 = vmul.f32 %v3139_v27, %v3134_v26  ;;  %v719_v42 = vmul.f32 %v3144_v29, %v3134_v26  ;;  %v735_v52 = vmul.f32 %v3168_v46, %v3159_v43 }
  0x5c   :  { %v736_v53 = vmul.f32 %v3173_v47, %v3159_v43  ;;  %v747_v54 = vmul.f32 %v3168_v46, %v3163_v44  ;;  %v748_v55 = vmul.f32 %v3173_v47, %v3163_v44  ;;  %v3188_v56 = vrot.slane %v3013_v58, %v3176_v48  ;;  %910 = vst.msk [vmem:[%s3986_s9] sm:$0xff] %vm616_vm3, %v3013_v58 }
  0x5d   :  { %2751 = vmatmul.mubr.msk.f32.vlgmr.msra.gmra.mxu1 %vm381_vm1, %v3043_v63  ;;  %v3093_v10 = vrot.slane %v3013_v58, %v3068_v15  ;;  %v3097_v11 = vrot.slane %v3027_v61, %v3068_v15  ;;  %v3192_v57 = vrot.slane %v3027_v61, %v3176_v48  ;;  %911 = vst.msk [vmem:[%s3986_s9 + $0x8] sm:$0xff] %vm616_vm3, %v3027_v61 }
  0x5e   :  { %2753 = vmatprep.mubr.msk.f32.mxu1 %vm381_vm1, %v3049_v0 }
  0x5f   :  { %v677_v21 = vmul.f32 %v3102_v13, %v3093_v10  ;;  %v678_v22 = vmul.f32 %v3107_v14, %v3093_v10  ;;  %v689_v23 = vmul.f32 %v3102_v13, %v3097_v11  ;;  %v690_v24 = vmul.f32 %v3107_v14, %v3097_v11 }
  0x61   :  { %2754 = vmatmul.mubr.msk.f32.gmra.mxu1 %vm381_vm1, %v3060_v1  ;;  %v681_v33 = vadd.f32 %v677_v21, %v656_v17  ;;  %v682_v35 = vadd.f32 %v678_v22, %v657_v18  ;;  %v693_v37 = vadd.f32 %v689_v23, %v664_v19  ;;  %v694_v38 = vadd.f32 %v690_v24, %v665_v20 }
  0x62   :  { %2766 = vmatprep.mubr.msk.f32.mxu1 %vm381_vm1, %v483_v62  ;;  %v3197_v62 = vld [vmem:[%s3985_s2 + $0x90] sm:$0xff]  ;;  %v3205_v17 = vsub.s32 5, %v3065_v3  ;;  %v3208_v18 = vsub.s32 6, %v3065_v3  ;;  %v765_v24 = vmul.f32 %v3202_v2, %v3188_v56 }
  0x63   :  { %v710_v49 = vadd.f32 %v706_v39, %v681_v33  ;;  %v711_v50 = vadd.f32 %v707_v40, %v682_v35  ;;  %v722_v51 = vadd.f32 %v718_v41, %v693_v37  ;;  %v723_v12 = vadd.f32 %v719_v42, %v694_v38  ;;  %4058 = vst [vmem:[#allocation9_spill] sm:$0xff] %v3197_v62  ;;  %v3229_v39 = vld [vmem:[%s3985_s2 + $0xb0] sm:$0xff]  ;;  %v3234_v40 = vld [vmem:[%s3985_s2 + $0xb8] sm:$0xff] }
  0x64   :  { %4060 = vst [vmem:[#allocation11_spill] sm:$0xff] %v3205_v17  ;;  %4061 = vst [vmem:[#allocation12_spill] sm:$0xff] %v3208_v18  ;;  %v764_v23 = vmul.f32 %v3197_v62, %v3188_v56  ;;  %v776_v33 = vmul.f32 %v3197_v62, %v3192_v57  ;;  %v777_v35 = vmul.f32 %v3202_v2, %v3192_v57 }
  0x65   :  { %v739_v19 = vadd.f32 %v735_v52, %v710_v49  ;;  %v740_v20 = vadd.f32 %v736_v53, %v711_v50  ;;  %v751_v21 = vadd.f32 %v747_v54, %v722_v51  ;;  %v752_v22 = vadd.f32 %v748_v55, %v723_v12  ;;  %4062 = vst [vmem:[#allocation13_spill] sm:$0xff] %v3229_v39  ;;  %v3247_v49 = vld [vmem:[%s3985_s2] sm:$0xff]  ;;  %v3252_v50 = vld [vmem:[%s3985_s2 + $0x8] sm:$0xff] }
  0x66   :  { %v3220_v37 = vrot.slane %v3013_v58, %v3205_v17  ;;  %v3224_v38 = vrot.slane %v3027_v61, %v3205_v17  ;;  %4063 = vst [vmem:[#allocation14_spill] sm:$0xff] %v3234_v40  ;;  %v3238_v41 = vrot.slane %v3013_v58, %v3208_v18  ;;  %v3242_v42 = vrot.slane %v3027_v61, %v3208_v18 }
  0x67   :  { %v768_v51 = vadd.f32 %v764_v23, %v739_v19  ;;  %v769_v12 = vadd.f32 %v765_v24, %v740_v20  ;;  %v780_v52 = vadd.f32 %v776_v33, %v751_v21  ;;  %v781_v53 = vadd.f32 %v777_v35, %v752_v22  ;;  %v3270_v19 = vld [vmem:[%s3985_s2 + $0xd8] sm:$0xff]  ;;  %v3282_v23 = vld [vmem:[%s3985_s2 + $0x20] sm:$0xff]  ;;  %v3287_v24 = vld [vmem:[%s3985_s2 + $0x28] sm:$0xff] }
  0x68   :  { %v793_v54 = vmul.f32 %v3229_v39, %v3220_v37  ;;  %v794_v55 = vmul.f32 %v3234_v40, %v3220_v37  ;;  %v805_v45 = vmul.f32 %v3229_v39, %v3224_v38  ;;  %v806_v36 = vmul.f32 %v3234_v40, %v3224_v38  ;;  %4065 = vst [vmem:[#allocation16_spill] sm:$0xff] %v3270_v19 }
  0x69   :  { %v3273_v20 = vsub.s32 7, %v3065_v3  ;;  %v654_v21 = vmul.f32 %v3075_v6, %v3247_v49  ;;  %v655_v22 = vmul.f32 %v3075_v6, %v3252_v50  ;;  %v822_v3 = vmul.f32 %v3265_v34, %v3238_v41 }
  0x6a   :  { %v823_v33 = vmul.f32 %v3270_v19, %v3238_v41  ;;  %v834_v35 = vmul.f32 %v3265_v34, %v3242_v42  ;;  %v835_v6 = vmul.f32 %v3270_v19, %v3242_v42  ;;  %v797_v32 = vadd.f32 %v793_v54, %v768_v51 }
  0x6b   :  { %4066 = vst [vmem:[#allocation17_spill] sm:$0xff] %v3273_v20  ;;  %v798_v30 = vadd.f32 %v794_v55, %v769_v12  ;;  %v809_v28 = vadd.f32 %v805_v45, %v780_v52  ;;  %v810_v40 = vadd.f32 %v806_v36, %v781_v53  ;;  %v662_v39 = vmul.f32 %v3079_v7, %v3247_v49  ;;  %v3320_v12 = vld [vmem:[%s3985_s2 + $0xf0] sm:$0xff]  ;;  %v3325_v52 = vld [vmem:[%s3985_s2 + $0xf8] sm:$0xff] }
  0x6c   :  { %v663_v18 = vmul.f32 %v3079_v7, %v3252_v50  ;;  %v3303_v2 = vrot.slane %v3013_v58, %v3273_v20  ;;  %v3307_v34 = vrot.slane %v3027_v61, %v3273_v20  ;;  %v675_v51 = vmul.f32 %v3282_v23, %v3093_v10  ;;  %4067 = vst [vmem:[#allocation18_spill] sm:$0xff] %v3320_v12 }
  0x6d   :  { %v676_v36 = vmul.f32 %v3287_v24, %v3093_v10  ;;  %v687_v45 = vmul.f32 %v3282_v23, %v3097_v11  ;;  %v688_v7 = vmul.f32 %v3287_v24, %v3097_v11  ;;  %4068 = vst [vmem:[#allocation19_spill] sm:$0xff] %v3325_v52  ;;  %v3332_v10 = vld [vmem:[%s3985_s2 + $0x40] sm:$0xff]  ;;  %v3337_v11 = vld [vmem:[%s3985_s2 + $0x48] sm:$0xff]  ;;  %v826_v54 = vadd.f32 %v822_v3, %v797_v32 }
  0x6e   :  { %v827_v55 = vadd.f32 %v823_v33, %v798_v30  ;;  %v838_v19 = vadd.f32 %v834_v35, %v809_v28  ;;  %v839_v20 = vadd.f32 %v835_v6, %v810_v40  ;;  %v851_v62 = vmul.f32 %v3320_v12, %v3303_v2 }
  0x6f   :  { %v852_v47 = vmul.f32 %v3325_v52, %v3303_v2  ;;  %v863_v46 = vmul.f32 %v3320_v12, %v3307_v34  ;;  %v864_v17 = vmul.f32 %v3325_v52, %v3307_v34  ;;  %v679_v48 = vadd.f32 %v675_v51, %v654_v21  ;;  %v3358_v21 = vld [vmem:[%s3985_s2 + $0x60] sm:$0xff] }
  0x70   :  { %v680_v31 = vadd.f32 %v676_v36, %v655_v22  ;;  %v691_v29 = vadd.f32 %v687_v45, %v662_v39  ;;  %v692_v27 = vadd.f32 %v688_v7, %v663_v18  ;;  %v704_v28 = vmul.f32 %v3332_v10, %v3130_v25  ;;  %v3363_v18 = vld [vmem:[%s3985_s2 + $0x68] sm:$0xff] }
  0x71   :  { %v705_v30 = vmul.f32 %v3337_v11, %v3130_v25  ;;  %v716_v32 = vmul.f32 %v3332_v10, %v3134_v26  ;;  %v717_v40 = vmul.f32 %v3337_v11, %v3134_v26  ;;  %4069 = vst [vmem:[#allocation20_spill] sm:$0xff] %v3363_v18  ;;  %v855_v39 = vadd.f32 %v851_v62, %v826_v54 }
  0x72   :  { %v856_v22 = vadd.f32 %v852_v47, %v827_v55  ;;  %v867_v25 = vadd.f32 %v863_v46, %v838_v19  ;;  %v868_v33 = vadd.f32 %v864_v17, %v839_v20  ;;  %v708_v35 = vadd.f32 %v704_v28, %v679_v48  ;;  %v3376_v46 = vld [vmem:[%s3985_s2 + $0x80] sm:$0xff] }
  0x73   :  { %v709_v6 = vadd.f32 %v705_v30, %v680_v31  ;;  %v720_v51 = vadd.f32 %v716_v32, %v691_v29  ;;  %v721_v36 = vadd.f32 %v717_v40, %v692_v27  ;;  %v733_v45 = vmul.f32 %v3358_v21, %v3159_v43  ;;  %4070 = vst [vmem:[#allocation21_spill] sm:$0xff] %v3376_v46  ;;  %v3381_v27 = vld [vmem:[%s3985_s2 + $0x88] sm:$0xff]  ;;  %v3398_v32 = vld [vmem:[%s3985_s2 + $0xa0] sm:$0xff] }
  0x74   :  { %v734_v7 = vmul.f32 %v3363_v18, %v3159_v43  ;;  %v745_v52 = vmul.f32 %v3358_v21, %v3163_v44  ;;  %v746_v62 = vmul.f32 %v3363_v18, %v3163_v44  ;;  %4071 = vst [vmem:[#allocation22_spill] sm:$0xff] %v3381_v27  ;;  %v3383_v31 = vsub.f32 %v855_v39, %v868_v33 }
  0x75   :  { %v3385_v43 = vadd.f32 %v867_v25, %v856_v22  ;;  %v762_v48 = vmul.f32 %v3376_v46, %v3188_v56  ;;  %v763_v44 = vmul.f32 %v3381_v27, %v3188_v56  ;;  %v774_v17 = vmul.f32 %v3376_v46, %v3192_v57  ;;  %4072 = vst [vmem:[#allocation23_spill] sm:$0xff] %v3398_v32  ;;  %v3403_v56 = vld [vmem:[%s3985_s2 + $0xa8] sm:$0xff] }
  0x76   :  { %v775_v19 = vmul.f32 %v3381_v27, %v3192_v57  ;;  %v737_v54 = vadd.f32 %v733_v45, %v708_v35  ;;  %v738_v55 = vadd.f32 %v734_v7, %v709_v6  ;;  %v749_v28 = vadd.f32 %v745_v52, %v720_v51  ;;  %4073 = vst [vmem:[#allocation24_spill] sm:$0xff] %v3403_v56  ;;  %v3420_v35 = vld [vmem:[%s3985_s2 + $0xc0] sm:$0xff]  ;;  %v3425_v6 = vld [vmem:[%s3985_s2 + $0xc8] sm:$0xff] }
  0x77   :  { %v750_v30 = vadd.f32 %v746_v62, %v721_v36  ;;  %v883_v40 = vmul.f32 %v3383_v31, %v3013_v58  ;;  %v884_v57 = vmul.f32 %v3385_v43, %v3027_v61  ;;  %v791_v52 = vmul.f32 %v3398_v32, %v3220_v37 }
  0x78   :  { %v792_v22 = vmul.f32 %v3403_v56, %v3220_v37  ;;  %v803_v25 = vmul.f32 %v3398_v32, %v3224_v38  ;;  %v804_v33 = vmul.f32 %v3403_v56, %v3224_v38  ;;  %v766_v45 = vadd.f32 %v762_v48, %v737_v54  ;;  %v3446_v54 = vld [vmem:[%s3985_s2 + $0xe0] sm:$0xff] }
  0x79   :  { %v767_v37 = vadd.f32 %v763_v44, %v738_v55  ;;  %v778_v7 = vadd.f32 %v774_v17, %v749_v28  ;;  %v779_v62 = vadd.f32 %v775_v19, %v750_v30  ;;  %v885_v56 = vadd.f32 %v884_v57, %v883_v40 }
  0x7a   :  { %v820_v46 = vmul.f32 %v3420_v35, %v3238_v41  ;;  %v821_v18 = vmul.f32 %v3425_v6, %v3238_v41  ;;  %v832_v48 = vmul.f32 %v3420_v35, %v3242_v42  ;;  %v833_v19 = vmul.f32 %v3425_v6, %v3242_v42  ;;  %v3451_v41 = vld [vmem:[%s3985_s2 + $0xe8] sm:$0xff] }
  0x7b   :  { %4077 = vst [vmem:[#allocation28_spill] sm:$0xff] %v3451_v41  ;;  %v808_v28 = vadd.f32 %v804_v33, %v779_v62  ;;  %v886_v57 = vsel %vm616_vm3, %v885_v56, 0.0 }
  0x7c   :  { %v887_v62 = vrot.slane %v886_v57, 4 }
  0x80   :  { %v55_v29 = vpop.permute.xlu0 %54 }
  0x81   :  { %v65_v47 = vpop.permute.xlu1 %64 }
  0x84   :  { %v60_v39 = vpop.permute.xlu0 %59 }
  0x85   :  { %v70_v38 = vpop.permute.xlu1 %69 }
  0x89   :  { %v3468_v56 = vpop.permute.xlu1 %599 }
  0xc6   :  { %v3327_v53 = vpop.f32.mrf.mxu0 }
  0xc7   :  { %v3428_v12 = vadd.f32 %v3327_v53, %v60_v39 }
  0xc8   :  { %v151_v3 = vpop.f32.mrf.mxu0 }
  0xc9   :  { %4074 = vst [vmem:[#allocation25_spill] sm:$0xff] %v3428_v12  ;;  %v3436_v44 = vadd.f32 %v151_v3, %v55_v29  ;;  %v795_v3 = vadd.f32 %v791_v52, %v766_v45  ;;  %v796_v29 = vadd.f32 %v792_v22, %v767_v37  ;;  %v861_v52 = vmul.f32 %v3446_v54, %v3307_v34  ;;  %v3463_v22 = vpop.permute.xlu0 %594 }
  0xca   :  { %v2739_v26 = vpop.f32.mrf.mxu0 }
  0xcb   :  { %4075 = vst [vmem:[#allocation26_spill] sm:$0xff] %v3436_v44  ;;  %v3438_v17 = vadd.f32 %v2739_v26, %v70_v38  ;;  %v807_v26 = vadd.f32 %v803_v25, %v778_v7  ;;  %v850_v38 = vmul.f32 %v3451_v41, %v3303_v2  ;;  %v824_v45 = vadd.f32 %v820_v46, %v795_v3 }
  0xcc   :  { %v161_v20 = vpop.f32.mrf.mxu0  ;;  %v825_v37 = vadd.f32 %v821_v18, %v796_v29 }
  0xcd   :  { %4076 = vst [vmem:[#allocation27_spill] sm:$0xff] %v3438_v17  ;;  %v3453_v30 = vadd.f32 %v161_v20, %v65_v47  ;;  %v836_v7 = vadd.f32 %v832_v48, %v807_v26  ;;  %v3474_v29 = vpop.permute.xlu0 %604 }
  0xcf   :  { %v865_v48 = vadd.f32 %v861_v52, %v836_v7 }
 0x119   :  { %v2744_v51 = vpop.f32.mrf.mxu0  ;;  %v2747_v36 = vpop.f32.mrf.mxu1 }
 0x11a   :  { %v480_v53 = vadd.f32 %v2744_v51, %v3428_v12  ;;  %v849_v51 = vmul.f32 %v3446_v54, %v3303_v2  ;;  %v482_v47 = vadd.f32 %v2747_v36, %v3438_v17  ;;  %v854_v17 = vadd.f32 %v850_v38, %v825_v37 }
 0x11b   :  { %v460_v32 = vpop.f32.mrf.mxu0  ;;  %v470_v27 = vpop.f32.mrf.mxu1 }
 0x11c   :  { %v479_v40 = vadd.f32 %v460_v32, %v3436_v44  ;;  %v862_v32 = vmul.f32 %v3451_v41, %v3307_v34  ;;  %v481_v2 = vadd.f32 %v470_v27, %v3453_v30  ;;  %v837_v44 = vadd.f32 %v833_v19, %v808_v28  ;;  %v3476_v27 = vpop.permute.xlu1 %609 }
 0x11d   :  { %v2752_v55 = vpop.f32.mrf.mxu1  ;;  %v853_v34 = vadd.f32 %v849_v51, %v824_v45  ;;  %v888_v41 = vadd.f32 %v887_v62, %v886_v57  ;;  %v870_v38 = vadd.f32 %v865_v48, %v854_v17 }
 0x11e   :  { %v585_v42 = vadd.f32 %v2752_v55, %v480_v53  ;;  %v866_v3 = vadd.f32 %v862_v32, %v837_v44 }
 0x11f   :  { %v565_v39 = vpop.f32.mrf.mxu1 }
 0x120   :  { %v589_v20 = vmax.f32 %v585_v42, 0.0  ;;  %v584_v25 = vadd.f32 %v565_v39, %v479_v40  ;;  %v869_v57 = vsub.f32 %v853_v34, %v866_v3  ;;  %v893_v3 = vmul.f32 %v870_v38, %v3013_v58 }
 0x121   :  { %v2755_v33 = vpop.f32.mrf.mxu1 }
 0x122   :  { %v588_v53 = vmax.f32 %v584_v25, 0.0  ;;  %v587_v55 = vadd.f32 %v2755_v33, %v482_v47  ;;  %v613_v36 = vmul.f32 %v3468_v56, %v589_v20  ;;  %v873_v32 = vmul.f32 %v869_v57, %v3013_v58 }
 0x123   :  { %v575_v12 = vpop.f32.mrf.mxu1  ;;  %v874_v33 = vmul.f32 %v870_v38, %v3027_v61 }
 0x124   :  { %v612_v40 = vmul.f32 %v3463_v22, %v588_v53  ;;  %v591_v42 = vmax.f32 %v587_v55, 0.0  ;;  %v586_v39 = vadd.f32 %v575_v12, %v481_v2  ;;  %v618_v19 = vsel %vm616_vm3, %v613_v36, 0.0  ;;  %v633_v36 = vpop.permute.xlu0 %632 }
 0x125   :  { %v889_v12 = vrot.slane %v888_v41, 2  ;;  %v875_v62 = vadd.f32 %v874_v33, %v873_v32 }
 0x126   :  { %v617_v46 = vsel %vm616_vm3, %v612_v40, 0.0  ;;  %v590_v18 = vmax.f32 %v586_v39, 0.0  ;;  %v615_v26 = vmul.f32 %v3476_v27, %v591_v42  ;;  %v3487_v42 = vrot.slane %v633_v36, %v3071_v4 }
 0x127   :  { %v619_v47 = vadd.f32 %v618_v19, %v617_v46  ;;  %v890_v25 = vadd.f32 %v889_v12, %v888_v41  ;;  %v876_v40 = vsel %vm616_vm3, %v875_v62, 0.0  ;;  %v894_v19 = vmul.f32 %v869_v57, %v3027_v61 }
 0x128   :  { %v614_v28 = vmul.f32 %v3474_v29, %v590_v18  ;;  %v622_v52 = vsel %vm616_vm3, %v615_v26, 0.0  ;;  %v877_v41 = vrot.slane %v876_v40, 4 }
 0x129   :  { %v891_v7 = vrot.slane %v890_v25, 1 }
 0x12a   :  { %v620_v51 = vsel %vm616_vm3, %v614_v28, 0.0  ;;  %v878_v18 = vadd.f32 %v877_v41, %v876_v40  ;;  %v897_v28 = vmul.f32 %v3385_v43, %v3013_v58 }
 0x12b   :  { %v621_v20 = vadd.f32 %v620_v51, %v619_v47  ;;  %v892_v55 = vadd.f32 %v891_v7, %v890_v25  ;;  %v898_v47 = vmul.f32 %v3383_v31, %v3027_v61  ;;  %v895_v51 = vsub.f32 %v893_v3, %v894_v19 }
 0x12c   :  { %v879_v48 = vrot.slane %v878_v18, 2  ;;  %v4078_v3 = vmov 683565275  }
 0x12d   :  { %v623_v44 = vadd.f32 %v622_v52, %v621_v20  ;;  %2819 = vrcp.f32 %v892_v55  ;;  %v899_v52 = vsub.f32 %v897_v28, %v898_v47  ;;  %v896_v32 = vmul.f32 2.0, %v895_v51 }
 0x12e   :  { %v880_v26 = vadd.f32 %v879_v48, %v878_v18  ;;  %v4080_v47 = vmov 2131351028  }
 0x12f   :  { %v624_v45 = vrot.slane %v623_v44, 4  ;;  %v905_v7 = vmul.f32 %v896_v32, %v892_v55 }
 0x130   :  { %v881_v20 = vrot.slane %v880_v26, 1 }
 0x131   :  { %v625_v37 = vadd.f32 %v624_v45, %v623_v44 }
 0x132   :  { %v882_v45 = vadd.f32 %v881_v20, %v880_v26  ;;  %v4079_v26 = vmov 2475754826   ;;  %v4081_v20 = vmov 2102212464  }
 0x133   :  { %v626_v2 = vrot.slane %v625_v37, 2 }
 0x135   :  { %v627_v53 = vadd.f32 %v626_v2, %v625_v37  ;;  %v900_v37 = vmul.f32 2.0, %v899_v52 }
 0x137   :  { %v628_v17 = vrot.slane %v627_v53, 1  ;;  %v906_v62 = vmul.f32 %v900_v37, %v882_v45  ;;  %v4083_v45 = vmov 1326507024  }
 0x139   :  { %v629_v39 = vadd.f32 %v628_v17, %v627_v53  ;;  %v907_v2 = vsub.f32 %v905_v7, %v906_v62 }
 0x13a   :  { %v2820_v12 = vpop.eup %2819 }
 0x13b   :  { %v639_v34 = vadd.f32 %v3487_v42, %v629_v39  ;;  %v902_v44 = vmul.f32 %v2820_v12, %v892_v55 }
 0x13d   :  { %v2567_v46 = vmul.f32 -1.442695, %v639_v34  ;;  %v903_v38 = vsub.f32 2.0, %v902_v44 }
 0x13f   :  { %2821 = vpow2.f32 %v2567_v46  ;;  %v904_v57 = vmul.f32 %v2820_v12, %v903_v38 }
 0x141   :  { %v908_v43 = vmul.f32 %v904_v57, %v904_v57 }
 0x143   :  { %v909_v31 = vmul.f32 %v908_v43, %v907_v2 }
 0x14c   :  { %v2822_v25 = vpop.eup %2821 }
 0x14d   :  { %v643_v33 = vadd.f32 1.0, %v2822_v25  ;;  %v4082_v25 = vmov 920167782  }
 0x14f   :  { %2823 = vrcp.f32 %v643_v33 }
 0x15c   :  { %v2824_v53 = vpop.eup %2823 }
 0x15d   :  { %913 = vst.msk [vmem:[%s3987_s10] sm:$0x1] %vm912_vm4, %v2824_v53  ;;  %v914_v55 = vmul.f32 %v2824_v53, %v909_v31 }
 0x15f   :  { %v3511_v36 = vsub.f32 %v2931_v5, %v914_v55 }
 0x161   :  { %v919_v58 = vand.u32 2139095040, %v3511_v36  ;;  %v916_v41 = vand.u32 2147483647, %v3511_v36  ;;  %vm918_vm12 = vcmp.lt.s32.totalorder %v3511_v36, 0 }
 0x163   :  { %v920_v40 = vshrl.u32 %v919_v58, 23  ;;  %v923_v46 = vand.u32 8388607, %v916_v41  ;;  %vm917_vm13 = vcmp.le.f32.partialorder %v916_v41, 0.7853982 }
 0x165   :  { %v2596_v17 = vadd.s32 4294967169, %v920_v40  ;;  %v924_v38 = vor.u32 8388608, %v923_v46 }
 0x167   :  { %v926_v39 = vadd.s32 1, %v2596_v17 }
 0x169   :  { %vm927_vm5 = vcmp.gt.s32.totalorder %v926_v39, 0 }
 0x16a   :  { %v928_v61 = vsel %vm927_vm5, %v926_v39, 0 }
 0x16b   :  { %v930_v34 = vand.u32 31, %v928_v61  ;;  %v929_v48 = vshrl.u32 %v928_v61, 5 }
 0x16d   :  { %v931_v18 = vsub.s32 32, %v930_v34  ;;  %v933_v19 = vshll.u32 %v4078_v3, %v930_v34  ;;  %v936_v5 = vshll.u32 %v4079_v26, %v930_v34  ;;  %v939_v51 = vshll.u32 %v4080_v47, %v930_v34 }
 0x16e   :  { %v942_v44 = vshll.u32 %v4081_v20, %v930_v34  ;;  %v945_v33 = vshll.u32 %v4082_v25, %v930_v34  ;;  %vm948_vm6 = vcmp.lt.s32.totalorder %v929_v48, 1  ;;  %vm951_vm7 = vcmp.lt.s32.totalorder %v929_v48, 4 }
 0x16f   :  { %v934_v28 = vshrl.u32 %v4079_v26, %v931_v18  ;;  %v937_v12 = vshrl.u32 %v4080_v47, %v931_v18  ;;  %v940_v52 = vshrl.u32 %v4081_v20, %v931_v18  ;;  %v943_v32 = vshrl.u32 %v4082_v25, %v931_v18 }
 0x170   :  { %v946_v37 = vshrl.u32 %v4083_v45, %v931_v18  ;;  %v932_v58 = vshrl.u32 %v4078_v3, %v931_v18  ;;  %vm950_vm8 = vcmp.lt.s32.totalorder %v929_v48, 3  ;;  %vm949_vm9 = vcmp.lt.s32.totalorder %v929_v48, 2 }
 0x171   :  { %v935_v57 = vor.u32 %v934_v28, %v933_v19  ;;  %v938_v7 = vor.u32 %v937_v12, %v936_v5  ;;  %v941_v62 = vor.u32 %v940_v52, %v939_v51  ;;  %v944_v2 = vor.u32 %v943_v32, %v942_v44 }
 0x172   :  { %v947_v43 = vor.u32 %v946_v37, %v945_v33  ;;  %v964_v34 = vshll.u32 %v924_v38, 8 }
 0x173   :  { %v953_v31 = vsel %vm951_vm7, %v941_v62, 2102212464  ;;  %v956_v53 = vsel %vm948_vm6, %v935_v57, %v938_v7  ;;  %v960_v55 = vsel %vm948_vm6, %v938_v7, %v941_v62  ;;  %v957_v40 = vsel %vm951_vm7, %v944_v2, 920167782 }
 0x174   :  { %v961_v17 = vsel %vm951_vm7, %v947_v43, 1326507024  ;;  %v958_v39 = vsel %vm950_vm8, %v941_v62, %v957_v40  ;;  %v952_v46 = vsel %vm948_vm6, %v932_v58, %v935_v57  ;;  %v954_v19 = vsel %vm950_vm8, %v938_v7, %v953_v31 }
 0x175   :  { %v962_v61 = vsel %vm950_vm8, %v944_v2, %v961_v17  ;;  %v959_v5 = vsel %vm949_vm9, %v956_v53, %v958_v39  ;;  %v955_v32 = vsel %vm949_vm9, %v952_v46, %v954_v19  ;;  %vm1008_vm7 = vweird.f32 %v3511_v36 }
 0x176   :  { %v963_v28 = vsel %vm949_vm9, %v960_v55, %v962_v61  ;;  %v3531_v52 = vmul.u32.u64.low %v964_v34, %v959_v5  ;;  %v3532_v44 = vmul.u32.u64.high %v964_v34, %v959_v5, %v3531_v52  ;;  %v971_v33 = vmul.u32 %v964_v34, %v955_v32 }
 0x177   :  { %v3528_v12 = vmul.u32.u64.low %v964_v34, %v963_v28  ;;  %v3529_v51 = vmul.u32.u64.high %v964_v34, %v963_v28, %v3528_v12 }
 0x178   :  { %v974_v18 = vadd.s32 1, %v3532_v44 }
 0x179   :  { %vm973_vm10 = vc.u32 %v3529_v51, %v3531_v52  ;;  %v972_v58 = vadd.s32 %v3531_v52, %v3529_v51 }
 0x17a   :  { %v975_v48 = vsel %vm973_vm10, %v974_v18, %v3532_v44 }
 0x17b   :  { %v976_v37 = vadd.s32 %v975_v48, %v971_v33 }
 0x17d   :  { %v977_v38 = vadd.s32 536870912, %v976_v37 }
 0x17f   :  { %v978_v57 = vshrl.u32 %v977_v38, 30 }
 0x181   :  { %v979_v7 = vshll.u32 %v978_v57, 30  ;;  %v1002_v18 = vsub.s32 4, %v978_v57 }
 0x183   :  { %v980_v62 = vsub.s32 %v976_v37, %v979_v7  ;;  %v1003_v52 = vsel %vm918_vm12, %v1002_v18, %v978_v57 }
 0x184   :  { %v1005_v48 = vsel %vm917_vm13, 0, %v1003_v52 }
 0x185   :  { %v982_v2 = vsub.s32 0, %v980_v62  ;;  %v1112_v37 = vadd.s32 3, %v1005_v48  ;;  %v1009_v38 = vand.u32 3, %v1005_v48 }
 0x187   :  { %v2597_v43 = vmin.u32 %v982_v2, %v980_v62  ;;  %v1113_v7 = vand.u32 3, %v1112_v37  ;;  %vm1014_vm14 = vcmp.eq.s32.totalorder %v1009_v38, 2  ;;  %vm1011_vm0 = vcmp.eq.s32.totalorder %v1009_v38, 0 }
 0x188   :  { %vm1010_vm5 = vcmp.lt.s32.totalorder %v1009_v38, 2 }
 0x189   :  { %v984_v31 = vclz %v2597_v43  ;;  %vm1118_vm15 = vcmp.eq.s32.totalorder %v1113_v7, 2  ;;  %vm1115_vm2 = vcmp.eq.s32.totalorder %v1113_v7, 0  ;;  %vm1114_vm6 = vcmp.lt.s32.totalorder %v1113_v7, 2 }
 0x18b   :  { %v2598_v53 = vadd.s32 4294967294, %v984_v31 }
 0x18d   :  { %vm2599_vm11 = vcmp.lt.s32.totalorder %v2598_v53, 0 }
 0x18e   :  { %v987_v55 = vsel %vm2599_vm11, 0, %v2598_v53 }
 0x18f   :  { %v988_v40 = vsub.s32 32, %v987_v55  ;;  %v992_v17 = vsub.s32 4294967266, %v987_v55  ;;  %v989_v39 = vshll.u32 %v980_v62, %v987_v55 }
 0x191   :  { %v990_v61 = vshrl.u32 %v972_v58, %v988_v40  ;;  %v993_v34 = vadd.s32 127, %v992_v17 }
 0x193   :  { %v991_v46 = vor.u32 %v990_v61, %v989_v39  ;;  %v994_v19 = vshll.u32 %v993_v34, 23 }
 0x195   :  { %v995_v5 = vor.u32 4788187, %v994_v19  ;;  %v998_v12 = vcvt.s32.f32 %v991_v46 }
 0x197   :  { %v996_v28 = vand.u32 2147483647, %v995_v5 }
 0x199   :  { %v999_v44 = vmul.f32 %v998_v12, %v996_v28  ;;  %v2849_v12 = vld [vmem:[%s3981_s4 + $0x10] sm:$0xff] }
 0x19b   :  { %v1000_v32 = vxor.u32 2147483648, %v999_v44 }
 0x19d   :  { %v1001_v33 = vsel %vm918_vm12, %v1000_v32, %v999_v44 }
 0x19e   :  { %v1004_v51 = vsel %vm917_vm13, %v3511_v36, %v1001_v33 }
 0x19f   :  { %2825 = vcosq.f32 %v1004_v51 }
 0x1a0   :  { %2827 = vsinq.f32 %v1004_v51 }
 0x1ac   :  { %v2826_v62 = vpop.eup %2825 }
 0x1ad   :  { %v2828_v2 = vpop.eup %2827  ;;  %v1015_v43 = vxor.u32 2147483648, %v2826_v62 }
 0x1ae   :  { %v1012_v31 = vxor.u32 2147483648, %v2828_v2 }
 0x1af   :  { %v1016_v53 = vsel %vm1014_vm14, %v1015_v43, %v2828_v2  ;;  %v1120_v41 = vsel %vm1118_vm15, %v1015_v43, %v2828_v2 }
 0x1b0   :  { %v1013_v55 = vsel %vm1011_vm0, %v2826_v62, %v1012_v31  ;;  %v1117_v58 = vsel %vm1115_vm2, %v2826_v62, %v1012_v31 }
 0x1b1   :  { %v1017_v57 = vsel %vm1010_vm5, %v1013_v55, %v1016_v53  ;;  %v1121_v40 = vsel %vm1114_vm6, %v1117_v58, %v1120_v41 }
 0x1b2   :  { %v3543_v17 = vsel %vm1008_vm7, nan, %v1017_v57  ;;  %v3545_v39 = vsel %vm1008_vm7, nan, %v1121_v40 }
 0x1b3   :  { %2756 = vmatprep.subr.mxu0 %v3543_v17  ;;  %2764 = vmatprep.subr.mxu1 %v3545_v39  ;;  %v1368_v61 = vrot.slane %v3543_v17, %v3071_v4  ;;  %v1376_v34 = vrot.slane %v3545_v39, %v3071_v4  ;;  %v1388_v46 = vrot.slane %v3543_v17, %v3068_v15 }
 0x1b4   :  { %1618 = vst.msk [vmem:[%s3986_s9 + $0x10] sm:$0xff] %vm616_vm3, %v3543_v17  ;;  %1619 = vst.msk [vmem:[%s3986_s9 + $0x18] sm:$0xff] %vm616_vm3, %v3545_v39  ;;  %2757 = vmatpush3.msra.mxu0 %v3543_v17  ;;  %2765 = vmatpush3.msra.mxu1 %v3545_v39  ;;  %v1400_v19 = vrot.slane %v3545_v39, %v3068_v15  ;;  %v1416_v28 = vrot.slane %v3543_v17, %v3110_v16 }
 0x1b5   :  { %2759 = vmatmul.mubr.msk.f32.vlgmr.msra.gmra.mxu0 %vm381_vm1, %v3018_v59  ;;  %2767 = vmatmul.mubr.msk.f32.vlgmr.msra.gmra.mxu1 %vm381_vm1, %v3043_v63  ;;  %v1369_v5 = vmul.f32 %v1368_v61, %v3247_v49  ;;  %v1370_v44 = vmul.f32 %v1368_v61, %v3252_v50  ;;  %v1371_v59 = vmul.f32 %v1368_v61, %v3084_v8 }
 0x1b6   :  { %2761 = vmatprep.mubr.msk.f32.mxu0 %vm381_vm1, %v2849_v12  ;;  %2769 = vmatprep.mubr.msk.f32.mxu1 %vm381_vm1, %v3049_v0  ;;  %v1372_v63 = vmul.f32 %v1368_v61, %v3089_v9  ;;  %v1377_v32 = vmul.f32 %v1376_v34, %v3247_v49  ;;  %v1378_v18 = vmul.f32 %v1376_v34, %v3252_v50 }
 0x1b7   :  { %v1389_v33 = vmul.f32 %v3282_v23, %v1388_v46  ;;  %v1390_v51 = vmul.f32 %v3287_v24, %v1388_v46  ;;  %v1391_v52 = vmul.f32 %v3102_v13, %v1388_v46  ;;  %v1392_v48 = vmul.f32 %v3107_v14, %v1388_v46 }
 0x1b8   :  { %v1401_v0 = vmul.f32 %v3282_v23, %v1400_v19  ;;  %v1402_v37 = vmul.f32 %v3287_v24, %v1400_v19  ;;  %v1379_v49 = vmul.f32 %v1376_v34, %v3084_v8  ;;  %v1380_v50 = vmul.f32 %v1376_v34, %v3089_v9  ;;  %v4084_v9 = vld [vmem:[#allocation3_spill] sm:$0xff]  ;;  %v4086_v34 = vld [vmem:[#allocation5_spill] sm:$0xff] }
 0x1b9   :  { %2762 = vmatmul.mubr.msk.f32.gmra.mxu0 %vm381_vm1, %v3023_v60  ;;  %2770 = vmatmul.mubr.msk.f32.gmra.mxu1 %vm381_vm1, %v3060_v1  ;;  %v1403_v38 = vmul.f32 %v3102_v13, %v1400_v19  ;;  %v1404_v7 = vmul.f32 %v3107_v14, %v1400_v19  ;;  %v1428_v62 = vrot.slane %v3545_v39, %v3110_v16  ;;  %v4085_v13 = vld [vmem:[#allocation4_spill] sm:$0xff] }
 0x1ba   :  { %v1393_v23 = vadd.f32 %v1389_v33, %v1369_v5  ;;  %v1394_v2 = vadd.f32 %v1390_v51, %v1370_v44  ;;  %v1395_v24 = vadd.f32 %v1391_v52, %v1371_v59  ;;  %v1396_v43 = vadd.f32 %v1392_v48, %v1372_v63  ;;  %v4088_v52 = vld [vmem:[#allocation11_spill] sm:$0xff] }
 0x1bb   :  { %v1405_v31 = vadd.f32 %v1401_v0, %v1377_v32  ;;  %v1406_v60 = vadd.f32 %v1402_v37, %v1378_v18  ;;  %v1407_v53 = vadd.f32 %v1403_v38, %v1379_v49  ;;  %v1408_v41 = vadd.f32 %v1404_v7, %v1380_v50  ;;  %v4087_v18 = vld [vmem:[#allocation8_spill] sm:$0xff]  ;;  %v4090_v49 = vld [vmem:[#allocation6_spill] sm:$0xff]  ;;  %v4091_v38 = vld [vmem:[#allocation7_spill] sm:$0xff] }
 0x1bc   :  { %v1417_v1 = vmul.f32 %v3332_v10, %v1416_v28  ;;  %v1418_v8 = vmul.f32 %v3337_v11, %v1416_v28  ;;  %v1419_v55 = vmul.f32 %v4084_v9, %v1416_v28  ;;  %v1420_v58 = vmul.f32 %v4085_v13, %v1416_v28  ;;  %v4089_v0 = vld [vmem:[#allocation20_spill] sm:$0xff] }
 0x1bd   :  { %v1429_v14 = vmul.f32 %v3332_v10, %v1428_v62  ;;  %v1430_v57 = vmul.f32 %v3337_v11, %v1428_v62  ;;  %v1431_v40 = vmul.f32 %v4084_v9, %v1428_v62  ;;  %v1432_v61 = vmul.f32 %v4085_v13, %v1428_v62 }
 0x1be   :  { %v1444_v46 = vrot.slane %v3543_v17, %v4086_v34  ;;  %v1456_v19 = vrot.slane %v3545_v39, %v4086_v34  ;;  %v1421_v5 = vadd.f32 %v1417_v1, %v1393_v23  ;;  %v1422_v12 = vadd.f32 %v1418_v8, %v1394_v2 }
 0x1bf   :  { %v1423_v44 = vadd.f32 %v1419_v55, %v1395_v24  ;;  %v1424_v59 = vadd.f32 %v1420_v58, %v1396_v43  ;;  %v1433_v63 = vadd.f32 %v1429_v14, %v1405_v31  ;;  %v1434_v28 = vadd.f32 %v1430_v57, %v1406_v60  ;;  %v4092_v55 = vld [vmem:[#allocation21_spill] sm:$0xff]  ;;  %v4093_v58 = vld [vmem:[#allocation22_spill] sm:$0xff] }
 0x1c0   :  { %v1435_v32 = vadd.f32 %v1431_v40, %v1407_v53  ;;  %v1436_v10 = vadd.f32 %v1432_v61, %v1408_v41  ;;  %v1445_v11 = vmul.f32 %v3358_v21, %v1444_v46  ;;  %v1472_v33 = vrot.slane %v3543_v17, %v4087_v18  ;;  %v4094_v57 = vld [vmem:[#allocation9_spill] sm:$0xff]  ;;  %v4095_v40 = vld [vmem:[#allocation10_spill] sm:$0xff] }
 0x1c1   :  { %v1484_v51 = vrot.slane %v3545_v39, %v4087_v18  ;;  %v1500_v48 = vrot.slane %v3543_v17, %v4088_v52  ;;  %v1446_v37 = vmul.f32 %v4089_v0, %v1444_v46  ;;  %v1447_v50 = vmul.f32 %v4090_v49, %v1444_v46 }
 0x1c2   :  { %v1448_v7 = vmul.f32 %v4091_v38, %v1444_v46  ;;  %v1457_v62 = vmul.f32 %v3358_v21, %v1456_v19  ;;  %v1449_v23 = vadd.f32 %v1445_v11, %v1421_v5  ;;  %v1458_v2 = vmul.f32 %v4089_v0, %v1456_v19  ;;  %v4096_v11 = vld [vmem:[#allocation23_spill] sm:$0xff] }
 0x1c3   :  { %v1459_v24 = vmul.f32 %v4090_v49, %v1456_v19  ;;  %v1460_v43 = vmul.f32 %v4091_v38, %v1456_v19  ;;  %v1450_v31 = vadd.f32 %v1446_v37, %v1422_v12  ;;  %v1451_v60 = vadd.f32 %v1447_v50, %v1423_v44  ;;  %v4098_v38 = vld [vmem:[#allocation24_spill] sm:$0xff] }
 0x1c4   :  { %v1452_v53 = vadd.f32 %v1448_v7, %v1424_v59  ;;  %v1461_v41 = vadd.f32 %v1457_v62, %v1433_v63  ;;  %v1462_v1 = vadd.f32 %v1458_v2, %v1434_v28  ;;  %v1473_v13 = vmul.f32 %v4092_v55, %v1472_v33  ;;  %v4099_v62 = vld [vmem:[#allocation13_spill] sm:$0xff]  ;;  %v4100_v2 = vld [vmem:[#allocation14_spill] sm:$0xff] }
 0x1c5   :  { %v1463_v8 = vadd.f32 %v1459_v24, %v1435_v32  ;;  %v1464_v9 = vadd.f32 %v1460_v43, %v1436_v10  ;;  %v1474_v14 = vmul.f32 %v4093_v58, %v1472_v33  ;;  %v1475_v21 = vmul.f32 %v4094_v57, %v1472_v33 }
 0x1c6   :  { %v1476_v61 = vmul.f32 %v4095_v40, %v1472_v33  ;;  %v1485_v46 = vmul.f32 %v4092_v55, %v1484_v51  ;;  %v1477_v5 = vadd.f32 %v1473_v13, %v1449_v23  ;;  %v1486_v19 = vmul.f32 %v4093_v58, %v1484_v51  ;;  %v4097_v33 = vld [vmem:[#allocation12_spill] sm:$0xff] }
 0x1c7   :  { %v1487_v12 = vmul.f32 %v4094_v57, %v1484_v51  ;;  %v1488_v44 = vmul.f32 %v4095_v40, %v1484_v51  ;;  %v1478_v59 = vadd.f32 %v1474_v14, %v1450_v31  ;;  %v1479_v63 = vadd.f32 %v1475_v21, %v1451_v60  ;;  %v4101_v60 = vld [vmem:[#allocation17_spill] sm:$0xff]  ;;  %v4102_v21 = vld [vmem:[#allocation15_spill] sm:$0xff] }
 0x1c8   :  { %v1480_v28 = vadd.f32 %v1476_v61, %v1452_v53  ;;  %v1489_v32 = vadd.f32 %v1485_v46, %v1461_v41  ;;  %v1490_v10 = vadd.f32 %v1486_v19, %v1462_v1  ;;  %v1501_v0 = vmul.f32 %v4096_v11, %v1500_v48  ;;  %v4103_v61 = vld [vmem:[#allocation16_spill] sm:$0xff] }
 0x1c9   :  { %v1512_v37 = vrot.slane %v3545_v39, %v4088_v52  ;;  %v1528_v49 = vrot.slane %v3543_v17, %v4097_v33  ;;  %v1491_v50 = vadd.f32 %v1487_v12, %v1463_v8  ;;  %v1502_v7 = vmul.f32 %v4098_v38, %v1500_v48 }
 0x1ca   :  { %v1503_v23 = vmul.f32 %v4099_v62, %v1500_v48  ;;  %v1504_v51 = vmul.f32 %v4100_v2, %v1500_v48  ;;  %v1492_v24 = vadd.f32 %v1488_v44, %v1464_v9  ;;  %v1505_v43 = vadd.f32 %v1501_v0, %v1477_v5 }
 0x1cb   :  { %v1540_v31 = vrot.slane %v3545_v39, %v4097_v33  ;;  %v1556_v53 = vrot.slane %v3543_v17, %v4101_v60  ;;  %v1506_v41 = vadd.f32 %v1502_v7, %v1478_v59  ;;  %v1513_v13 = vmul.f32 %v4096_v11, %v1512_v37 }
 0x1cc   :  { %v1507_v1 = vadd.f32 %v1503_v23, %v1479_v63  ;;  %v1508_v55 = vadd.f32 %v1504_v51, %v1480_v28  ;;  %v1514_v8 = vmul.f32 %v4098_v38, %v1512_v37  ;;  %v1515_v58 = vmul.f32 %v4099_v62, %v1512_v37  ;;  %v4104_v62 = vld [vmem:[#allocation28_spill] sm:$0xff]  ;;  %v4106_v23 = vld [vmem:[#allocation19_spill] sm:$0xff] }
 0x1cd   :  { %v1516_v14 = vmul.f32 %v4100_v2, %v1512_v37  ;;  %v1529_v48 = vmul.f32 %v3420_v35, %v1528_v49  ;;  %v1517_v9 = vadd.f32 %v1513_v13, %v1489_v32  ;;  %v1530_v57 = vmul.f32 %v3425_v6, %v1528_v49 }
 0x1ce   :  { %v1531_v40 = vmul.f32 %v4102_v21, %v1528_v49  ;;  %v1532_v46 = vmul.f32 %v4103_v61, %v1528_v49  ;;  %v1518_v5 = vadd.f32 %v1514_v8, %v1490_v10  ;;  %v1519_v19 = vadd.f32 %v1515_v58, %v1491_v50  ;;  %v4105_v10 = vld [vmem:[#allocation18_spill] sm:$0xff] }
 0x1cf   :  { %v1520_v12 = vadd.f32 %v1516_v14, %v1492_v24  ;;  %v1533_v44 = vadd.f32 %v1529_v48, %v1505_v43  ;;  %v1534_v59 = vadd.f32 %v1530_v57, %v1506_v41  ;;  %v1541_v11 = vmul.f32 %v3420_v35, %v1540_v31 }
 0x1d0   :  { %v1535_v63 = vadd.f32 %v1531_v40, %v1507_v1  ;;  %v1536_v28 = vadd.f32 %v1532_v46, %v1508_v55  ;;  %v1542_v0 = vmul.f32 %v3425_v6, %v1540_v31  ;;  %v1543_v37 = vmul.f32 %v4102_v21, %v1540_v31 }
 0x1d1   :  { %v1544_v32 = vmul.f32 %v4103_v61, %v1540_v31  ;;  %v1557_v38 = vmul.f32 %v3446_v54, %v1556_v53  ;;  %v1545_v7 = vadd.f32 %v1541_v11, %v1517_v9  ;;  %v1558_v49 = vmul.f32 %v4104_v62, %v1556_v53 }
 0x1d2   :  { %v1559_v50 = vmul.f32 %v4105_v10, %v1556_v53  ;;  %v1560_v2 = vmul.f32 %v4106_v23, %v1556_v53  ;;  %v1546_v51 = vadd.f32 %v1542_v0, %v1518_v5  ;;  %v1547_v24 = vadd.f32 %v1543_v37, %v1519_v19 }
 0x1d3   :  { %v1548_v43 = vadd.f32 %v1544_v32, %v1520_v12  ;;  %v1568_v35 = vrot.slane %v3545_v39, %v4101_v60  ;;  %v1561_v6 = vadd.f32 %v1557_v38, %v1533_v44  ;;  %v1562_v41 = vadd.f32 %v1558_v49, %v1534_v59 }
 0x1d4   :  { %v1563_v1 = vadd.f32 %v1559_v50, %v1535_v63  ;;  %v1564_v55 = vadd.f32 %v1560_v2, %v1536_v28 }
 0x1d5   :  { %v1569_v31 = vmul.f32 %v3446_v54, %v1568_v35  ;;  %v1570_v13 = vmul.f32 %v4104_v62, %v1568_v35  ;;  %v1571_v8 = vmul.f32 %v4105_v10, %v1568_v35  ;;  %v1572_v58 = vmul.f32 %v4106_v23, %v1568_v35 }
 0x1d7   :  { %v1573_v14 = vadd.f32 %v1569_v31, %v1545_v7  ;;  %v1574_v53 = vadd.f32 %v1570_v13, %v1546_v51  ;;  %v1575_v48 = vadd.f32 %v1571_v8, %v1547_v24  ;;  %v1576_v9 = vadd.f32 %v1572_v58, %v1548_v43 }
 0x1d9   :  { %v1577_v57 = vsub.f32 %v1561_v6, %v1574_v53  ;;  %v1578_v21 = vadd.f32 %v1573_v14, %v1562_v41  ;;  %v1579_v40 = vsub.f32 %v1563_v1, %v1576_v9  ;;  %v1580_v61 = vadd.f32 %v1575_v48, %v1564_v55 }
 0x1db   :  { %v1581_v46 = vmul.f32 %v1577_v57, %v3543_v17  ;;  %v1582_v5 = vmul.f32 %v1578_v21, %v3545_v39  ;;  %v1591_v54 = vmul.f32 %v1579_v40, %v3543_v17  ;;  %v1592_v19 = vmul.f32 %v1580_v61, %v3545_v39 }
 0x1dc   :  { %v1601_v12 = vmul.f32 %v1578_v21, %v3543_v17  ;;  %v1602_v44 = vmul.f32 %v1577_v57, %v3545_v39  ;;  %v1605_v59 = vmul.f32 %v1580_v61, %v3543_v17  ;;  %v1606_v63 = vmul.f32 %v1579_v40, %v3545_v39  ;;  %v4107_v57 = vld [vmem:[#allocation25_spill] sm:$0xff] }
 0x1dd   :  { %v1583_v28 = vadd.f32 %v1582_v5, %v1581_v46  ;;  %v1593_v11 = vadd.f32 %v1592_v19, %v1591_v54  ;;  %v4108_v5 = vld [vmem:[#allocation26_spill] sm:$0xff] }
 0x1de   :  { %v1603_v0 = vsub.f32 %v1601_v12, %v1602_v44  ;;  %v1607_v37 = vsub.f32 %v1605_v59, %v1606_v63  ;;  %v4109_v63 = vld [vmem:[#allocation27_spill] sm:$0xff] }
 0x1df   :  { %v1584_v32 = vsel %vm616_vm3, %v1583_v28, 0.0  ;;  %v1594_v38 = vsel %vm616_vm3, %v1593_v11, 0.0 }
 0x1e0   :  { %v1585_v7 = vrot.slane %v1584_v32, 4  ;;  %v1595_v62 = vrot.slane %v1594_v38, 4  ;;  %v1604_v35 = vmul.f32 2.0, %v1603_v0  ;;  %v1608_v6 = vmul.f32 2.0, %v1607_v37 }
 0x1e2   :  { %v1586_v49 = vadd.f32 %v1585_v7, %v1584_v32  ;;  %v1596_v10 = vadd.f32 %v1595_v62, %v1594_v38 }
 0x1e4   :  { %v1587_v50 = vrot.slane %v1586_v49, 2  ;;  %v1597_v23 = vrot.slane %v1596_v10, 2 }
 0x1e6   :  { %v1588_v2 = vadd.f32 %v1587_v50, %v1586_v49  ;;  %v1598_v51 = vadd.f32 %v1597_v23, %v1596_v10 }
 0x1e8   :  { %v1589_v24 = vrot.slane %v1588_v2, 1  ;;  %v1599_v17 = vrot.slane %v1598_v51, 1 }
 0x1ea   :  { %v1590_v43 = vadd.f32 %v1589_v24, %v1588_v2  ;;  %v1600_v39 = vadd.f32 %v1599_v17, %v1598_v51 }
 0x1ec   :  { %2829 = vrcp.f32 %v1600_v39  ;;  %v1613_v41 = vmul.f32 %v1604_v35, %v1600_v39  ;;  %v1614_v1 = vmul.f32 %v1608_v6, %v1590_v43 }
 0x1ee   :  { %v1615_v55 = vsub.f32 %v1613_v41, %v1614_v1 }
 0x1f9   :  { %v2830_v31 = vpop.eup %2829 }
 0x1fa   :  { %v1610_v13 = vmul.f32 %v2830_v31, %v1600_v39 }
 0x1fc   :  { %v1611_v8 = vsub.f32 2.0, %v1610_v13 }
 0x1fe   :  { %v1612_v58 = vmul.f32 %v2830_v31, %v1611_v8  ;;  %v1830_v8 = vld [vmem:[%s3981_s4] sm:$0xff] }
 0x1ff   :  { %2774 = vmatprep.mubr.msk.f32.mxu0 %vm381_vm1, %v1830_v8 }
 0x200   :  { %v1616_v14 = vmul.f32 %v1612_v58, %v1612_v58  ;;  %v1935_v58 = vld [vmem:[%s3984_s5] sm:$0xff] }
 0x201   :  { %2782 = vmatprep.mubr.msk.f32.mxu1 %vm381_vm1, %v1935_v58 }
 0x202   :  { %v1617_v53 = vmul.f32 %v1616_v14, %v1615_v55 }
 0x275   :  { %v2760_v48 = vpop.f32.mrf.mxu0  ;;  %v2768_v9 = vpop.f32.mrf.mxu1 }
 0x276   :  { %v1225_v21 = vadd.f32 %v2760_v48, %v4107_v57 }
 0x277   :  { %v1205_v40 = vpop.f32.mrf.mxu0  ;;  %v1310_v61 = vpop.f32.mrf.mxu1 }
 0x278   :  { %v1330_v46 = vadd.f32 %v2768_v9, %v1225_v21  ;;  %v1224_v54 = vadd.f32 %v1205_v40, %v4108_v5 }
 0x279   :  { %v2763_v19 = vpop.f32.mrf.mxu0  ;;  %v2771_v12 = vpop.f32.mrf.mxu1 }
 0x27a   :  { %v1334_v44 = vmax.f32 %v1330_v46, 0.0  ;;  %v1329_v59 = vadd.f32 %v1310_v61, %v1224_v54  ;;  %v1227_v28 = vadd.f32 %v2763_v19, %v4109_v63 }
 0x27b   :  { %v1215_v11 = vpop.f32.mrf.mxu0  ;;  %v1320_v38 = vpop.f32.mrf.mxu1 }
 0x27c   :  { %v1333_v0 = vmax.f32 %v1329_v59, 0.0  ;;  %v1332_v37 = vadd.f32 %v2771_v12, %v1227_v28  ;;  %v1226_v32 = vadd.f32 %v1215_v11, %v3453_v30  ;;  %v1338_v7 = vmul.f32 %v1334_v44, %v3468_v56 }
 0x27e   :  { %v1337_v62 = vmul.f32 %v1333_v0, %v3463_v22  ;;  %v1336_v49 = vmax.f32 %v1332_v37, 0.0  ;;  %v1331_v10 = vadd.f32 %v1320_v38, %v1226_v32  ;;  %v1342_v2 = vsel %vm616_vm3, %v1338_v7, 0.0 }
 0x280   :  { %v1341_v50 = vsel %vm616_vm3, %v1337_v62, 0.0  ;;  %v1335_v23 = vmax.f32 %v1331_v10, 0.0  ;;  %v1340_v51 = vmul.f32 %v1336_v49, %v3476_v27 }
 0x281   :  { %v1343_v17 = vadd.f32 %v1342_v2, %v1341_v50 }
 0x282   :  { %v1339_v24 = vmul.f32 %v1335_v23, %v3474_v29  ;;  %v1346_v35 = vsel %vm616_vm3, %v1340_v51, 0.0 }
 0x284   :  { %v1344_v43 = vsel %vm616_vm3, %v1339_v24, 0.0 }
 0x285   :  { %v1345_v39 = vadd.f32 %v1344_v43, %v1343_v17 }
 0x287   :  { %v1347_v6 = vadd.f32 %v1346_v35, %v1345_v39 }
 0x289   :  { %v1348_v41 = vrot.slane %v1347_v6, 4 }
 0x28b   :  { %v1349_v1 = vadd.f32 %v1348_v41, %v1347_v6 }
 0x28d   :  { %v1350_v55 = vrot.slane %v1349_v1, 2 }
 0x28f   :  { %v1351_v31 = vadd.f32 %v1350_v55, %v1349_v1 }
 0x291   :  { %v1352_v13 = vrot.slane %v1351_v31, 1 }
 0x293   :  { %v1353_v14 = vadd.f32 %v1352_v13, %v1351_v31 }
 0x295   :  { %v1354_v48 = vadd.f32 %v1353_v14, %v3487_v42 }
 0x297   :  { %v2612_v9 = vmul.f32 -1.442695, %v1354_v48 }
 0x299   :  { %2831 = vpow2.f32 %v2612_v9 }
 0x2a6   :  { %v2832_v21 = vpop.eup %2831 }
 0x2a7   :  { %v1358_v40 = vadd.f32 1.0, %v2832_v21 }
 0x2a9   :  { %2833 = vrcp.f32 %v1358_v40 }
 0x2b6   :  { %v2834_v61 = vpop.eup %2833 }
 0x2b7   :  { %1620 = vst.msk [vmem:[%s3987_s10 + $0x1] sm:$0x1] %vm912_vm4, %v2834_v61  ;;  %v1621_v46 = vmul.f32 %v2834_v61, %v1617_v53 }
 0x2b9   :  { %v3707_v54 = vsub.f32 %v3511_v36, %v1621_v46 }
 0x2bb   :  { %v1626_v19 = vand.u32 2139095040, %v3707_v54  ;;  %v1623_v28 = vand.u32 2147483647, %v3707_v54  ;;  %vm1625_vm15 = vcmp.lt.s32.totalorder %v3707_v54, 0 }
 0x2bd   :  { %v1627_v12 = vshrl.u32 %v1626_v19, 23  ;;  %v1630_v37 = vand.u32 8388607, %v1623_v28  ;;  %vm1624_vm0 = vcmp.le.f32.partialorder %v1623_v28, 0.7853982 }
 0x2bf   :  { %v2641_v44 = vadd.s32 4294967169, %v1627_v12  ;;  %v1631_v24 = vor.u32 8388608, %v1630_v37 }
 0x2c1   :  { %v1633_v59 = vadd.s32 1, %v2641_v44  ;;  %v1671_v48 = vshll.u32 %v1631_v24, 8 }
 0x2c3   :  { %vm1634_vm8 = vcmp.gt.s32.totalorder %v1633_v59, 0 }
 0x2c4   :  { %v1635_v11 = vsel %vm1634_vm8, %v1633_v59, 0 }
 0x2c5   :  { %v1637_v0 = vand.u32 31, %v1635_v11  ;;  %v1636_v38 = vshrl.u32 %v1635_v11, 5 }
 0x2c7   :  { %v1638_v32 = vsub.s32 32, %v1637_v0  ;;  %v1640_v53 = vshll.u32 %v4078_v3, %v1637_v0  ;;  %v1643_v36 = vshll.u32 %v4079_v26, %v1637_v0  ;;  %v1646_v49 = vshll.u32 %v4080_v47, %v1637_v0 }
 0x2c8   :  { %v1649_v50 = vshll.u32 %v4081_v20, %v1637_v0  ;;  %v1652_v2 = vshll.u32 %v4082_v25, %v1637_v0  ;;  %vm1655_vm9 = vcmp.lt.s32.totalorder %v1636_v38, 1  ;;  %vm1658_vm10 = vcmp.lt.s32.totalorder %v1636_v38, 4 }
 0x2c9   :  { %v1641_v7 = vshrl.u32 %v4079_v26, %v1638_v32  ;;  %v1644_v62 = vshrl.u32 %v4080_v47, %v1638_v32  ;;  %v1647_v10 = vshrl.u32 %v4081_v20, %v1638_v32  ;;  %v1650_v23 = vshrl.u32 %v4082_v25, %v1638_v32 }
 0x2ca   :  { %v1653_v51 = vshrl.u32 %v4083_v45, %v1638_v32  ;;  %v1639_v31 = vshrl.u32 %v4078_v3, %v1638_v32  ;;  %vm1657_vm11 = vcmp.lt.s32.totalorder %v1636_v38, 3  ;;  %vm1656_vm12 = vcmp.lt.s32.totalorder %v1636_v38, 2 }
 0x2cb   :  { %v1642_v17 = vor.u32 %v1641_v7, %v1640_v53  ;;  %v1645_v43 = vor.u32 %v1644_v62, %v1643_v36  ;;  %v1648_v39 = vor.u32 %v1647_v10, %v1646_v49  ;;  %v1651_v35 = vor.u32 %v1650_v23, %v1649_v50 }
 0x2cc   :  { %v1654_v6 = vor.u32 %v1653_v51, %v1652_v2 }
 0x2cd   :  { %v1660_v41 = vsel %vm1658_vm10, %v1648_v39, 2102212464  ;;  %v1663_v1 = vsel %vm1655_vm9, %v1642_v17, %v1645_v43  ;;  %v1667_v55 = vsel %vm1655_vm9, %v1645_v43, %v1648_v39  ;;  %v1664_v13 = vsel %vm1658_vm10, %v1651_v35, 920167782 }
 0x2ce   :  { %v1668_v8 = vsel %vm1658_vm10, %v1654_v6, 1326507024  ;;  %v1665_v58 = vsel %vm1657_vm11, %v1648_v39, %v1664_v13  ;;  %v1659_v9 = vsel %vm1655_vm9, %v1639_v31, %v1642_v17  ;;  %v1661_v21 = vsel %vm1657_vm11, %v1645_v43, %v1660_v41 }
 0x2cf   :  { %v1669_v14 = vsel %vm1657_vm11, %v1651_v35, %v1668_v8  ;;  %v1666_v40 = vsel %vm1656_vm12, %v1663_v1, %v1665_v58  ;;  %v1662_v59 = vsel %vm1656_vm12, %v1659_v9, %v1661_v21  ;;  %vm1715_vm10 = vweird.f32 %v3707_v54 }
 0x2d0   :  { %v1670_v61 = vsel %vm1656_vm12, %v1667_v55, %v1669_v14  ;;  %v3727_v12 = vmul.u32.u64.low %v1671_v48, %v1666_v40  ;;  %v3728_v44 = vmul.u32.u64.high %v1671_v48, %v1666_v40, %v3727_v12  ;;  %v1678_v0 = vmul.u32 %v1671_v48, %v1662_v59 }
 0x2d1   :  { %v3724_v46 = vmul.u32.u64.low %v1671_v48, %v1670_v61  ;;  %v3725_v19 = vmul.u32.u64.high %v1671_v48, %v1670_v61, %v3724_v46 }
 0x2d2   :  { %v1681_v11 = vadd.s32 1, %v3728_v44 }
 0x2d3   :  { %vm1680_vm13 = vc.u32 %v3725_v19, %v3727_v12  ;;  %v1679_v2 = vadd.s32 %v3727_v12, %v3725_v19 }
 0x2d4   :  { %v1682_v37 = vsel %vm1680_vm13, %v1681_v11, %v3728_v44 }
 0x2d5   :  { %v1683_v32 = vadd.s32 %v1682_v37, %v1678_v0 }
 0x2d7   :  { %v1684_v38 = vadd.s32 536870912, %v1683_v32 }
 0x2d9   :  { %v1685_v53 = vshrl.u32 %v1684_v38, 30  ;;  %v1831_v38 = vld [vmem:[%s3981_s4 + $0x8] sm:$0xff] }
 0x2db   :  { %v1686_v36 = vshll.u32 %v1685_v53, 30  ;;  %v1709_v8 = vsub.s32 4, %v1685_v53 }
 0x2dd   :  { %v1687_v7 = vsub.s32 %v1683_v32, %v1686_v36  ;;  %v1710_v48 = vsel %vm1625_vm15, %v1709_v8, %v1685_v53  ;;  %v1936_v53 = vld [vmem:[%s3984_s5 + $0x8] sm:$0xff] }
 0x2de   :  { %v1712_v9 = vsel %vm1624_vm0, 0, %v1710_v48 }
 0x2df   :  { %v1689_v62 = vsub.s32 0, %v1687_v7  ;;  %v1819_v21 = vadd.s32 3, %v1712_v9  ;;  %v1716_v40 = vand.u32 3, %v1712_v9 }
 0x2e1   :  { %v2642_v49 = vmin.u32 %v1689_v62, %v1687_v7  ;;  %v1820_v61 = vand.u32 3, %v1819_v21  ;;  %vm1721_vm2 = vcmp.eq.s32.totalorder %v1716_v40, 2  ;;  %vm1718_vm6 = vcmp.eq.s32.totalorder %v1716_v40, 0  ;;  %v1832_v62 = vld [vmem:[%s3981_s4 + $0x10] sm:$0xff] }
 0x2e2   :  { %vm1717_vm8 = vcmp.lt.s32.totalorder %v1716_v40, 2 }
 0x2e3   :  { %v1691_v10 = vclz %v2642_v49  ;;  %vm1825_vm5 = vcmp.eq.s32.totalorder %v1820_v61, 2  ;;  %vm1822_vm7 = vcmp.eq.s32.totalorder %v1820_v61, 0  ;;  %vm1821_vm9 = vcmp.lt.s32.totalorder %v1820_v61, 2  ;;  %v1937_v49 = vld [vmem:[%s3984_s5 + $0x10] sm:$0xff] }
 0x2e5   :  { %v2643_v50 = vadd.s32 4294967294, %v1691_v10  ;;  %v2068_v10 = vld [vmem:[%s3985_s2] sm:$0xff] }
 0x2e7   :  { %vm2644_vm14 = vcmp.lt.s32.totalorder %v2643_v50, 0 }
 0x2e8   :  { %v1694_v23 = vsel %vm2644_vm14, 0, %v2643_v50  ;;  %v2069_v50 = vld [vmem:[%s3985_s2 + $0x8] sm:$0xff] }
 0x2e9   :  { %v1695_v51 = vsub.s32 32, %v1694_v23  ;;  %v1699_v24 = vsub.s32 4294967266, %v1694_v23  ;;  %v1696_v17 = vshll.u32 %v1687_v7, %v1694_v23  ;;  %v2070_v23 = vld [vmem:[%s3985_s2 + $0x10] sm:$0xff] }
 0x2eb   :  { %v1697_v43 = vshrl.u32 %v1679_v2, %v1695_v51  ;;  %v1700_v39 = vadd.s32 127, %v1699_v24  ;;  %v2071_v2 = vld [vmem:[%s3985_s2 + $0x18] sm:$0xff] }
 0x2ed   :  { %v1698_v35 = vor.u32 %v1697_v43, %v1696_v17  ;;  %v1701_v6 = vshll.u32 %v1700_v39, 23  ;;  %v2659_v43 = vld [vmem:[%s3985_s2 + $0x28] sm:$0xff] }
 0x2ef   :  { %v1702_v41 = vor.u32 4788187, %v1701_v6  ;;  %v1705_v55 = vcvt.s32.f32 %v1698_v35  ;;  %v2660_v6 = vld [vmem:[%s3985_s2 + $0x30] sm:$0xff] }
 0x2f1   :  { %v1703_v1 = vand.u32 2147483647, %v1702_v41  ;;  %v2661_v41 = vld [vmem:[%s3985_s2 + $0x38] sm:$0xff] }
 0x2f3   :  { %v1706_v31 = vmul.f32 %v1705_v55, %v1703_v1  ;;  %v1938_v55 = vld [vmem:[%s3984_s5 + $0x18] sm:$0xff] }
 0x2f5   :  { %v1707_v13 = vxor.u32 2147483648, %v1706_v31 }
 0x2f7   :  { %v1708_v58 = vsel %vm1625_vm15, %v1707_v13, %v1706_v31 }
 0x2f8   :  { %v1711_v14 = vsel %vm1624_vm0, %v3707_v54, %v1708_v58 }
 0x2f9   :  { %2835 = vcosq.f32 %v1711_v14 }
 0x2fa   :  { %2837 = vsinq.f32 %v1711_v14 }
 0x306   :  { %v2836_v46 = vpop.eup %2835 }
 0x307   :  { %v2838_v19 = vpop.eup %2837  ;;  %v1722_v12 = vxor.u32 2147483648, %v2836_v46 }
 0x308   :  { %v1719_v44 = vxor.u32 2147483648, %v2838_v19 }
 0x309   :  { %v1723_v59 = vsel %vm1721_vm2, %v1722_v12, %v2838_v19  ;;  %v1827_v28 = vsel %vm1825_vm5, %v1722_v12, %v2838_v19 }
 0x30a   :  { %v1720_v11 = vsel %vm1718_vm6, %v2836_v46, %v1719_v44  ;;  %v1824_v0 = vsel %vm1822_vm7, %v2836_v46, %v1719_v44 }
 0x30b   :  { %v1724_v37 = vsel %vm1717_vm8, %v1720_v11, %v1723_v59  ;;  %v1828_v32 = vsel %vm1821_vm9, %v1824_v0, %v1827_v28  ;;  %v2662_v28 = vld [vmem:[%s3985_s2 + $0x40] sm:$0xff]  ;;  %v2663_v11 = vld [vmem:[%s3985_s2 + $0x48] sm:$0xff] }
 0x30c   :  { %v3745_v36 = vsel %vm1715_vm10, nan, %v1724_v37  ;;  %v3747_v7 = vsel %vm1715_vm10, nan, %v1828_v32 }
 0x30d   :  { %2772 = vmatprep.subr.mxu0 %v3745_v36  ;;  %2780 = vmatprep.subr.mxu1 %v3747_v7  ;;  %v2075_v51 = vrot.slane %v3745_v36, %v3071_v4  ;;  %v2083_v24 = vrot.slane %v3747_v7, %v3071_v4  ;;  %v2095_v17 = vrot.slane %v3745_v36, %v3068_v15  ;;  %v2658_v4 = vld [vmem:[%s3985_s2 + $0x20] sm:$0xff] }
 0x30e   :  { %2325 = vst.msk [vmem:[%s3986_s9 + $0x20] sm:$0xff] %vm616_vm3, %v3745_v36  ;;  %2326 = vst.msk [vmem:[%s3986_s9 + $0x28] sm:$0xff] %vm616_vm3, %v3747_v7  ;;  %2773 = vmatpush3.msra.mxu0 %v3745_v36  ;;  %2781 = vmatpush3.msra.mxu1 %v3747_v7  ;;  %v2107_v39 = vrot.slane %v3747_v7, %v3068_v15  ;;  %v2123_v1 = vrot.slane %v3745_v36, %v3110_v16  ;;  %v1833_v15 = vld [vmem:[%s3981_s4 + $0x18] sm:$0xff] }
 0x30f   :  { %2775 = vmatmul.mubr.msk.f32.vlgmr.msra.gmra.mxu0 %vm381_vm1, %v1831_v38  ;;  %2783 = vmatmul.mubr.msk.f32.vlgmr.msra.gmra.mxu1 %vm381_vm1, %v1936_v53  ;;  %v2076_v35 = vmul.f32 %v2075_v51, %v2068_v10  ;;  %v2077_v31 = vmul.f32 %v2075_v51, %v2069_v50  ;;  %v2078_v13 = vmul.f32 %v2075_v51, %v2070_v23  ;;  %v2664_v38 = vld [vmem:[%s3985_s2 + $0x50] sm:$0xff]  ;;  %v2665_v53 = vld [vmem:[%s3985_s2 + $0x58] sm:$0xff] }
 0x310   :  { %2777 = vmatprep.mubr.msk.f32.mxu0 %vm381_vm1, %v1832_v62  ;;  %2785 = vmatprep.mubr.msk.f32.mxu1 %vm381_vm1, %v1937_v49  ;;  %v2079_v8 = vmul.f32 %v2075_v51, %v2071_v2  ;;  %v2084_v58 = vmul.f32 %v2083_v24, %v2068_v10  ;;  %v2085_v14 = vmul.f32 %v2083_v24, %v2069_v50 }
 0x311   :  { %v2096_v48 = vmul.f32 %v2658_v4, %v2095_v17  ;;  %v2097_v9 = vmul.f32 %v2659_v43, %v2095_v17  ;;  %v2098_v21 = vmul.f32 %v2660_v6, %v2095_v17  ;;  %v2099_v40 = vmul.f32 %v2661_v41, %v2095_v17 }
 0x312   :  { %v2108_v61 = vmul.f32 %v2658_v4, %v2107_v39  ;;  %v2109_v46 = vmul.f32 %v2659_v43, %v2107_v39  ;;  %v2086_v19 = vmul.f32 %v2083_v24, %v2070_v23  ;;  %v2087_v12 = vmul.f32 %v2083_v24, %v2071_v2 }
 0x313   :  { %2778 = vmatmul.mubr.msk.f32.gmra.mxu0 %vm381_vm1, %v1833_v15  ;;  %2786 = vmatmul.mubr.msk.f32.gmra.mxu1 %vm381_vm1, %v1938_v55  ;;  %v2110_v44 = vmul.f32 %v2660_v6, %v2107_v39  ;;  %v2111_v59 = vmul.f32 %v2661_v41, %v2107_v39  ;;  %v2135_v0 = vrot.slane %v3747_v7, %v3110_v16  ;;  %v2666_v6 = vld [vmem:[%s3985_s2 + $0x60] sm:$0xff] }
 0x314   :  { %v2100_v37 = vadd.f32 %v2096_v48, %v2076_v35  ;;  %v2101_v32 = vadd.f32 %v2097_v9, %v2077_v31  ;;  %v2102_v62 = vadd.f32 %v2098_v21, %v2078_v13  ;;  %v2103_v49 = vadd.f32 %v2099_v40, %v2079_v8 }
 0x315   :  { %v2112_v10 = vadd.f32 %v2108_v61, %v2084_v58  ;;  %v2113_v50 = vadd.f32 %v2109_v46, %v2085_v14  ;;  %v2114_v23 = vadd.f32 %v2110_v44, %v2086_v19  ;;  %v2115_v2 = vadd.f32 %v2111_v59, %v2087_v12  ;;  %v2668_v58 = vld [vmem:[%s3985_s2 + $0x70] sm:$0xff]  ;;  %v2669_v14 = vld [vmem:[%s3985_s2 + $0x78] sm:$0xff] }
 0x316   :  { %v2124_v51 = vmul.f32 %v2662_v28, %v2123_v1  ;;  %v2125_v24 = vmul.f32 %v2663_v11, %v2123_v1  ;;  %v2126_v17 = vmul.f32 %v2664_v38, %v2123_v1  ;;  %v2127_v16 = vmul.f32 %v2665_v53, %v2123_v1  ;;  %v2667_v1 = vld [vmem:[%s3985_s2 + $0x68] sm:$0xff] }
 0x317   :  { %v2136_v4 = vmul.f32 %v2662_v28, %v2135_v0  ;;  %v2137_v43 = vmul.f32 %v2663_v11, %v2135_v0  ;;  %v2138_v39 = vmul.f32 %v2664_v38, %v2135_v0  ;;  %v2139_v35 = vmul.f32 %v2665_v53, %v2135_v0  ;;  %v2670_v11 = vld [vmem:[%s3985_s2 + $0x80] sm:$0xff]  ;;  %v2671_v53 = vld [vmem:[%s3985_s2 + $0x88] sm:$0xff] }
 0x318   :  { %v2151_v41 = vrot.slane %v3745_v36, %v4086_v34  ;;  %v2163_v15 = vrot.slane %v3747_v7, %v4086_v34  ;;  %v2128_v55 = vadd.f32 %v2124_v51, %v2100_v37  ;;  %v2129_v31 = vadd.f32 %v2125_v24, %v2101_v32 }
 0x319   :  { %v2130_v13 = vadd.f32 %v2126_v17, %v2102_v62  ;;  %v2131_v8 = vadd.f32 %v2127_v16, %v2103_v49  ;;  %v2140_v48 = vadd.f32 %v2136_v4, %v2112_v10  ;;  %v2141_v9 = vadd.f32 %v2137_v43, %v2113_v50  ;;  %v2673_v62 = vld [vmem:[%s3985_s2 + $0x98] sm:$0xff] }
 0x31a   :  { %v2142_v21 = vadd.f32 %v2138_v39, %v2114_v23  ;;  %v2143_v34 = vadd.f32 %v2139_v35, %v2115_v2  ;;  %v2152_v40 = vmul.f32 %v2666_v6, %v2151_v41  ;;  %v2179_v61 = vrot.slane %v3745_v36, %v4087_v18  ;;  %v2674_v35 = vld [vmem:[%s3985_s2 + $0xa0] sm:$0xff] }
 0x31b   :  { %v2191_v46 = vrot.slane %v3747_v7, %v4087_v18  ;;  %v2207_v19 = vrot.slane %v3745_v36, %v4088_v52  ;;  %v2153_v12 = vmul.f32 %v2667_v1, %v2151_v41  ;;  %v2154_v44 = vmul.f32 %v2668_v58, %v2151_v41  ;;  %v2672_v18 = vld [vmem:[%s3985_s2 + $0x90] sm:$0xff] }
 0x31c   :  { %v2155_v59 = vmul.f32 %v2669_v14, %v2151_v41  ;;  %v2164_v28 = vmul.f32 %v2666_v6, %v2163_v15  ;;  %v2156_v0 = vadd.f32 %v2152_v40, %v2128_v55  ;;  %v2165_v37 = vmul.f32 %v2667_v1, %v2163_v15 }
 0x31d   :  { %v2166_v32 = vmul.f32 %v2668_v58, %v2163_v15  ;;  %v2167_v38 = vmul.f32 %v2669_v14, %v2163_v15  ;;  %v2157_v49 = vadd.f32 %v2153_v12, %v2129_v31  ;;  %v2158_v10 = vadd.f32 %v2154_v44, %v2130_v13  ;;  %v2675_v31 = vld [vmem:[%s3985_s2 + $0xa8] sm:$0xff]  ;;  %v2676_v13 = vld [vmem:[%s3985_s2 + $0xb0] sm:$0xff] }
 0x31e   :  { %v2159_v50 = vadd.f32 %v2155_v59, %v2131_v8  ;;  %v2168_v23 = vadd.f32 %v2164_v28, %v2140_v48  ;;  %v2169_v2 = vadd.f32 %v2165_v37, %v2141_v9  ;;  %v2180_v17 = vmul.f32 %v2670_v11, %v2179_v61  ;;  %v2677_v8 = vld [vmem:[%s3985_s2 + $0xb8] sm:$0xff]  ;;  %v2678_v59 = vld [vmem:[%s3985_s2 + $0xc0] sm:$0xff] }
 0x31f   :  { %v2170_v51 = vadd.f32 %v2166_v32, %v2142_v21  ;;  %v2171_v24 = vadd.f32 %v2167_v38, %v2143_v34  ;;  %v2181_v16 = vmul.f32 %v2671_v53, %v2179_v61  ;;  %v2182_v4 = vmul.f32 %v2672_v18, %v2179_v61  ;;  %v2681_v37 = vld [vmem:[%s3985_s2 + $0xd8] sm:$0xff] }
 0x320   :  { %v2183_v43 = vmul.f32 %v2673_v62, %v2179_v61  ;;  %v2192_v39 = vmul.f32 %v2670_v11, %v2191_v46  ;;  %v2184_v6 = vadd.f32 %v2180_v17, %v2156_v0  ;;  %v2193_v41 = vmul.f32 %v2671_v53, %v2191_v46  ;;  %v2679_v0 = vld [vmem:[%s3985_s2 + $0xc8] sm:$0xff] }
 0x321   :  { %v2194_v15 = vmul.f32 %v2672_v18, %v2191_v46  ;;  %v2195_v55 = vmul.f32 %v2673_v62, %v2191_v46  ;;  %v2185_v1 = vadd.f32 %v2181_v16, %v2157_v49  ;;  %v2186_v58 = vadd.f32 %v2182_v4, %v2158_v10  ;;  %v2682_v16 = vld [vmem:[%s3985_s2 + $0xe0] sm:$0xff] }
 0x322   :  { %v2187_v14 = vadd.f32 %v2183_v43, %v2159_v50  ;;  %v2196_v48 = vadd.f32 %v2192_v39, %v2168_v23  ;;  %v2197_v9 = vadd.f32 %v2193_v41, %v2169_v2  ;;  %v2208_v21 = vmul.f32 %v2674_v35, %v2207_v19  ;;  %v2685_v41 = vld [vmem:[%s3985_s2 + $0xf8] sm:$0xff] }
 0x323   :  { %v2219_v34 = vrot.slane %v3747_v7, %v4088_v52  ;;  %v2235_v40 = vrot.slane %v3745_v36, %v4097_v33  ;;  %v2198_v61 = vadd.f32 %v2194_v15, %v2170_v51  ;;  %v2209_v46 = vmul.f32 %v2675_v31, %v2207_v19  ;;  %v2680_v52 = vld [vmem:[%s3985_s2 + $0xd0] sm:$0xff] }
 0x324   :  { %v2210_v12 = vmul.f32 %v2676_v13, %v2207_v19  ;;  %v2211_v44 = vmul.f32 %v2677_v8, %v2207_v19  ;;  %v2199_v28 = vadd.f32 %v2195_v55, %v2171_v24  ;;  %v2212_v11 = vadd.f32 %v2208_v21, %v2184_v6  ;;  %v2684_v6 = vld [vmem:[%s3985_s2 + $0xf0] sm:$0xff] }
 0x325   :  { %v2247_v19 = vrot.slane %v3747_v7, %v4097_v33  ;;  %v2263_v32 = vrot.slane %v3745_v36, %v4101_v60  ;;  %v2213_v38 = vadd.f32 %v2209_v46, %v2185_v1  ;;  %v2220_v62 = vmul.f32 %v2674_v35, %v2219_v34  ;;  %v2683_v35 = vld [vmem:[%s3985_s2 + $0xe8] sm:$0xff] }
 0x326   :  { %v2214_v53 = vadd.f32 %v2210_v12, %v2186_v58  ;;  %v2215_v18 = vadd.f32 %v2211_v44, %v2187_v14  ;;  %v2221_v49 = vmul.f32 %v2675_v31, %v2219_v34  ;;  %v2222_v10 = vmul.f32 %v2676_v13, %v2219_v34 }
 0x327   :  { %v2223_v50 = vmul.f32 %v2677_v8, %v2219_v34  ;;  %v2236_v23 = vmul.f32 %v2678_v59, %v2235_v40  ;;  %v2224_v2 = vadd.f32 %v2220_v62, %v2196_v48  ;;  %v2237_v51 = vmul.f32 %v2679_v0, %v2235_v40 }
 0x328   :  { %v2238_v24 = vmul.f32 %v2680_v52, %v2235_v40  ;;  %v2239_v17 = vmul.f32 %v2681_v37, %v2235_v40  ;;  %v2225_v33 = vadd.f32 %v2221_v49, %v2197_v9  ;;  %v2226_v4 = vadd.f32 %v2222_v10, %v2198_v61 }
 0x329   :  { %v2227_v43 = vadd.f32 %v2223_v50, %v2199_v28  ;;  %v2240_v39 = vadd.f32 %v2236_v23, %v2212_v11  ;;  %v2241_v15 = vadd.f32 %v2237_v51, %v2213_v38  ;;  %v2248_v13 = vmul.f32 %v2678_v59, %v2247_v19 }
 0x32a   :  { %v2242_v55 = vadd.f32 %v2238_v24, %v2214_v53  ;;  %v2243_v31 = vadd.f32 %v2239_v17, %v2215_v18  ;;  %v2249_v8 = vmul.f32 %v2679_v0, %v2247_v19  ;;  %v2250_v1 = vmul.f32 %v2680_v52, %v2247_v19 }
 0x32b   :  { %v2251_v58 = vmul.f32 %v2681_v37, %v2247_v19  ;;  %v2264_v14 = vmul.f32 %v2682_v16, %v2263_v32  ;;  %v2252_v48 = vadd.f32 %v2248_v13, %v2224_v2  ;;  %v2265_v9 = vmul.f32 %v2683_v35, %v2263_v32 }
 0x32c   :  { %v2266_v21 = vmul.f32 %v2684_v6, %v2263_v32  ;;  %v2267_v34 = vmul.f32 %v2685_v41, %v2263_v32  ;;  %v2253_v40 = vadd.f32 %v2249_v8, %v2225_v33  ;;  %v2254_v61 = vadd.f32 %v2250_v1, %v2226_v4 }
 0x32d   :  { %v2255_v46 = vadd.f32 %v2251_v58, %v2227_v43  ;;  %v2275_v12 = vrot.slane %v3747_v7, %v4101_v60  ;;  %v2268_v44 = vadd.f32 %v2264_v14, %v2240_v39  ;;  %v2269_v28 = vadd.f32 %v2265_v9, %v2241_v15 }
 0x32e   :  { %v2270_v11 = vadd.f32 %v2266_v21, %v2242_v55  ;;  %v2271_v38 = vadd.f32 %v2267_v34, %v2243_v31 }
 0x32f   :  { %v2276_v53 = vmul.f32 %v2682_v16, %v2275_v12  ;;  %v2277_v59 = vmul.f32 %v2683_v35, %v2275_v12  ;;  %v2278_v0 = vmul.f32 %v2684_v6, %v2275_v12  ;;  %v2279_v52 = vmul.f32 %v2685_v41, %v2275_v12 }
 0x331   :  { %v2280_v37 = vadd.f32 %v2276_v53, %v2252_v48  ;;  %v2281_v19 = vadd.f32 %v2277_v59, %v2253_v40  ;;  %v2282_v18 = vadd.f32 %v2278_v0, %v2254_v61  ;;  %v2283_v62 = vadd.f32 %v2279_v52, %v2255_v46 }
 0x333   :  { %v2284_v49 = vsub.f32 %v2268_v44, %v2281_v19  ;;  %v2285_v32 = vadd.f32 %v2280_v37, %v2269_v28  ;;  %v2286_v10 = vsub.f32 %v2270_v11, %v2283_v62  ;;  %v2287_v50 = vadd.f32 %v2282_v18, %v2271_v38 }
 0x335   :  { %v2288_v23 = vmul.f32 %v2284_v49, %v3745_v36  ;;  %v2289_v60 = vmul.f32 %v2285_v32, %v3747_v7  ;;  %v2298_v2 = vmul.f32 %v2286_v10, %v3745_v36  ;;  %v2299_v51 = vmul.f32 %v2287_v50, %v3747_v7 }
 0x336   :  { %v2308_v24 = vmul.f32 %v2285_v32, %v3745_v36  ;;  %v2309_v17 = vmul.f32 %v2284_v49, %v3747_v7  ;;  %v2312_v16 = vmul.f32 %v2287_v50, %v3745_v36  ;;  %v2313_v33 = vmul.f32 %v2286_v10, %v3747_v7 }
 0x337   :  { %v2290_v4 = vadd.f32 %v2289_v60, %v2288_v23  ;;  %v2300_v43 = vadd.f32 %v2299_v51, %v2298_v2 }
 0x338   :  { %v2310_v39 = vsub.f32 %v2308_v24, %v2309_v17  ;;  %v2314_v35 = vsub.f32 %v2312_v16, %v2313_v33 }
 0x339   :  { %v2291_v6 = vsel %vm616_vm3, %v2290_v4, 0.0  ;;  %v2301_v41 = vsel %vm616_vm3, %v2300_v43, 0.0 }
 0x33a   :  { %v2292_v15 = vrot.slane %v2291_v6, 4  ;;  %v2302_v55 = vrot.slane %v2301_v41, 4  ;;  %v2311_v21 = vmul.f32 2.0, %v2310_v39  ;;  %v2315_v34 = vmul.f32 2.0, %v2314_v35 }
 0x33c   :  { %v2293_v31 = vadd.f32 %v2292_v15, %v2291_v6  ;;  %v2303_v13 = vadd.f32 %v2302_v55, %v2301_v41 }
 0x33e   :  { %v2294_v8 = vrot.slane %v2293_v31, 2  ;;  %v2304_v1 = vrot.slane %v2303_v13, 2 }
 0x340   :  { %v2295_v58 = vadd.f32 %v2294_v8, %v2293_v31  ;;  %v2305_v14 = vadd.f32 %v2304_v1, %v2303_v13 }
 0x342   :  { %v2296_v48 = vrot.slane %v2295_v58, 1  ;;  %v2306_v36 = vrot.slane %v2305_v14, 1 }
 0x344   :  { %v2297_v9 = vadd.f32 %v2296_v48, %v2295_v58  ;;  %v2307_v7 = vadd.f32 %v2306_v36, %v2305_v14 }
 0x346   :  { %2839 = vrcp.f32 %v2307_v7  ;;  %v2320_v40 = vmul.f32 %v2311_v21, %v2307_v7  ;;  %v2321_v61 = vmul.f32 %v2315_v34, %v2297_v9 }
 0x348   :  { %v2322_v46 = vsub.f32 %v2320_v40, %v2321_v61 }
 0x353   :  { %v2840_v12 = vpop.eup %2839 }
 0x354   :  { %v2317_v44 = vmul.f32 %v2840_v12, %v2307_v7 }
 0x356   :  { %v2318_v28 = vsub.f32 2.0, %v2317_v44 }
 0x358   :  { %v2319_v11 = vmul.f32 %v2840_v12, %v2318_v28 }
 0x35a   :  { %v2323_v38 = vmul.f32 %v2319_v11, %v2319_v11 }
 0x35c   :  { %v2324_v53 = vmul.f32 %v2323_v38, %v2322_v46 }
 0x3cf   :  { %v2776_v59 = vpop.f32.mrf.mxu0  ;;  %v2784_v0 = vpop.f32.mrf.mxu1 }
 0x3d0   :  { %v1932_v52 = vadd.f32 %v2776_v59, %v4107_v57 }
 0x3d1   :  { %v1912_v37 = vpop.f32.mrf.mxu0  ;;  %v2017_v19 = vpop.f32.mrf.mxu1 }
 0x3d2   :  { %v1931_v18 = vadd.f32 %v1912_v37, %v4108_v5  ;;  %v2037_v62 = vadd.f32 %v2784_v0, %v1932_v52 }
 0x3d3   :  { %v2779_v49 = vpop.f32.mrf.mxu0  ;;  %v2787_v32 = vpop.f32.mrf.mxu1 }
 0x3d4   :  { %v2041_v10 = vmax.f32 %v2037_v62, 0.0  ;;  %v1934_v50 = vadd.f32 %v2779_v49, %v4109_v63  ;;  %v2036_v23 = vadd.f32 %v2017_v19, %v1931_v18 }
 0x3d5   :  { %v1922_v60 = vpop.f32.mrf.mxu0  ;;  %v2027_v17 = vpop.f32.mrf.mxu1 }
 0x3d6   :  { %v2040_v2 = vmax.f32 %v2036_v23, 0.0  ;;  %v1933_v51 = vadd.f32 %v1922_v60, %v3453_v30  ;;  %v2039_v24 = vadd.f32 %v2787_v32, %v1934_v50  ;;  %v2045_v16 = vmul.f32 %v2041_v10, %v3468_v56 }
 0x3d8   :  { %v2044_v57 = vmul.f32 %v2040_v2, %v3463_v22  ;;  %v2043_v33 = vmax.f32 %v2039_v24, 0.0  ;;  %v2038_v4 = vadd.f32 %v2027_v17, %v1933_v51  ;;  %v2049_v39 = vsel %vm616_vm3, %v2045_v16, 0.0 }
 0x3da   :  { %v2048_v5 = vsel %vm616_vm3, %v2044_v57, 0.0  ;;  %v2042_v43 = vmax.f32 %v2038_v4, 0.0  ;;  %v2047_v63 = vmul.f32 %v2043_v33, %v3476_v27 }
 0x3db   :  { %v2050_v6 = vadd.f32 %v2049_v39, %v2048_v5 }
 0x3dc   :  { %v2046_v35 = vmul.f32 %v2042_v43, %v3474_v29  ;;  %v2053_v15 = vsel %vm616_vm3, %v2047_v63, 0.0 }
 0x3de   :  { %v2051_v30 = vsel %vm616_vm3, %v2046_v35, 0.0 }
 0x3df   :  { %v2052_v41 = vadd.f32 %v2051_v30, %v2050_v6 }
 0x3e1   :  { %v2054_v56 = vadd.f32 %v2053_v15, %v2052_v41 }
 0x3e3   :  { %v2055_v55 = vrot.slane %v2054_v56, 4 }
 0x3e5   :  { %v2056_v22 = vadd.f32 %v2055_v55, %v2054_v56 }
 0x3e7   :  { %v2057_v31 = vrot.slane %v2056_v22, 2 }
 0x3e9   :  { %v2058_v13 = vadd.f32 %v2057_v31, %v2056_v22 }
 0x3eb   :  { %v2059_v8 = vrot.slane %v2058_v13, 1 }
 0x3ed   :  { %v2060_v1 = vadd.f32 %v2059_v8, %v2058_v13 }
 0x3ef   :  { %v2061_v58 = vadd.f32 %v2060_v1, %v3487_v42 }
 0x3f1   :  { %v2657_v14 = vmul.f32 -1.442695, %v2061_v58 }
 0x3f3   :  { %2841 = vpow2.f32 %v2657_v14 }
 0x400   :  { %v2842_v27 = vpop.eup %2841 }
 0x401   :  { %v2065_v48 = vadd.f32 1.0, %v2842_v27 }
 0x403   :  { %2843 = vrcp.f32 %v2065_v48 }
 0x410   :  { %v2844_v29 = vpop.eup %2843 }
 0x411   :  { %2327 = vst.msk [vmem:[%s3987_s10 + $0x2] sm:$0x1] %vm912_vm4, %v2844_v29  ;;  %v2328_v36 = vmul.f32 %v2844_v29, %v2324_v53 }
 0x413   :  { %v3937_v9 = vsub.f32 %v3707_v54, %v2328_v36 }
 0x415   :  { %v2333_v7 = vand.u32 2139095040, %v3937_v9  ;;  %v2330_v40 = vand.u32 2147483647, %v3937_v9  ;;  %vm2332_vm0 = vcmp.lt.s32.totalorder %v3937_v9, 0 }
 0x417   :  { %v2334_v21 = vshrl.u32 %v2333_v7, 23  ;;  %v2337_v12 = vand.u32 8388607, %v2330_v40  ;;  %vm2331_vm2 = vcmp.le.f32.partialorder %v2330_v40, 0.7853982 }
 0x419   :  { %v2686_v34 = vadd.s32 4294967169, %v2334_v21  ;;  %v2338_v62 = vor.u32 8388608, %v2337_v12 }
 0x41b   :  { %v2340_v42 = vadd.s32 1, %v2686_v34 }
 0x41d   :  { %vm2341_vm1 = vcmp.gt.s32.totalorder %v2340_v42, 0 }
 0x41e   :  { %v2342_v61 = vsel %vm2341_vm1, %v2340_v42, 0  ;;  %vm2422_vm1 = vweird.f32 %v3937_v9 }
 0x41f   :  { %v2344_v46 = vand.u32 31, %v2342_v61  ;;  %v2343_v28 = vshrl.u32 %v2342_v61, 5 }
 0x421   :  { %v2345_v44 = vsub.s32 32, %v2344_v46  ;;  %v2347_v11 = vshll.u32 %v4078_v3, %v2344_v46  ;;  %v2350_v54 = vshll.u32 %v4079_v26, %v2344_v46  ;;  %v2353_v59 = vshll.u32 %v4080_v47, %v2344_v46 }
 0x422   :  { %v2356_v52 = vshll.u32 %v4081_v20, %v2344_v46  ;;  %v2359_v19 = vshll.u32 %v4082_v25, %v2344_v46  ;;  %vm2362_vm4 = vcmp.lt.s32.totalorder %v2343_v28, 1  ;;  %vm2365_vm11 = vcmp.lt.s32.totalorder %v2343_v28, 4 }
 0x423   :  { %v2348_v38 = vshrl.u32 %v4079_v26, %v2345_v44  ;;  %v2351_v53 = vshrl.u32 %v4080_v47, %v2345_v44  ;;  %v2354_v0 = vshrl.u32 %v4081_v20, %v2345_v44  ;;  %v2357_v37 = vshrl.u32 %v4082_v25, %v2345_v44 }
 0x424   :  { %v2360_v18 = vshrl.u32 %v4083_v45, %v2345_v44  ;;  %v2346_v2 = vshrl.u32 %v4078_v3, %v2345_v44  ;;  %vm2364_vm12 = vcmp.lt.s32.totalorder %v2343_v28, 3  ;;  %vm2363_vm13 = vcmp.lt.s32.totalorder %v2343_v28, 2 }
 0x425   :  { %v2349_v49 = vor.u32 %v2348_v38, %v2347_v11  ;;  %v2352_v32 = vor.u32 %v2351_v53, %v2350_v54  ;;  %v2355_v10 = vor.u32 %v2354_v0, %v2353_v59  ;;  %v2358_v50 = vor.u32 %v2357_v37, %v2356_v52 }
 0x426   :  { %v2361_v26 = vor.u32 %v2360_v18, %v2359_v19  ;;  %v2378_v45 = vshll.u32 %v2338_v62, 8 }
 0x427   :  { %v2367_v23 = vsel %vm2365_vm11, %v2355_v10, 2102212464  ;;  %v2370_v47 = vsel %vm2362_vm4, %v2349_v49, %v2352_v32  ;;  %v2374_v60 = vsel %vm2362_vm4, %v2352_v32, %v2355_v10  ;;  %v2371_v20 = vsel %vm2365_vm11, %v2358_v50, 920167782 }
 0x428   :  { %v2375_v51 = vsel %vm2365_vm11, %v2361_v26, 1326507024  ;;  %v2372_v25 = vsel %vm2364_vm12, %v2355_v10, %v2371_v20  ;;  %v2366_v17 = vsel %vm2362_vm4, %v2346_v2, %v2349_v49  ;;  %v2368_v16 = vsel %vm2364_vm12, %v2352_v32, %v2367_v23 }
 0x429   :  { %v2376_v24 = vsel %vm2364_vm12, %v2358_v50, %v2375_v51  ;;  %v2373_v57 = vsel %vm2363_vm13, %v2370_v47, %v2372_v25  ;;  %v2369_v63 = vsel %vm2363_vm13, %v2366_v17, %v2368_v16 }
 0x42a   :  { %v2377_v33 = vsel %vm2363_vm13, %v2374_v60, %v2376_v24  ;;  %v3957_v43 = vmul.u32.u64.low %v2378_v45, %v2373_v57  ;;  %v3958_v39 = vmul.u32.u64.high %v2378_v45, %v2373_v57, %v3957_v43  ;;  %v2385_v35 = vmul.u32 %v2378_v45, %v2369_v63 }
 0x42b   :  { %v3954_v4 = vmul.u32.u64.low %v2378_v45, %v2377_v33  ;;  %v3955_v5 = vmul.u32.u64.high %v2378_v45, %v2377_v33, %v3954_v4 }
 0x42c   :  { %v2388_v3 = vadd.s32 1, %v3958_v39 }
 0x42d   :  { %vm2387_vm14 = vc.u32 %v3955_v5, %v3957_v43  ;;  %v2386_v58 = vadd.s32 %v3957_v43, %v3955_v5 }
 0x42e   :  { %v2389_v6 = vsel %vm2387_vm14, %v2388_v3, %v3958_v39 }
 0x42f   :  { %v2390_v30 = vadd.s32 %v2389_v6, %v2385_v35 }
 0x431   :  { %v2391_v41 = vadd.s32 536870912, %v2390_v30 }
 0x433   :  { %v2392_v15 = vshrl.u32 %v2391_v41, 30 }
 0x435   :  { %v2393_v56 = vshll.u32 %v2392_v15, 30  ;;  %v2416_v44 = vsub.s32 4, %v2392_v15 }
 0x437   :  { %v2394_v55 = vsub.s32 %v2390_v30, %v2393_v56  ;;  %v2417_v54 = vsel %vm2332_vm0, %v2416_v44, %v2392_v15 }
 0x438   :  { %v2419_v38 = vsel %vm2331_vm2, 0, %v2417_v54 }
 0x439   :  { %v2396_v22 = vsub.s32 0, %v2394_v55  ;;  %v2527_v53 = vadd.s32 3, %v2419_v38  ;;  %v2423_v59 = vand.u32 3, %v2419_v38 }
 0x43b   :  { %v2687_v31 = vmin.u32 %v2396_v22, %v2394_v55  ;;  %v2528_v0 = vand.u32 3, %v2527_v53  ;;  %vm2428_vm5 = vcmp.eq.s32.totalorder %v2423_v59, 2  ;;  %vm2425_vm7 = vcmp.eq.s32.totalorder %v2423_v59, 0 }
 0x43c   :  { %vm2424_vm9 = vcmp.lt.s32.totalorder %v2423_v59, 2 }
 0x43d   :  { %v2398_v13 = vclz %v2687_v31  ;;  %vm2533_vm6 = vcmp.eq.s32.totalorder %v2528_v0, 2  ;;  %vm2530_vm8 = vcmp.eq.s32.totalorder %v2528_v0, 0  ;;  %vm2529_vm10 = vcmp.lt.s32.totalorder %v2528_v0, 2 }
 0x43f   :  { %v2688_v8 = vadd.s32 4294967294, %v2398_v13 }
 0x441   :  { %vm2689_vm15 = vcmp.lt.s32.totalorder %v2688_v8, 0 }
 0x442   :  { %v2401_v1 = vsel %vm2689_vm15, 0, %v2688_v8 }
 0x443   :  { %v2402_v14 = vsub.s32 32, %v2401_v1  ;;  %v2406_v27 = vsub.s32 4294967266, %v2401_v1  ;;  %v2403_v48 = vshll.u32 %v2394_v55, %v2401_v1 }
 0x445   :  { %v2404_v29 = vshrl.u32 %v2386_v58, %v2402_v14  ;;  %v2407_v36 = vadd.s32 127, %v2406_v27 }
 0x447   :  { %v2405_v7 = vor.u32 %v2404_v29, %v2403_v48  ;;  %v2408_v21 = vshll.u32 %v2407_v36, 23 }
 0x449   :  { %v2409_v34 = vor.u32 4788187, %v2408_v21  ;;  %v2412_v61 = vcvt.s32.f32 %v2405_v7 }
 0x44b   :  { %v2410_v42 = vand.u32 2147483647, %v2409_v34 }
 0x44d   :  { %v2413_v46 = vmul.f32 %v2412_v61, %v2410_v42 }
 0x44f   :  { %v2414_v12 = vxor.u32 2147483648, %v2413_v46 }
 0x451   :  { %v2415_v28 = vsel %vm2332_vm0, %v2414_v12, %v2413_v46 }
 0x452   :  { %v2418_v11 = vsel %vm2331_vm2, %v3937_v9, %v2415_v28 }
 0x453   :  { %2845 = vcosq.f32 %v2418_v11 }
 0x454   :  { %2847 = vsinq.f32 %v2418_v11 }
 0x460   :  { %v2846_v52 = vpop.eup %2845 }
 0x461   :  { %v2848_v37 = vpop.eup %2847  ;;  %v2429_v19 = vxor.u32 2147483648, %v2846_v52 }
 0x462   :  { %v2426_v18 = vxor.u32 2147483648, %v2848_v37 }
 0x463   :  { %v2430_v62 = vsel %vm2428_vm5, %v2429_v19, %v2848_v37  ;;  %v2535_v40 = vsel %vm2533_vm6, %v2429_v19, %v2848_v37 }
 0x464   :  { %v2427_v49 = vsel %vm2425_vm7, %v2846_v52, %v2426_v18  ;;  %v2532_v32 = vsel %vm2530_vm8, %v2846_v52, %v2426_v18 }
 0x465   :  { %v2431_v10 = vsel %vm2424_vm9, %v2427_v49, %v2430_v62  ;;  %v2536_v50 = vsel %vm2529_vm10, %v2532_v32, %v2535_v40 }
 0x466   :  { %v2432_v26 = vsel %vm2422_vm1, nan, %v2431_v10  ;;  %v2537_v23 = vsel %vm2422_vm1, nan, %v2536_v50 }
 0x467   :  { %2433 = vst.msk [vmem:[%s3986_s9 + $0x30] sm:$0xff] %vm616_vm3, %v2432_v26  ;;  %2538 = vst.msk [vmem:[%s3986_s9 + $0x38] sm:$0xff] %vm616_vm3, %v2537_v23 }

</bundles_post_ra>
